<compile_context>
chip_gen: v5e
topology: v5e:2x2
jax: 0.10.0
libtpu: 0.0.40
codegen_flags: <defaults>
</compile_context>

<pallas_src>
import functools

import jax
import jax.numpy as jnp
from jax.experimental import pallas as pl
from jax.experimental.pallas import tpu as pltpu


# ----------------------------------------------------------------------------
# Kernel: one GATConv layer (all heads fused), tiled over destination nodes.
# ----------------------------------------------------------------------------
def _gat_layer_kernel(*refs, heads, c, fuse_bn_elu):
    if fuse_bn_elu:
        (x_ref, xd_ref, w_ref, asrc_ref, adst_ref, bias_ref,
         bns_ref, bnb_ref, mb_ref, o_ref) = refs
    else:
        (x_ref, xd_ref, w_ref, asrc_ref, adst_ref, bias_ref,
         mb_ref, o_ref) = refs
        bns_ref = bnb_ref = None

    f32, bf16 = jnp.float32, jnp.bfloat16
    w = w_ref[...]                                        # (Fin_p, HC_p) bf16

    # Project every source row (needed for alpha_src + aggregation) and this
    # tile's destination rows.  Cheap recompute per grid step (K is small);
    # dst projection shares the weights (x_target = x[:n_dst] in the module).
    xs = jnp.dot(x_ref[...].astype(bf16), w, preferred_element_type=f32)
    xs_bf = xs.astype(bf16)                               # (N_src_p, HC_p)
    xd = jnp.dot(xd_ref[...].astype(bf16), w, preferred_element_type=f32)

    # alpha_src for ALL heads: one block-diagonal MXU matmul -> (H_p, N_src_p)
    alpha_src = jax.lax.dot_general(
        asrc_ref[...], xs_bf, dimension_numbers=(((1,), (1,)), ((), ())),
        preferred_element_type=f32)
    # alpha_dst for ALL heads: one block-diagonal MXU matmul -> (T, H_p)
    alpha_dst = jax.lax.dot_general(
        xd.astype(bf16), adst_ref[...],
        dimension_numbers=(((1,), (1,)), ((), ())),
        preferred_element_type=f32)

    mb = mb_ref[...].astype(f32)                          # (T, N_src_p)
    # A dst row with no incoming edge is all -1e30 -> bias-only output.
    valid = (jnp.max(mb, axis=-1, keepdims=True) > -1e29).astype(f32)

    bias = bias_ref[...]                                  # (1, HC_p) f32
    if fuse_bn_elu:
        bns = bns_ref[...]
        bnb = bnb_ref[...]

    # Zero the whole tile first so padded lanes (> heads*c) are defined, then
    # write each head's result straight into its lane offsets (no concat).
    o_ref[...] = jnp.zeros_like(o_ref)
    for h in range(heads):                                # static unroll
        lo, hi = h * c, (h + 1) * c
        s = alpha_dst[:, h:h + 1] + alpha_src[h:h + 1, :]   # (T, N_src_p)
        s = jnp.where(s >= 0.0, s, 0.2 * s)                  # LeakyReLU(0.2)
        s = s + mb                                           # additive mask
        m = jnp.max(s, axis=-1, keepdims=True)
        p = jnp.exp(s - m)                                   # masked -> 0
        denom = jnp.sum(p, axis=-1, keepdims=True)
        p = p * pl.reciprocal(denom)                         # exact division
        agg = jnp.dot(p.astype(bf16), xs_bf[:, lo:hi],
                      preferred_element_type=f32)            # (T, C)
        res = valid * agg + bias[:, lo:hi]
        if fuse_bn_elu:
            res = res * bns[:, lo:hi] + bnb[:, lo:hi]        # eval BatchNorm
            res = jnp.where(res > 0.0, res,
                            jnp.exp(jnp.minimum(res, 0.0)) - 1.0)   # ELU
        o_ref[:, lo:hi] = res


# ----------------------------------------------------------------------------
# One GATConv layer = one pallas_call, grid over dst tiles ("parallel").
# ----------------------------------------------------------------------------
def _gat_conv_layer(x_full, w, asrc_blk, adst_blk, bias, mask_bias, *,
                    heads, c, tile_dst, bn_scale=None, bn_shift=None):
    n_src_p, fin_p = x_full.shape
    hc_p = w.shape[1]
    n_dst_p = mask_bias.shape[0]
    assert mask_bias.shape[1] == n_src_p
    assert n_dst_p % tile_dst == 0 and n_dst_p <= n_src_p
    fuse_bn = bn_scale is not None

    kernel = functools.partial(_gat_layer_kernel, heads=heads, c=c,
                               fuse_bn_elu=fuse_bn)

    def const_spec(shape):                 # stays VMEM-resident across steps
        return pl.BlockSpec(shape, lambda i: (0, 0))

    inputs = [x_full, x_full, w, asrc_blk, adst_blk, bias]
    in_specs = [const_spec(x_full.shape),
                pl.BlockSpec((tile_dst, fin_p), lambda i: (i, 0)),  # dst rows
                const_spec(w.shape), const_spec(asrc_blk.shape),
                const_spec(adst_blk.shape), const_spec(bias.shape)]
    if fuse_bn:
        inputs += [bn_scale, bn_shift]
        in_specs += [const_spec(bn_scale.shape), const_spec(bn_shift.shape)]
    inputs.append(mask_bias)
    in_specs.append(pl.BlockSpec((tile_dst, n_src_p), lambda i: (i, 0)))

    return pl.pallas_call(
        kernel,
        out_shape=jax.ShapeDtypeStruct((n_dst_p, hc_p), jnp.float32),
        grid_spec=pltpu.PrefetchScalarGridSpec(
            num_scalar_prefetch=0,
            grid=(n_dst_p // tile_dst,),
            in_specs=in_specs,
            out_specs=pl.BlockSpec((tile_dst, hc_p), lambda i: (i, 0))),
        compiler_params=pltpu.CompilerParams(
            dimension_semantics=("parallel",),
            vmem_limit_bytes=32 * 1024 * 1024),
    )(*inputs)


# ----------------------------------------------------------------------------
# Plain-JAX host-side glue (padding, mask construction, parameter folding)
# ----------------------------------------------------------------------------
def _round_up(v, m):
    return ((v + m - 1) // m) * m


def _pad2(a, rows, cols):
    r, c = a.shape
    return jnp.pad(a, ((0, rows - r), (0, cols - c)))


def _block_diag_att(att, rows_pad, cols_pad):
    """(H, C) per-head att vector -> padded (rows_pad, cols_pad) block-diag."""
    h, c = att.shape
    eye = jnp.eye(h, dtype=att.dtype)
    blk = (eye[:, :, None] * att[None, :, :]).reshape(h, h * c)
    return _pad2(blk, rows_pad, cols_pad)


def edge_index_to_mask_bias(edge_index, n_dst_pad, n_src_pad):
    """edge_index[2, E] -> bf16 additive softmax bias at padded shape.

    log(edge multiplicity) on existing edges (exact parallel-edge handling,
    matching PyG's scatter softmax), -1e30 elsewhere (exp underflows to 0
    after the row-max subtraction).  Padded rows/cols are fully masked.
    """
    src, dst = edge_index[0], edge_index[1]
    cnt = jnp.zeros((n_dst_pad, n_src_pad), jnp.float32).at[dst, src].add(1.0)
    bias = jnp.where(cnt > 0.0, jnp.log(jnp.maximum(cnt, 1.0)),
                     jnp.float32(-1e30))
    return bias.astype(jnp.bfloat16)


def gat_forward(x, adjs, params, *, tile_dst1=64, tile_dst2=8):
    (ei1, size1), (ei2, size2) = adjs
    n0, fin = x.shape
    n1, n2 = size1[1], size2[1]
    g1, g2, bn = params["gat1"], params["gat2"], params["bn"]
    heads, c1 = g1["att_src"].shape
    c2 = g2["w"].shape[1]

    # Padded geometry: lane axes (feature widths, mask src columns) -> x128;
    # dst rows -> multiple of the dst tile (and >=2 tiles for v7x megacore).
    fin_p = _round_up(fin, 128)
    hc1_p = _round_up(heads * c1, 128)
    c2_p = _round_up(c2, 128)
    n0_p = _round_up(n0, 128)                 # layer-1 src (mask1 lane axis)
    n1_p = _round_up(n1, 128)                 # layer-1 dst AND layer-2 src
    n2_p = _round_up(max(n2, 2 * tile_dst2), tile_dst2)
    assert n1_p % tile_dst1 == 0 and n1_p <= n0_p and n2_p <= n1_p

    # ---- parameters: pad, cast MXU operands to bf16, fold eval BatchNorm ----
    x_p = _pad2(x.astype(jnp.float32), n0_p, fin_p)

    w1 = _pad2(g1["w"], fin_p, hc1_p).astype(jnp.bfloat16)
    w2 = _pad2(g2["w"], hc1_p, c2_p).astype(jnp.bfloat16)

    asrc1 = _block_diag_att(g1["att_src"], 8, hc1_p).astype(jnp.bfloat16)
    adst1 = _block_diag_att(g1["att_dst"], 8, hc1_p).astype(jnp.bfloat16)
    asrc2 = _block_diag_att(g2["att_src"], 8, c2_p).astype(jnp.bfloat16)
    adst2 = _block_diag_att(g2["att_dst"], 8, c2_p).astype(jnp.bfloat16)

    b1 = _pad2(g1["bias"], 1, hc1_p)
    b2 = _pad2(g2["bias"], 1, c2_p)

    bn_scale = bn["gamma"] * jax.lax.rsqrt(bn["var"] + 1e-5)
    bn_shift = bn["beta"] - bn["mean"] * bn_scale
    bn_scale = _pad2(bn_scale, 1, hc1_p)
    bn_shift = _pad2(bn_shift, 1, hc1_p)

    mb1 = edge_index_to_mask_bias(ei1, n1_p, n0_p)        # (N1p, N0p) bf16
    mb2 = edge_index_to_mask_bias(ei2, n2_p, n1_p)        # (N2p, N1p) bf16

    # Layer 1: GATConv(in_dim -> hid, heads=H, concat=True) + BN(eval) + ELU.
    h1 = _gat_conv_layer(x_p, w1, asrc1, adst1, b1, mb1,
                         heads=heads, c=c1, tile_dst=tile_dst1,
                         bn_scale=bn_scale, bn_shift=bn_shift)
    # F.dropout(training=False) -> identity.

    # Layer 2: GATConv(H*hid -> out_dim, heads=1).
    out_p = _gat_conv_layer(h1, w2, asrc2, adst2, b2, mb2,
                            heads=1, c=c2, tile_dst=tile_dst2)
    return out_p[:n2, :c2]


# ----------------------------------------------------------------------------
# Deterministic parameter init + example run
# ----------------------------------------------------------------------------
def init_params(key, in_dim, hid_dim, out_dim, heads):
    ks = jax.random.split(key, 6)
    d = heads * hid_dim
    return {
        "gat1": {
            "w": 0.1 * jax.random.normal(ks[0], (in_dim, d), jnp.float32),
            "att_src": 0.1 * jax.random.normal(ks[1], (heads, hid_dim), jnp.float32),
            "att_dst": 0.1 * jax.random.normal(ks[2], (heads, hid_dim), jnp.float32),
            "bias": jnp.zeros((1, d), jnp.float32),
        },
        "gat2": {
            "w": 0.1 * jax.random.normal(ks[3], (d, out_dim), jnp.float32),
            "att_src": 0.1 * jax.random.normal(ks[4], (1, out_dim), jnp.float32),
            "att_dst": 0.1 * jax.random.normal(ks[5], (1, out_dim), jnp.float32),
            "bias": jnp.zeros((1, out_dim), jnp.float32),
        },
        "bn": {
            "gamma": jnp.ones((1, d), jnp.float32),
            "beta": jnp.zeros((1, d), jnp.float32),
            "mean": jnp.zeros((1, d), jnp.float32),
            "var": jnp.ones((1, d), jnp.float32),
        },
    }


def make_edge_index(key, n_src, n_dst, n_extra):
    # self edges (j -> j) guarantee every target has >= 1 incoming edge
    self_idx = jnp.arange(n_dst, dtype=jnp.int32)
    k1, k2 = jax.random.split(key)
    rnd_src = jax.random.randint(k1, (n_extra,), 0, n_src, jnp.int32)
    rnd_dst = jax.random.randint(k2, (n_extra,), 0, n_dst, jnp.int32)
    src = jnp.concatenate([self_idx, rnd_src])
    dst = jnp.concatenate([self_idx, rnd_dst])
    return jnp.stack([src, dst], axis=0)  # [2, E]


if __name__ == "__main__":
    in_dim, hid_dim, out_dim, heads = 32, 16, 8, 4
    n0, n1, n2 = 40, 24, 8          # sampled node counts per hop (mini-batch)

    key = jax.random.PRNGKey(0)
    kx, ke1, ke2, kp = jax.random.split(key, 4)

    x = jax.random.normal(kx, (n0, in_dim), jnp.float32)
    edge_index_1 = make_edge_index(ke1, n0, n1, 64)   # [2, 88]
    edge_index_2 = make_edge_index(ke2, n1, n2, 32)   # [2, 40]
    adjs = [(edge_index_1, (n0, n1)), (edge_index_2, (n1, n2))]

    params = init_params(kp, in_dim, hid_dim, out_dim, heads)

    out = jax.block_until_ready(gat_forward(x, adjs, params))

    assert out.shape == (n2, out_dim), out.shape
    assert bool(jnp.all(jnp.isfinite(out)))
    print("KERNEL_OK")
</pallas_src>

<mosaic_0001>
module attributes {stable_mosaic.version = 11 : i64} {
  func.func @_gat_layer_kernel(%arg0: i32, %arg1: memref<128x128xf32, #tpu.memory_space<vmem>>, %arg2: memref<64x128xf32, #tpu.memory_space<vmem>>, %arg3: memref<128x128xbf16, #tpu.memory_space<vmem>>, %arg4: memref<8x128xbf16, #tpu.memory_space<vmem>>, %arg5: memref<8x128xbf16, #tpu.memory_space<vmem>>, %arg6: memref<1x128xf32, #tpu.memory_space<vmem>>, %arg7: memref<1x128xf32, #tpu.memory_space<vmem>>, %arg8: memref<1x128xf32, #tpu.memory_space<vmem>>, %arg9: memref<64x128xbf16, #tpu.memory_space<vmem>>, %arg10: memref<64x128xf32, #tpu.memory_space<vmem>>) attributes {dimension_semantics = [#tpu.dimension_semantics<parallel>], iteration_bounds = array<i64: 2>, scalar_prefetch = 0 : i64, scratch_operands = 0 : i64, tpu.core_type = #tpu.core_type<tc>, window_params = [{pipeline_mode = #tpu.pipeline_mode<synchronous>, transform_indices = @transform_0, window_bounds = array<i64: 128, 128>}, {transform_indices = @transform_1, window_bounds = array<i64: 64, 128>}, {pipeline_mode = #tpu.pipeline_mode<synchronous>, transform_indices = @transform_2, window_bounds = array<i64: 128, 128>}, {pipeline_mode = #tpu.pipeline_mode<synchronous>, transform_indices = @transform_3, window_bounds = array<i64: 8, 128>}, {pipeline_mode = #tpu.pipeline_mode<synchronous>, transform_indices = @transform_4, window_bounds = array<i64: 8, 128>}, {pipeline_mode = #tpu.pipeline_mode<synchronous>, transform_indices = @transform_5, window_bounds = array<i64: 1, 128>}, {pipeline_mode = #tpu.pipeline_mode<synchronous>, transform_indices = @transform_6, window_bounds = array<i64: 1, 128>}, {pipeline_mode = #tpu.pipeline_mode<synchronous>, transform_indices = @transform_7, window_bounds = array<i64: 1, 128>}, {transform_indices = @transform_8, window_bounds = array<i64: 64, 128>}, {transform_indices = @transform_9, window_bounds = array<i64: 64, 128>}]} {
    %c0 = arith.constant 0 : index
    %c0_0 = arith.constant 0 : index
    %0 = vector.load %arg3[%c0, %c0_0] : memref<128x128xbf16, #tpu.memory_space<vmem>>, vector<128x128xbf16>
    %c0_1 = arith.constant 0 : index
    %c0_2 = arith.constant 0 : index
    %1 = vector.load %arg1[%c0_1, %c0_2] : memref<128x128xf32, #tpu.memory_space<vmem>>, vector<128x128xf32>
    %2 = arith.truncf %1 : vector<128x128xf32> to vector<128x128xbf16>
    %cst = arith.constant dense<0.000000e+00> : vector<128x128xf32>
    %3 = tpu.matmul %2, %0, %cst {dimension_numbers = #tpu.dot_dimension_numbers<[1], [0], [0], [1], [0, 0, 1, 1], [], []>} : vector<128x128xbf16>, vector<128x128xbf16>, vector<128x128xf32> -> vector<128x128xf32>
    %4 = arith.truncf %3 : vector<128x128xf32> to vector<128x128xbf16>
    %c0_3 = arith.constant 0 : index
    %c0_4 = arith.constant 0 : index
    %5 = vector.load %arg2[%c0_3, %c0_4] : memref<64x128xf32, #tpu.memory_space<vmem>>, vector<64x128xf32>
    %6 = arith.truncf %5 : vector<64x128xf32> to vector<64x128xbf16>
    %cst_5 = arith.constant dense<0.000000e+00> : vector<64x128xf32>
    %7 = tpu.matmul %6, %0, %cst_5 {dimension_numbers = #tpu.dot_dimension_numbers<[1], [0], [0], [1], [0, 0, 1, 1], [], []>} : vector<64x128xbf16>, vector<128x128xbf16>, vector<64x128xf32> -> vector<64x128xf32>
    %c0_6 = arith.constant 0 : index
    %c0_7 = arith.constant 0 : index
    %8 = vector.load %arg4[%c0_6, %c0_7] : memref<8x128xbf16, #tpu.memory_space<vmem>>, vector<8x128xbf16>
    %cst_8 = arith.constant dense<0.000000e+00> : vector<8x128xf32>
    %9 = tpu.matmul %8, %4, %cst_8 {dimension_numbers = #tpu.dot_dimension_numbers<[1], [1], [0], [0], [0, 0, 1, 0], [], []>} : vector<8x128xbf16>, vector<128x128xbf16>, vector<8x128xf32> -> vector<8x128xf32>
    %10 = arith.truncf %7 : vector<64x128xf32> to vector<64x128xbf16>
    %c0_9 = arith.constant 0 : index
    %c0_10 = arith.constant 0 : index
    %11 = vector.load %arg5[%c0_9, %c0_10] : memref<8x128xbf16, #tpu.memory_space<vmem>>, vector<8x128xbf16>
    %cst_11 = arith.constant dense<0.000000e+00> : vector<64x8xf32>
    %12 = tpu.matmul %10, %11, %cst_11 {dimension_numbers = #tpu.dot_dimension_numbers<[1], [1], [0], [0], [0, 0, 1, 0], [], []>} : vector<64x128xbf16>, vector<8x128xbf16>, vector<64x8xf32> -> vector<64x8xf32>
    %c0_12 = arith.constant 0 : index
    %c0_13 = arith.constant 0 : index
    %13 = vector.load %arg9[%c0_12, %c0_13] : memref<64x128xbf16, #tpu.memory_space<vmem>>, vector<64x128xbf16>
    %14 = arith.extf %13 : vector<64x128xbf16> to vector<64x128xf32>
    %cst_14 = arith.constant dense<0xFF800000> : vector<64xf32>
    %15 = vector.multi_reduction <maximumf>, %14, %cst_14 [1] : vector<64x128xf32> to vector<64xf32>
    %16 = vector.shape_cast %15 : vector<64xf32> to vector<64x1xf32>
    %cst_15 = arith.constant -1.000000e+29 : f32
    %17 = vector.broadcast %cst_15 : f32 to vector<64x1xf32>
    %18 = arith.cmpf ogt, %16, %17 : vector<64x1xf32>
    %19 = arith.extui %18 : vector<64x1xi1> to vector<64x1xi32>
    %20 = arith.sitofp %19 : vector<64x1xi32> to vector<64x1xf32>
    %c0_16 = arith.constant 0 : index
    %c0_17 = arith.constant 0 : index
    %21 = vector.load %arg6[%c0_16, %c0_17] : memref<1x128xf32, #tpu.memory_space<vmem>>, vector<1x128xf32>
    %c0_18 = arith.constant 0 : index
    %c0_19 = arith.constant 0 : index
    %22 = vector.load %arg7[%c0_18, %c0_19] : memref<1x128xf32, #tpu.memory_space<vmem>>, vector<1x128xf32>
    %c0_20 = arith.constant 0 : index
    %c0_21 = arith.constant 0 : index
    %23 = vector.load %arg8[%c0_20, %c0_21] : memref<1x128xf32, #tpu.memory_space<vmem>>, vector<1x128xf32>
    %cst_22 = arith.constant 0.000000e+00 : f32
    %24 = vector.broadcast %cst_22 : f32 to vector<64x128xf32>
    %c0_23 = arith.constant 0 : index
    %c0_24 = arith.constant 0 : index
    %25 = vector.load %arg10[%c0_23, %c0_24] : memref<64x128xf32, #tpu.memory_space<vmem>>, vector<64x128xf32>
    tpu.vector_store %arg10[%c0_23, %c0_24], %24 {strides = array<i32>} : memref<64x128xf32, #tpu.memory_space<vmem>>, vector<64x128xf32>,
    %26 = vector.extract_strided_slice %12 {offsets = [0, 0], sizes = [64, 1], strides = [1, 1]} : vector<64x8xf32> to vector<64x1xf32>
    %27 = vector.extract_strided_slice %9 {offsets = [0, 0], sizes = [1, 128], strides = [1, 1]} : vector<8x128xf32> to vector<1x128xf32>
    %28 = vector.broadcast %26 : vector<64x1xf32> to vector<64x128xf32>
    %29 = vector.broadcast %27 : vector<1x128xf32> to vector<64x128xf32>
    %30 = arith.addf %28, %29 : vector<64x128xf32>
    %cst_25 = arith.constant 0.000000e+00 : f32
    %31 = vector.broadcast %cst_25 : f32 to vector<64x128xf32>
    %32 = arith.cmpf oge, %30, %31 : vector<64x128xf32>
    %cst_26 = arith.constant 2.000000e-01 : f32
    %33 = vector.broadcast %cst_26 : f32 to vector<64x128xf32>
    %34 = arith.mulf %33, %30 : vector<64x128xf32>
    %35 = arith.select %32, %30, %34 : vector<64x128xi1>, vector<64x128xf32>
    %36 = arith.addf %35, %14 : vector<64x128xf32>
    %cst_27 = arith.constant dense<0xFF800000> : vector<64xf32>
    %37 = vector.multi_reduction <maximumf>, %36, %cst_27 [1] : vector<64x128xf32> to vector<64xf32>
    %38 = vector.shape_cast %37 : vector<64xf32> to vector<64x1xf32>
    %39 = vector.broadcast %38 : vector<64x1xf32> to vector<64x128xf32>
    %40 = arith.subf %36, %39 : vector<64x128xf32>
    %41 = math.exp %40 : vector<64x128xf32>
    %cst_28 = arith.constant dense<0.000000e+00> : vector<64xf32>
    %42 = vector.multi_reduction <add>, %41, %cst_28 [1] : vector<64x128xf32> to vector<64xf32>
    %43 = vector.shape_cast %42 : vector<64xf32> to vector<64x1xf32>
    %44 = tpu.reciprocal %43 : vector<64x1xf32> -> vector<64x1xf32>
    %45 = vector.broadcast %44 : vector<64x1xf32> to vector<64x128xf32>
    %46 = arith.mulf %41, %45 : vector<64x128xf32>
    %47 = arith.truncf %46 : vector<64x128xf32> to vector<64x128xbf16>
    %48 = vector.extract_strided_slice %4 {offsets = [0, 0], sizes = [128, 16], strides = [1, 1]} : vector<128x128xbf16> to vector<128x16xbf16>
    %cst_29 = arith.constant dense<0.000000e+00> : vector<64x16xf32>
    %49 = tpu.matmul %47, %48, %cst_29 {dimension_numbers = #tpu.dot_dimension_numbers<[1], [0], [0], [1], [0, 0, 1, 1], [], []>} : vector<64x128xbf16>, vector<128x16xbf16>, vector<64x16xf32> -> vector<64x16xf32>
    %50 = vector.broadcast %20 : vector<64x1xf32> to vector<64x16xf32>
    %51 = arith.mulf %50, %49 : vector<64x16xf32>
    %52 = vector.extract_strided_slice %21 {offsets = [0, 0], sizes = [1, 16], strides = [1, 1]} : vector<1x128xf32> to vector<1x16xf32>
    %53 = vector.broadcast %52 : vector<1x16xf32> to vector<64x16xf32>
    %54 = arith.addf %51, %53 : vector<64x16xf32>
    %55 = vector.extract_strided_slice %22 {offsets = [0, 0], sizes = [1, 16], strides = [1, 1]} : vector<1x128xf32> to vector<1x16xf32>
    %56 = vector.broadcast %55 : vector<1x16xf32> to vector<64x16xf32>
    %57 = arith.mulf %54, %56 : vector<64x16xf32>
    %58 = vector.extract_strided_slice %23 {offsets = [0, 0], sizes = [1, 16], strides = [1, 1]} : vector<1x128xf32> to vector<1x16xf32>
    %59 = vector.broadcast %58 : vector<1x16xf32> to vector<64x16xf32>
    %60 = arith.addf %57, %59 : vector<64x16xf32>
    %cst_30 = arith.constant 0.000000e+00 : f32
    %61 = vector.broadcast %cst_30 : f32 to vector<64x16xf32>
    %62 = arith.cmpf ogt, %60, %61 : vector<64x16xf32>
    %cst_31 = arith.constant 0.000000e+00 : f32
    %63 = vector.broadcast %cst_31 : f32 to vector<64x16xf32>
    %64 = arith.minimumf %60, %63 : vector<64x16xf32>
    %65 = math.exp %64 : vector<64x16xf32>
    %cst_32 = arith.constant 1.000000e+00 : f32
    %66 = vector.broadcast %cst_32 : f32 to vector<64x16xf32>
    %67 = arith.subf %65, %66 : vector<64x16xf32>
    %68 = arith.select %62, %60, %67 : vector<64x16xi1>, vector<64x16xf32>
    %c0_33 = arith.constant 0 : index
    %c0_34 = arith.constant 0 : index
    %69 = vector.load %arg10[%c0_33, %c0_34] : memref<64x128xf32, #tpu.memory_space<vmem>>, vector<64x16xf32>
    tpu.vector_store %arg10[%c0_33, %c0_34], %68 {strides = array<i32>} : memref<64x128xf32, #tpu.memory_space<vmem>>, vector<64x16xf32>,
    %70 = vector.extract_strided_slice %12 {offsets = [0, 1], sizes = [64, 1], strides = [1, 1]} : vector<64x8xf32> to vector<64x1xf32>
    %71 = vector.extract_strided_slice %9 {offsets = [1, 0], sizes = [1, 128], strides = [1, 1]} : vector<8x128xf32> to vector<1x128xf32>
    %72 = vector.broadcast %70 : vector<64x1xf32> to vector<64x128xf32>
    %73 = vector.broadcast %71 : vector<1x128xf32> to vector<64x128xf32>
    %74 = arith.addf %72, %73 : vector<64x128xf32>
    %cst_35 = arith.constant 0.000000e+00 : f32
    %75 = vector.broadcast %cst_35 : f32 to vector<64x128xf32>
    %76 = arith.cmpf oge, %74, %75 : vector<64x128xf32>
    %cst_36 = arith.constant 2.000000e-01 : f32
    %77 = vector.broadcast %cst_36 : f32 to vector<64x128xf32>
    %78 = arith.mulf %77, %74 : vector<64x128xf32>
    %79 = arith.select %76, %74, %78 : vector<64x128xi1>, vector<64x128xf32>
    %80 = arith.addf %79, %14 : vector<64x128xf32>
    %cst_37 = arith.constant dense<0xFF800000> : vector<64xf32>
    %81 = vector.multi_reduction <maximumf>, %80, %cst_37 [1] : vector<64x128xf32> to vector<64xf32>
    %82 = vector.shape_cast %81 : vector<64xf32> to vector<64x1xf32>
    %83 = vector.broadcast %82 : vector<64x1xf32> to vector<64x128xf32>
    %84 = arith.subf %80, %83 : vector<64x128xf32>
    %85 = math.exp %84 : vector<64x128xf32>
    %cst_38 = arith.constant dense<0.000000e+00> : vector<64xf32>
    %86 = vector.multi_reduction <add>, %85, %cst_38 [1] : vector<64x128xf32> to vector<64xf32>
    %87 = vector.shape_cast %86 : vector<64xf32> to vector<64x1xf32>
    %88 = tpu.reciprocal %87 : vector<64x1xf32> -> vector<64x1xf32>
    %89 = vector.broadcast %88 : vector<64x1xf32> to vector<64x128xf32>
    %90 = arith.mulf %85, %89 : vector<64x128xf32>
    %91 = arith.truncf %90 : vector<64x128xf32> to vector<64x128xbf16>
    %92 = vector.extract_strided_slice %4 {offsets = [0, 16], sizes = [128, 16], strides = [1, 1]} : vector<128x128xbf16> to vector<128x16xbf16>
    %cst_39 = arith.constant dense<0.000000e+00> : vector<64x16xf32>
    %93 = tpu.matmul %91, %92, %cst_39 {dimension_numbers = #tpu.dot_dimension_numbers<[1], [0], [0], [1], [0, 0, 1, 1], [], []>} : vector<64x128xbf16>, vector<128x16xbf16>, vector<64x16xf32> -> vector<64x16xf32>
    %94 = vector.broadcast %20 : vector<64x1xf32> to vector<64x16xf32>
    %95 = arith.mulf %94, %93 : vector<64x16xf32>
    %96 = vector.extract_strided_slice %21 {offsets = [0, 16], sizes = [1, 16], strides = [1, 1]} : vector<1x128xf32> to vector<1x16xf32>
    %97 = vector.broadcast %96 : vector<1x16xf32> to vector<64x16xf32>
    %98 = arith.addf %95, %97 : vector<64x16xf32>
    %99 = vector.extract_strided_slice %22 {offsets = [0, 16], sizes = [1, 16], strides = [1, 1]} : vector<1x128xf32> to vector<1x16xf32>
    %100 = vector.broadcast %99 : vector<1x16xf32> to vector<64x16xf32>
    %101 = arith.mulf %98, %100 : vector<64x16xf32>
    %102 = vector.extract_strided_slice %23 {offsets = [0, 16], sizes = [1, 16], strides = [1, 1]} : vector<1x128xf32> to vector<1x16xf32>
    %103 = vector.broadcast %102 : vector<1x16xf32> to vector<64x16xf32>
    %104 = arith.addf %101, %103 : vector<64x16xf32>
    %cst_40 = arith.constant 0.000000e+00 : f32
    %105 = vector.broadcast %cst_40 : f32 to vector<64x16xf32>
    %106 = arith.cmpf ogt, %104, %105 : vector<64x16xf32>
    %cst_41 = arith.constant 0.000000e+00 : f32
    %107 = vector.broadcast %cst_41 : f32 to vector<64x16xf32>
    %108 = arith.minimumf %104, %107 : vector<64x16xf32>
    %109 = math.exp %108 : vector<64x16xf32>
    %cst_42 = arith.constant 1.000000e+00 : f32
    %110 = vector.broadcast %cst_42 : f32 to vector<64x16xf32>
    %111 = arith.subf %109, %110 : vector<64x16xf32>
    %112 = arith.select %106, %104, %111 : vector<64x16xi1>, vector<64x16xf32>
    %c0_43 = arith.constant 0 : index
    %c16 = arith.constant 16 : index
    %113 = vector.load %arg10[%c0_43, %c16] : memref<64x128xf32, #tpu.memory_space<vmem>>, vector<64x16xf32>
    tpu.vector_store %arg10[%c0_43, %c16], %112 {strides = array<i32>} : memref<64x128xf32, #tpu.memory_space<vmem>>, vector<64x16xf32>,
    %114 = vector.extract_strided_slice %12 {offsets = [0, 2], sizes = [64, 1], strides = [1, 1]} : vector<64x8xf32> to vector<64x1xf32>
    %115 = vector.extract_strided_slice %9 {offsets = [2, 0], sizes = [1, 128], strides = [1, 1]} : vector<8x128xf32> to vector<1x128xf32>
    %116 = vector.broadcast %114 : vector<64x1xf32> to vector<64x128xf32>
    %117 = vector.broadcast %115 : vector<1x128xf32> to vector<64x128xf32>
    %118 = arith.addf %116, %117 : vector<64x128xf32>
    %cst_44 = arith.constant 0.000000e+00 : f32
    %119 = vector.broadcast %cst_44 : f32 to vector<64x128xf32>
    %120 = arith.cmpf oge, %118, %119 : vector<64x128xf32>
    %cst_45 = arith.constant 2.000000e-01 : f32
    %121 = vector.broadcast %cst_45 : f32 to vector<64x128xf32>
    %122 = arith.mulf %121, %118 : vector<64x128xf32>
    %123 = arith.select %120, %118, %122 : vector<64x128xi1>, vector<64x128xf32>
    %124 = arith.addf %123, %14 : vector<64x128xf32>
    %cst_46 = arith.constant dense<0xFF800000> : vector<64xf32>
    %125 = vector.multi_reduction <maximumf>, %124, %cst_46 [1] : vector<64x128xf32> to vector<64xf32>
    %126 = vector.shape_cast %125 : vector<64xf32> to vector<64x1xf32>
    %127 = vector.broadcast %126 : vector<64x1xf32> to vector<64x128xf32>
    %128 = arith.subf %124, %127 : vector<64x128xf32>
    %129 = math.exp %128 : vector<64x128xf32>
    %cst_47 = arith.constant dense<0.000000e+00> : vector<64xf32>
    %130 = vector.multi_reduction <add>, %129, %cst_47 [1] : vector<64x128xf32> to vector<64xf32>
    %131 = vector.shape_cast %130 : vector<64xf32> to vector<64x1xf32>
    %132 = tpu.reciprocal %131 : vector<64x1xf32> -> vector<64x1xf32>
    %133 = vector.broadcast %132 : vector<64x1xf32> to vector<64x128xf32>
    %134 = arith.mulf %129, %133 : vector<64x128xf32>
    %135 = arith.truncf %134 : vector<64x128xf32> to vector<64x128xbf16>
    %136 = vector.extract_strided_slice %4 {offsets = [0, 32], sizes = [128, 16], strides = [1, 1]} : vector<128x128xbf16> to vector<128x16xbf16>
    %cst_48 = arith.constant dense<0.000000e+00> : vector<64x16xf32>
    %137 = tpu.matmul %135, %136, %cst_48 {dimension_numbers = #tpu.dot_dimension_numbers<[1], [0], [0], [1], [0, 0, 1, 1], [], []>} : vector<64x128xbf16>, vector<128x16xbf16>, vector<64x16xf32> -> vector<64x16xf32>
    %138 = vector.broadcast %20 : vector<64x1xf32> to vector<64x16xf32>
    %139 = arith.mulf %138, %137 : vector<64x16xf32>
    %140 = vector.extract_strided_slice %21 {offsets = [0, 32], sizes = [1, 16], strides = [1, 1]} : vector<1x128xf32> to vector<1x16xf32>
    %141 = vector.broadcast %140 : vector<1x16xf32> to vector<64x16xf32>
    %142 = arith.addf %139, %141 : vector<64x16xf32>
    %143 = vector.extract_strided_slice %22 {offsets = [0, 32], sizes = [1, 16], strides = [1, 1]} : vector<1x128xf32> to vector<1x16xf32>
    %144 = vector.broadcast %143 : vector<1x16xf32> to vector<64x16xf32>
    %145 = arith.mulf %142, %144 : vector<64x16xf32>
    %146 = vector.extract_strided_slice %23 {offsets = [0, 32], sizes = [1, 16], strides = [1, 1]} : vector<1x128xf32> to vector<1x16xf32>
    %147 = vector.broadcast %146 : vector<1x16xf32> to vector<64x16xf32>
    %148 = arith.addf %145, %147 : vector<64x16xf32>
    %cst_49 = arith.constant 0.000000e+00 : f32
    %149 = vector.broadcast %cst_49 : f32 to vector<64x16xf32>
    %150 = arith.cmpf ogt, %148, %149 : vector<64x16xf32>
    %cst_50 = arith.constant 0.000000e+00 : f32
    %151 = vector.broadcast %cst_50 : f32 to vector<64x16xf32>
    %152 = arith.minimumf %148, %151 : vector<64x16xf32>
    %153 = math.exp %152 : vector<64x16xf32>
    %cst_51 = arith.constant 1.000000e+00 : f32
    %154 = vector.broadcast %cst_51 : f32 to vector<64x16xf32>
    %155 = arith.subf %153, %154 : vector<64x16xf32>
    %156 = arith.select %150, %148, %155 : vector<64x16xi1>, vector<64x16xf32>
    %c0_52 = arith.constant 0 : index
    %c32 = arith.constant 32 : index
    %157 = vector.load %arg10[%c0_52, %c32] : memref<64x128xf32, #tpu.memory_space<vmem>>, vector<64x16xf32>
    tpu.vector_store %arg10[%c0_52, %c32], %156 {strides = array<i32>} : memref<64x128xf32, #tpu.memory_space<vmem>>, vector<64x16xf32>,
    %158 = vector.extract_strided_slice %12 {offsets = [0, 3], sizes = [64, 1], strides = [1, 1]} : vector<64x8xf32> to vector<64x1xf32>
    %159 = vector.extract_strided_slice %9 {offsets = [3, 0], sizes = [1, 128], strides = [1, 1]} : vector<8x128xf32> to vector<1x128xf32>
    %160 = vector.broadcast %158 : vector<64x1xf32> to vector<64x128xf32>
    %161 = vector.broadcast %159 : vector<1x128xf32> to vector<64x128xf32>
    %162 = arith.addf %160, %161 : vector<64x128xf32>
    %cst_53 = arith.constant 0.000000e+00 : f32
    %163 = vector.broadcast %cst_53 : f32 to vector<64x128xf32>
    %164 = arith.cmpf oge, %162, %163 : vector<64x128xf32>
    %cst_54 = arith.constant 2.000000e-01 : f32
    %165 = vector.broadcast %cst_54 : f32 to vector<64x128xf32>
    %166 = arith.mulf %165, %162 : vector<64x128xf32>
    %167 = arith.select %164, %162, %166 : vector<64x128xi1>, vector<64x128xf32>
    %168 = arith.addf %167, %14 : vector<64x128xf32>
    %cst_55 = arith.constant dense<0xFF800000> : vector<64xf32>
    %169 = vector.multi_reduction <maximumf>, %168, %cst_55 [1] : vector<64x128xf32> to vector<64xf32>
    %170 = vector.shape_cast %169 : vector<64xf32> to vector<64x1xf32>
    %171 = vector.broadcast %170 : vector<64x1xf32> to vector<64x128xf32>
    %172 = arith.subf %168, %171 : vector<64x128xf32>
    %173 = math.exp %172 : vector<64x128xf32>
    %cst_56 = arith.constant dense<0.000000e+00> : vector<64xf32>
    %174 = vector.multi_reduction <add>, %173, %cst_56 [1] : vector<64x128xf32> to vector<64xf32>
    %175 = vector.shape_cast %174 : vector<64xf32> to vector<64x1xf32>
    %176 = tpu.reciprocal %175 : vector<64x1xf32> -> vector<64x1xf32>
    %177 = vector.broadcast %176 : vector<64x1xf32> to vector<64x128xf32>
    %178 = arith.mulf %173, %177 : vector<64x128xf32>
    %179 = arith.truncf %178 : vector<64x128xf32> to vector<64x128xbf16>
    %180 = vector.extract_strided_slice %4 {offsets = [0, 48], sizes = [128, 16], strides = [1, 1]} : vector<128x128xbf16> to vector<128x16xbf16>
    %cst_57 = arith.constant dense<0.000000e+00> : vector<64x16xf32>
    %181 = tpu.matmul %179, %180, %cst_57 {dimension_numbers = #tpu.dot_dimension_numbers<[1], [0], [0], [1], [0, 0, 1, 1], [], []>} : vector<64x128xbf16>, vector<128x16xbf16>, vector<64x16xf32> -> vector<64x16xf32>
    %182 = vector.broadcast %20 : vector<64x1xf32> to vector<64x16xf32>
    %183 = arith.mulf %182, %181 : vector<64x16xf32>
    %184 = vector.extract_strided_slice %21 {offsets = [0, 48], sizes = [1, 16], strides = [1, 1]} : vector<1x128xf32> to vector<1x16xf32>
    %185 = vector.broadcast %184 : vector<1x16xf32> to vector<64x16xf32>
    %186 = arith.addf %183, %185 : vector<64x16xf32>
    %187 = vector.extract_strided_slice %22 {offsets = [0, 48], sizes = [1, 16], strides = [1, 1]} : vector<1x128xf32> to vector<1x16xf32>
    %188 = vector.broadcast %187 : vector<1x16xf32> to vector<64x16xf32>
    %189 = arith.mulf %186, %188 : vector<64x16xf32>
    %190 = vector.extract_strided_slice %23 {offsets = [0, 48], sizes = [1, 16], strides = [1, 1]} : vector<1x128xf32> to vector<1x16xf32>
    %191 = vector.broadcast %190 : vector<1x16xf32> to vector<64x16xf32>
    %192 = arith.addf %189, %191 : vector<64x16xf32>
    %cst_58 = arith.constant 0.000000e+00 : f32
    %193 = vector.broadcast %cst_58 : f32 to vector<64x16xf32>
    %194 = arith.cmpf ogt, %192, %193 : vector<64x16xf32>
    %cst_59 = arith.constant 0.000000e+00 : f32
    %195 = vector.broadcast %cst_59 : f32 to vector<64x16xf32>
    %196 = arith.minimumf %192, %195 : vector<64x16xf32>
    %197 = math.exp %196 : vector<64x16xf32>
    %cst_60 = arith.constant 1.000000e+00 : f32
    %198 = vector.broadcast %cst_60 : f32 to vector<64x16xf32>
    %199 = arith.subf %197, %198 : vector<64x16xf32>
    %200 = arith.select %194, %192, %199 : vector<64x16xi1>, vector<64x16xf32>
    %c0_61 = arith.constant 0 : index
    %c48 = arith.constant 48 : index
    %201 = vector.load %arg10[%c0_61, %c48] : memref<64x128xf32, #tpu.memory_space<vmem>>, vector<64x16xf32>
    tpu.vector_store %arg10[%c0_61, %c48], %200 {strides = array<i32>} : memref<64x128xf32, #tpu.memory_space<vmem>>, vector<64x16xf32>,
    return
  }
  func.func @transform_0(%arg0: i32) -> (i32, i32) {
    %c0_i32 = arith.constant 0 : i32
    %c0_i32_0 = arith.constant 0 : i32
    %c0_i32_1 = arith.constant 0 : i32
    return %c0_i32, %c0_i32_0 : i32, i32
  }
  func.func @transform_1(%arg0: i32) -> (i32, i32) {
    %c0_i32 = arith.constant 0 : i32
    %c0_i32_0 = arith.constant 0 : i32
    return %arg0, %c0_i32 : i32, i32
  }
  func.func @transform_2(%arg0: i32) -> (i32, i32) {
    %c0_i32 = arith.constant 0 : i32
    %c0_i32_0 = arith.constant 0 : i32
    %c0_i32_1 = arith.constant 0 : i32
    return %c0_i32, %c0_i32_0 : i32, i32
  }
  func.func @transform_3(%arg0: i32) -> (i32, i32) {
    %c0_i32 = arith.constant 0 : i32
    %c0_i32_0 = arith.constant 0 : i32
    %c0_i32_1 = arith.constant 0 : i32
    return %c0_i32, %c0_i32_0 : i32, i32
  }
  func.func @transform_4(%arg0: i32) -> (i32, i32) {
    %c0_i32 = arith.constant 0 : i32
    %c0_i32_0 = arith.constant 0 : i32
    %c0_i32_1 = arith.constant 0 : i32
    return %c0_i32, %c0_i32_0 : i32, i32
  }
  func.func @transform_5(%arg0: i32) -> (i32, i32) {
    %c0_i32 = arith.constant 0 : i32
    %c0_i32_0 = arith.constant 0 : i32
    %c0_i32_1 = arith.constant 0 : i32
    return %c0_i32, %c0_i32_0 : i32, i32
  }
  func.func @transform_6(%arg0: i32) -> (i32, i32) {
    %c0_i32 = arith.constant 0 : i32
    %c0_i32_0 = arith.constant 0 : i32
    %c0_i32_1 = arith.constant 0 : i32
    return %c0_i32, %c0_i32_0 : i32, i32
  }
  func.func @transform_7(%arg0: i32) -> (i32, i32) {
    %c0_i32 = arith.constant 0 : i32
    %c0_i32_0 = arith.constant 0 : i32
    %c0_i32_1 = arith.constant 0 : i32
    return %c0_i32, %c0_i32_0 : i32, i32
  }
  func.func @transform_8(%arg0: i32) -> (i32, i32) {
    %c0_i32 = arith.constant 0 : i32
    %c0_i32_0 = arith.constant 0 : i32
    return %arg0, %c0_i32 : i32, i32
  }
  func.func @transform_9(%arg0: i32) -> (i32, i32) {
    %c0_i32 = arith.constant 0 : i32
    %c0_i32_0 = arith.constant 0 : i32
    return %arg0, %c0_i32 : i32, i32
  }
}

</mosaic_0001>

<bundles_post_ra>
// kernel: tpu_custom_call.1
= control target key start
LH: loop header
LB: loop body
LE: loop exit
PB: predicated region body
PF: predicated region fallthrough
CT: control target
= control target key end

     0   :  { %s5340_s0 = inlined_call_operand.hbm [shape: f32[128,128], index: 0, kind: input, shape index: {}]   ;;  %s5341_s1 = inlined_call_operand.hbm [shape: f32[128,128], index: 1, kind: input, shape index: {}]   ;;  %s5342_s2 = inlined_call_operand.hbm [shape: bf16[128,128], index: 2, kind: input, shape index: {}]   ;;  %s5343_s3 = inlined_call_operand.hbm [shape: bf16[8,128], index: 3, kind: input, shape index: {}]   ;;  %s5344_s4 = inlined_call_operand.hbm [shape: bf16[8,128], index: 4, kind: input, shape index: {}]   ;;  %s5345_s5 = inlined_call_operand.vmem [shape: f32[1,128], index: 5, kind: input, shape index: {}]   ;;  %s5346_s6 = inlined_call_operand.vmem [shape: f32[1,128], index: 6, kind: input, shape index: {}]   ;;  %s5347_s7 = inlined_call_operand.vmem [shape: f32[1,128], index: 7, kind: input, shape index: {}]   ;;  %s5348_s8 = inlined_call_operand.hbm [shape: bf16[128,128], index: 8, kind: input, shape index: {}]   ;;  %s5349_s9 = inlined_call_operand.hbm [shape: f32[128,128], index: 9, kind: output, shape index: {}]  }
   0x1   :  { %5368 = sst [smem:[#allocation39_spill]] %s5340_s0 }
   0x2   :  { %5369 = sst [smem:[#allocation40_spill]] %s5342_s2 }
   0x3   :  { %5370 = sst [smem:[#allocation41_spill]] %s5343_s3 }
   0x4   :  { %5371 = sst [smem:[#allocation42_spill]] %s5344_s4 }
   0x5   :  { %14 = vsyncpa [#allocation3], 0 }
   0x6   :  { %15 = vsyncpa [#allocation6], 0 }
   0x7   :  { %17 = vsyncpa [#allocation6 + $0x1], 0 }
   0x8   :  { %18 = vsyncpa [#allocation9], 0 }
   0x9   :  { %19 = vsyncpa [#allocation12], 0 }
   0xa   :  { %21 = vsyncpa [#allocation12 + $0x1], 0 }
   0xb   :  { %22 = vsyncpa [#allocation4], 0 }
   0xc   :  { %24 = vsyncpa [#allocation4 + $0x1], 0  ;;  %s3466_s30 = smov 0   ;;  %s3468_s10 = smov 0  }
   0xd   :  { %s3470_s11 = smov 0   ;;  %s3472_s12 = smov 0  }
   0xe LB: > { %5372 = sst [smem:[#allocation20_spill]] %s3389_s11  ;;  %s3487_s13 = sadd.s32 4294967295, %s3393_s12   ;;  %s3393_s12 = sphi %s3472_s12, %s5479_s12   ;;  %s3389_s11 = sphi %s3470_s11, %s5481_s11   ;;  %s3385_s10 = sphi %s3468_s10, %s5483_s10   ;;  %s3381_s30 = sphi %s3466_s30, %s5482_s30  }
   0xf   : > { %5373 = sst [smem:[#allocation21_spill]] %s3393_s12  ;;  %s2666_s14 = sadd.s32 4294967294, %s3393_s12  }
  0x10   : > { %p71_p0 = scmp.ne.s32.totalorder %s3385_s10, %s3381_s30  ;;  %p72_p1 = scmp.eq.s32.totalorder %s3487_s13, 0 }
  0x11   : > { %p247_p2 = scmp.eq.s32.totalorder %s3487_s13, 1  ;;  %p253_p3 = scmp.eq.s32.totalorder %s2666_s14, 1 }
  0x12   : > { %p3496_p4 = por %p72_p1, %p71_p0  ;;  %p2667_p5 = scmp.ge.s32.totalorder %s3393_s12, 1 }
  0x13   : > { %p3501_p6 = por %p253_p3, %p71_p0  ;;  %p260_p7 = scmp.lt.s32.totalorder %s3393_s12, 3 }
  0x14   : > { %s5377_s2 = sld [smem:[#allocation40_spill]]  ;;  %s3395_s21 = smov [#allocation7]  }
  0x15   : > { %s5375_s16 = scalar_select %p3501_p6, 1, 0 }
  0x16   : > { %p3509_p8 = pnand %p2667_p5, %p260_p7  ;;  %s287_s22 = sshll.u32 %s3395_s21, 4  ;;  %s288_s22 = int_to_ptr.vmem [resolvable:$true] %s287_s22 }
  0x17   : > { %5376 = sst [smem:[#allocation22_spill]] %s5375_s16  ;;  %s5350_s27 = smov 64  }
  0x18   : > { %p2817_p9 = pneg %p3509_p8  ;;  %s5380_s3 = sld [smem:[#allocation41_spill]] }
  0x19   : > { %s5351_s28 = smov 4   ;;  %s3398_s29 = smov [#allocation8]  }
  0x1a   : > { %s285_s19 = sshll.u32 %s5377_s2, 4  ;;  %p3517_p10 = pnand %p2817_p9, %p72_p1  ;;  %s286_s19 = int_to_ptr.hbm [resolvable:$true] %s285_s19 }
  0x1b   : > { %s302_s14 = sshll.u32 %s3398_s29, 4  ;;  %s5381_s0 = sld [smem:[#allocation39_spill]]  ;;  %s303_s14 = int_to_ptr.vmem [resolvable:$true] %s302_s14 }
  0x1c   : > { %2823 = dma.hbm_to_vmem [thread:$0]  (!%p3517_p10), %s286_s19, 1024, %s288_s22, [#allocation6], %s5350_s27, %s5350_s27, %s5351_s28  }
  0x1d   : > { %s3399_s24 = smov [#allocation2]   ;;  %s5382_s4 = sld [smem:[#allocation42_spill]] }
  0x1e   : > { %s300_s26 = sshll.u32 %s5380_s3, 4  ;;  %s273_s25 = sshll.u32 %s3399_s24, 4  ;;  %s301_s26 = int_to_ptr.hbm [resolvable:$true] %s300_s26  ;;  %s274_s25 = int_to_ptr.vmem [resolvable:$true] %s273_s25 }
  0x1f   : > { %2826 = dma.hbm_to_vmem [thread:$0]  (!%p3517_p10), %s301_s26, 64, %s303_s14, [#allocation9]  }
  0x20   : > { %s5352_s17 = smov 128   ;;  %s5353_s18 = smov 8  }
  0x21   : > { %s271_s21 = sshll.u32 %s5381_s0, 4  ;;  %s3402_s26 = smov [#allocation10]   ;;  %s272_s21 = int_to_ptr.hbm [resolvable:$true] %s271_s21 }
  0x22   : > { %2820 = dma.hbm_to_vmem [thread:$0]  (!%p3517_p10), %s272_s21, 2048, %s274_s25, [#allocation3], %s5352_s17, %s5352_s17, %s5353_s18  }
  0x23   : > { %s312_s29 = sshll.u32 %s5382_s4, 4  ;;  %s314_s14 = sshll.u32 %s3402_s26, 4  ;;  %s313_s29 = int_to_ptr.hbm [resolvable:$true] %s312_s29  ;;  %s315_s14 = int_to_ptr.vmem [resolvable:$true] %s314_s14 }
  0x24   : > { %2829 = dma.hbm_to_vmem [thread:$0]  (!%p3517_p10), %s313_s29, 64, %s315_s14, [#allocation9]  }
  0x25   : > { %s3546_s24 = sadd.s32 1, %s3393_s12   ;;  %s58_s19 = sadd.s32 1, %s3389_s11 }
  0x26   : > { %5383 = sst [smem:[#allocation23_spill]] %s3546_s24  ;;  %s55_s22 = ssub.s32 %s3393_s12, %s3546_s24 }
  0x27   : > { %p65_p12 = scmp.ne.s32.totalorder %s3389_s11, %s3385_s10  ;;  %p56_p13 = scmp.eq.s32.totalorder %s55_s22, 0 }
  0x28   : > { %p66_p0 = scmp.eq.s32.totalorder %s3393_s12, 0  ;;  %p2845_p5 = scmp.lt.s32.totalorder %s3393_s12, 2 }
  0x29   : > { %p3556_p3 = por %p247_p2, %p65_p12  ;;  %s334_s23 = sand.u32 1, %s3393_s12  }
  0x2a   : > { %s3562_s25 = scalar_select %p56_p13, %s3389_s11, %s58_s19  }
  0x2b   : > { %p67_p7 = por %p66_p0, %p65_p12  ;;  %s3566_s29 = sand.u32 1, %s3389_s11  }
  0x2c   : > { %5385 = sst [smem:[#allocation24_spill]] %s3562_s25  ;;  %s2673_s26 = sshll.u32 %s3566_s29, 6 }
  0x2d   : > { %s2764_s14 = sshll.u32 %s3393_s12, 6  ;;  %s338_s18 = scalar_lea.vmem [#allocation5], %s2673_s26 }
  0x2e   : > { %s343_s28 = scalar_lea.hbm %s5341_s1, %s2764_s14  ;;  %s346_s0 = sshll.u32 %s338_s18, 4  ;;  %s347_s0 = int_to_ptr.vmem [resolvable:$true] %s346_s0 }
  0x2f   : > { %s344_s17 = sshll.u32 %s343_s28, 4  ;;  %p3575_p2 = pnand %p2845_p5, %p67_p7  ;;  %s345_s17 = int_to_ptr.hbm [resolvable:$true] %s344_s17 }
  0x30   : > { %s2676_s2 = sshll.u32 %s3566_s29, 5  ;;  %s2765_s3 = sshll.u32 %s3393_s12, 5 }
  0x31   : > { %s335_s4 = scalar_lea.sflag [#allocation6], %s334_s23  ;;  %s3251_s25 = sshra.s32 %s345_s17, 4  ;;  %s3252_s25 = int_to_ptr.hbm [resolvable:$true] %s3251_s25 }
  0x32   : > { %s3253_s11 = scalar_lea.hbm %s3252_s25, 64  ;;  %p3255_p10 = pneg %p3575_p2 }
  0x33   : > { %p3254_p9 = scmp.ne.s32.totalorder %s3252_s25, %s3253_s11  ;;  %s3258_s18 = scalar_lea.hbm %s5341_s1, 128 }
  0x34   : > { %p3259_p0 = scmp.lt.s32.totalorder %s3252_s25, %s5341_s1  ;;  %p3260_p5 = scmp.lt.s32.totalorder %s3258_s18, %s3253_s11 }
  0x35   : > { %p3256_p12 = pnand %p3255_p10, %p3254_p9 }
  0x36   : > { %p3261_p7 = por %p3260_p5, %p3259_p0 }
  0x37   : > { %p3257_p13 = pneg %p3256_p12 }
  0x39   : > { %p3262_p11 = pnand %p3261_p7, %p3257_p13 }
  0x3b   : > { %3265 = shalt.err (!%p3262_p11)
}
  0x3c   : > { %s5387_s23 = smov 8   ;;  %s5388_s22 = smov 128  }
  0x3d   : > { %2833 = dma.hbm_to_vmem [thread:$0]  (!%p3575_p2), %s345_s17, 1024, %s347_s0, %s335_s4, %s5388_s22, %s5388_s22, %s5387_s23  }
  0x3e   : > { %s365_s27 = scalar_lea.hbm %s5348_s8, %s2765_s3  ;;  %s360_s28 = scalar_lea.vmem [#allocation11], %s2676_s2 }
  0x3f   : > { %s368_s16 = sshll.u32 %s360_s28, 4  ;;  %s366_s26 = sshll.u32 %s365_s27, 4  ;;  %s369_s16 = int_to_ptr.vmem [resolvable:$true] %s368_s16  ;;  %s367_s26 = int_to_ptr.hbm [resolvable:$true] %s366_s26 }
  0x40   : > { %s357_s11 = scalar_lea.sflag [#allocation12], %s3566_s29  ;;  %s3281_s25 = sshra.s32 %s367_s26, 4  ;;  %s3282_s25 = int_to_ptr.hbm [resolvable:$true] %s3281_s25 }
  0x41   : > { %s3283_s18 = scalar_lea.hbm %s3282_s25, 32  ;;  %s3288_s4 = scalar_lea.hbm %s5348_s8, 64 }
  0x42   : > { %p3284_p11 = scmp.ne.s32.totalorder %s3282_s25, %s3283_s18  ;;  %p3289_p13 = scmp.lt.s32.totalorder %s3282_s25, %s5348_s8 }
  0x43   : > { %p3290_p0 = scmp.lt.s32.totalorder %s3288_s4, %s3283_s18 }
  0x44   : > { %p3286_p9 = pnand %p3284_p11, %p3255_p10 }
  0x45   : > { %p3291_p5 = por %p3290_p0, %p3289_p13 }
  0x46   : > { %p3287_p12 = pneg %p3286_p9 }
  0x48   : > { %p3292_p7 = pnand %p3291_p5, %p3287_p12 }
  0x4a   : > { %3295 = shalt.err (!%p3292_p7)
}
  0x4b   : > { %s5389_s2 = smov 4   ;;  %s5390_s17 = smov 64  }
  0x4c   : > { %2836 = dma.hbm_to_vmem [thread:$0]  (!%p3575_p2), %s367_s26, 512, %s369_s16, %s357_s11, %s5390_s17, %s5390_s17, %s5389_s2  }
  0x4d   : > { %380 = sbr.rel (%p3509_p8) target bundleno = 1365 (0x555), region = 56 }
  0x52   : > { %3356 = dma.done.wait (%p72_p1), [#allocation3], 2048  }
  0x53   : > { %3358 = vsyncadd (%p72_p1), [#allocation3], 4294965248  ;;  %s387_s24 = sand.u32 1, %s3487_s13   ;;  %s3623_s29 = sand.u32 1, %s3385_s10  }
  0x54   : > { %s2681_s19 = sshll.u32 %s3623_s29, 6  ;;  %s388_s23 = scalar_lea.sflag [#allocation6], %s387_s24 }
  0x55   : > { %s3628_s16 = scalar_lea.vmem [#allocation5], %s2681_s19 }
  0x56   : > { %3360 = dma.done.wait (%p3496_p4), %s388_s23, 1024  }
  0x57   : > { %3362 = vsyncadd (%p3496_p4), %s388_s23, 4294966272 }
  0x58   : > { %3364 = dma.done.wait (%p72_p1), [#allocation6], 1024  }
  0x59   : > { %3366 = vsyncadd (%p72_p1), [#allocation6], 4294966272 }
  0x5a   : > { %3368 = dma.done.wait (%p72_p1), [#allocation9], 128  }
  0x5b   : > { %3370 = vsyncadd (%p72_p1), [#allocation9], 4294967168  ;;  %s2685_s20 = sshll.u32 %s3623_s29, 5  ;;  %s413_s22 = scalar_lea.sflag [#allocation12], %s3623_s29 }
  0x5c   : > { %s3644_s27 = scalar_lea.vmem [#allocation11], %s2685_s20 }
  0x5d   : > { %3372 = dma.done.wait (%p3496_p4), %s413_s22, 512  }
  0x5e   : > { %3374 = vsyncadd (%p3496_p4), %s413_s22, 4294966784  ;;  %v2773_v0 = vld [vmem:[#allocation7 + $0x38] sm:$0xff]  ;;  %v2772_v1 = vld [vmem:[#allocation7 + $0x30] sm:$0xff]  ;;  %s3403_s15 = smov 80   ;;  %s3404_s28 = smov 96  }
  0x5f   : > { %549 = vmatpush.bf16.msra.mxu0 %v2773_v0  ;;  %626 = vmatpush.bf16.msra.mxu1 %v2773_v0  ;;  %v2771_v2 = vld [vmem:[#allocation7 + $0x28] sm:$0xff]  ;;  %v2770_v3 = vld [vmem:[#allocation7 + $0x20] sm:$0xff]  ;;  %v2769_v4 = vld [vmem:[#allocation7 + $0x18] sm:$0xff]  ;;  %s3408_s26 = smov 112   ;;  %s4666_s12 = scalar_lea.vmem [#allocation13], %s2681_s19 }
  0x60   : > { %v2768_v5 = vld [vmem:[#allocation7 + $0x10] sm:$0xff]  ;;  %v721_v6 = vld [vmem:[#allocation10] sm:$0xf]  ;;  %v2767_v7 = vld [vmem:[#allocation7 + $0x8] sm:$0xff]  ;;  %s3411_s19 = smov 32   ;;  %s3412_s23 = smov 16  }
  0x61   : > { %2794 = vmatpush.bf16.xpose.msra.mxu3 %v721_v6  ;;  %v2766_v8 = vld [vmem:[#allocation7] sm:$0xff]  ;;  %v478_v10 = vld [vmem:[#allocation2 + $0x8] sm:$0xff]  ;;  %v479_v15 = vld [vmem:[#allocation2 + $0x10] sm:$0xff]  ;;  %s2774_s20 = sshll.u32 %s3487_s13, 6  ;;  %s2515_s11 = scalar_lea.sflag [#allocation4], %s3623_s29 }
  0x62   : > { %v477_v9 = vld [vmem:[#allocation2] sm:$0xff]  ;;  %v615_v12 = vld [vmem:[%s3628_s16 + $0x8] sm:$0xff]  ;;  %v480_v16 = vld [vmem:[#allocation2 + $0x18] sm:$0xff]  ;;  %s3331_s0 = scalar_lea.hbm %s5349_s9, 128 }
  0x63   : > { %550 = vmatpush.bf16.msra.mxu0 %v2772_v1  ;;  %627 = vmatpush.bf16.msra.mxu1 %v2772_v1  ;;  %v614_v11 = vld [vmem:[%s3628_s16] sm:$0xff]  ;;  %v493_v13 = vpack.c.bf16 %v478_v10, %v477_v9  ;;  %v616_v17 = vld [vmem:[%s3628_s16 + $0x10] sm:$0xff]  ;;  %v617_v18 = vld [vmem:[%s3628_s16 + $0x18] sm:$0xff]  ;;  %v494_v19 = vpack.c.bf16 %v480_v16, %v479_v15 }
  0x64   : > { %v622_v14 = vpack.c.bf16 %v615_v12, %v614_v11  ;;  %v623_v20 = vpack.c.bf16 %v617_v18, %v616_v17  ;;  %v481_v21 = vld [vmem:[#allocation2 + $0x20] sm:$0xff]  ;;  %v482_v22 = vld [vmem:[#allocation2 + $0x28] sm:$0xff]  ;;  %v483_v27 = vld [vmem:[#allocation2 + $0x30] sm:$0xff] }
  0x65   : > { %v618_v23 = vld [vmem:[%s3628_s16 + $0x20] sm:$0xff]  ;;  %v619_v24 = vld [vmem:[%s3628_s16 + $0x28] sm:$0xff]  ;;  %v495_v25 = vpack.c.bf16 %v482_v22, %v481_v21  ;;  %v484_v28 = vld [vmem:[#allocation2 + $0x38] sm:$0xff] }
  0x66   : > { %v624_v26 = vpack.c.bf16 %v619_v24, %v618_v23  ;;  %v620_v29 = vld [vmem:[%s3628_s16 + $0x30] sm:$0xff]  ;;  %v621_v30 = vld [vmem:[%s3628_s16 + $0x38] sm:$0xff]  ;;  %v496_v31 = vpack.c.bf16 %v484_v28, %v483_v27  ;;  %v485_v33 = vld [vmem:[#allocation2 + $0x40] sm:$0xff]  ;;  %s3413_s16 = smov 48  }
  0x67   : > { %551 = vmatpush.bf16.msra.mxu0 %v2771_v2  ;;  %628 = vmatpush.bf16.msra.mxu1 %v2771_v2  ;;  %v625_v32 = vpack.c.bf16 %v621_v30, %v620_v29  ;;  %v486_v34 = vld [vmem:[#allocation2 + $0x48] sm:$0xff]  ;;  %v487_v36 = vld [vmem:[#allocation2 + $0x50] sm:$0xff]  ;;  %v488_v37 = vld [vmem:[#allocation2 + $0x58] sm:$0xff] }
  0x68   : > { %v497_v35 = vpack.c.bf16 %v486_v34, %v485_v33  ;;  %v498_v38 = vpack.c.bf16 %v488_v37, %v487_v36  ;;  %v489_v39 = vld [vmem:[#allocation2 + $0x60] sm:$0xff]  ;;  %v490_v40 = vld [vmem:[#allocation2 + $0x68] sm:$0xff]  ;;  %v491_v42 = vld [vmem:[#allocation2 + $0x70] sm:$0xff] }
  0x69   : > { %v499_v41 = vpack.c.bf16 %v490_v40, %v489_v39  ;;  %v492_v43 = vld [vmem:[#allocation2 + $0x78] sm:$0xff]  ;;  %v2791_v58 = vld [vmem:[%s3644_s27 + $0x8] sm:$0xff]   ;;  %v2793_v9 = vld [vmem:[%s3644_s27 + $0x18] sm:$0xff]  }
  0x6a   : > { %v500_v44 = vpack.c.bf16 %v492_v43, %v491_v42  ;;  %v2792_v57 = vld [vmem:[%s3644_s27 + $0x10] sm:$0xff]   ;;  %v3664_v60 = vunpack.c.l.bf16 %v2791_v58  ;;  %v3677_v10 = vunpack.c.h.bf16 %v2793_v9  ;;  %v3689_v29 = vunpack.c.l.bf16 %v2793_v9 }
  0x6b   : > { %552 = vmatpush.bf16.msra.mxu0 %v2770_v3  ;;  %629 = vmatpush.bf16.msra.mxu1 %v2770_v3  ;;  %v3662_v59 = vunpack.c.l.bf16 %v2792_v57 }
  0x6c   : > { %771 = vmax.xlane.f32.xlu1 %v3664_v60 }
  0x6d   : > { %775 = vmax.xlane.f32.xlu2 %v3662_v59 }
  0x6f   : > { %553 = vmatpush.bf16.msra.mxu0 %v2769_v4  ;;  %630 = vmatpush.bf16.msra.mxu1 %v2769_v4  ;;  %v3668_v4 = vunpack.c.h.bf16 %v2792_v57 }
  0x73   : > { %554 = vmatpush.bf16.msra.mxu0 %v2768_v5  ;;  %631 = vmatpush.bf16.msra.mxu1 %v2768_v5  ;;  %v3670_v5 = vunpack.c.h.bf16 %v2791_v58 }
  0x75   : > { %777 = vmax.xlane.f32.xlu2 %v3668_v4  ;;  %773 = vmax.xlane.f32.xlu1 %v3670_v5 }
  0x77   : > { %555 = vmatpush.bf16.msra.mxu0 %v2767_v7  ;;  %632 = vmatpush.bf16.msra.mxu1 %v2767_v7 }
  0x7b   : > { %556 = vmatpush.bf16.msra.mxu0 %v2766_v8  ;;  %633 = vmatpush.bf16.msra.mxu1 %v2766_v8 }
  0x7d   : > { %781 = vmax.xlane.f32.xlu1 %v3677_v10 }
  0x7e   : > { %557 = vmatmul.bf16.vlgmr.msra.gmra.mxu0 %v493_v13  ;;  %634 = vmatmul.bf16.vlgmr.msra.gmra.mxu1 %v622_v14  ;;  %v2776_v14 = vld [vmem:[%s3644_s27] sm:$0xff]  }
  0x7f   : > { %729 = vmatpush.bf16.xpose.msrb.mxu0 %v721_v6  ;;  %v3681_v17 = vunpack.c.l.bf16 %v2776_v14  ;;  %v3686_v23 = vunpack.c.h.bf16 %v2776_v14 }
  0x81   : > { %767 = vmax.xlane.f32.xlu0 %v3681_v17 }
  0x89   : > { %769 = vmax.xlane.f32.xlu0 %v3686_v23 }
  0x8e   : > { %562 = vmatmul.bf16.gmra.mxu0 %v494_v19  ;;  %639 = vmatmul.bf16.gmra.mxu1 %v623_v20 }
  0x91   : > { %779 = vmax.xlane.f32.xlu0 %v3689_v29 }
  0x9e   : > { %567 = vmatmul.bf16.gmra.mxu0 %v495_v25  ;;  %644 = vmatmul.bf16.gmra.mxu1 %v624_v26 }
  0xae   : > { %572 = vmatmul.bf16.gmra.mxu0 %v496_v31  ;;  %649 = vmatmul.bf16.gmra.mxu1 %v625_v32 }
  0xbe   : > { %577 = vmatmul.bf16.gmra.mxu0 %v497_v35 }
  0xce   : > { %582 = vmatmul.bf16.gmra.mxu0 %v498_v38 }
  0xde   : > { %587 = vmatmul.bf16.gmra.mxu0 %v499_v41 }
  0xdf   : > { %v3735_v14 = vpop.xlane.xlu1 %771 }
  0xe0   : > { %5391 = vst [vmem:[#allocation25_spill] sm:$0xff] %v3735_v14 }
  0xee   : > { %592 = vmatmul.bf16.gmra.mxu0 %v500_v44 }
  0xfb   : > { %v558_v45 = vpop.f32.mrf.mxu0  ;;  %v635_v46 = vpop.f32.mrf.mxu1 }
  0xfc   : > { %v598_v47 = vpack.c.bf16 %v558_v45, %v558_v45 }
  0xfe   : > { %v672_v52 = vunpack.c.l.b16 %v598_v47  ;;  %v3406_v47 = vmov 1  }
  0xff   : > { %2905 = vset.pattern.permute.xlu0 %v3406_v47 }
 0x103   : > { %v560_v48 = vpop.f32.mrf.mxu0  ;;  %v637_v49 = vpop.f32.mrf.mxu1 }
 0x104   : > { %v599_v50 = vpack.c.bf16 %v560_v48, %v560_v48  ;;  %v717_v51 = vpack.c.bf16 %v637_v49, %v635_v46  ;;  %v3405_v46 = vmov 2  }
 0x105   : > { %2906 = vset.pattern.permute.xlu1 %v3405_v46 }
 0x106   : > { %v673_v53 = vunpack.c.l.b16 %v599_v50  ;;  %730 = vmatmul.bf16.vlgmr.msrb.gmra.mxu0 %v717_v51  ;;  %v3407_v51 = vmov 0  }
 0x107   : > { %2904 = vset.pattern.permute.xlu2 %v3407_v51 }
 0x108   : > { %v3658_v54 = vpack.c.b16 %v673_v53, %v672_v52 }
 0x10b   : > { %v563_v55 = vpop.f32.mrf.mxu0  ;;  %v640_v56 = vpop.f32.mrf.mxu1 }
 0x10c   : > { %v600_v61 = vpack.c.bf16 %v563_v55, %v563_v55 }
 0x10e   : > { %v674_v2 = vunpack.c.l.b16 %v600_v61 }
 0x113   : > { %v565_v62 = vpop.f32.mrf.mxu0  ;;  %v642_v63 = vpop.f32.mrf.mxu1 }
 0x114   : > { %v601_v0 = vpack.c.bf16 %v565_v62, %v565_v62  ;;  %v718_v1 = vpack.c.bf16 %v642_v63, %v640_v56 }
 0x116   : > { %v675_v3 = vunpack.c.l.b16 %v601_v0  ;;  %735 = vmatmul.bf16.vlgmr.msra.gmra.mxu3 %v718_v1 }
 0x118   : > { %v3672_v6 = vpack.c.b16 %v675_v3, %v674_v2 }
 0x11b   : > { %v568_v7 = vpop.f32.mrf.mxu0  ;;  %v645_v8 = vpop.f32.mrf.mxu1 }
 0x11c   : > { %v602_v11 = vpack.c.bf16 %v568_v7, %v568_v7 }
 0x11e   : > { %v676_v18 = vunpack.c.l.b16 %v602_v11 }
 0x123   : > { %v570_v12 = vpop.f32.mrf.mxu0  ;;  %v647_v13 = vpop.f32.mrf.mxu1 }
 0x124   : > { %v603_v15 = vpack.c.bf16 %v570_v12, %v570_v12  ;;  %v719_v16 = vpack.c.bf16 %v647_v13, %v645_v8  ;;  %v3409_v8 = vmov 3  }
 0x126   : > { %v677_v19 = vunpack.c.l.b16 %v603_v15  ;;  %740 = vmatmul.bf16.gmra.mxu3 %v719_v16  ;;  %v655_v15 = vld [vmem:[#allocation8] sm:$0xf]  ;;  %v3738_v16 = vpop.xlane.xlu2 %775 }
 0x127   : > { %5392 = vst [vmem:[#allocation26_spill] sm:$0xff] %v3738_v16 }
 0x128   : > { %v3684_v20 = vpack.c.b16 %v677_v19, %v676_v18  ;;  %v3742_v19 = vpop.xlane.xlu0 %767 }
 0x129   : > { %5393 = vst [vmem:[#allocation27_spill] sm:$0xff] %v3742_v19 }
 0x12b   : > { %v573_v21 = vpop.f32.mrf.mxu0  ;;  %v650_v22 = vpop.f32.mrf.mxu1 }
 0x12c   : > { %v604_v24 = vpack.c.bf16 %v573_v21, %v573_v21  ;;  %v3744_v21 = vpop.xlane.xlu1 %773 }
 0x12d   : > { %5394 = vst [vmem:[#allocation28_spill] sm:$0xff] %v3744_v21 }
 0x12e   : > { %v678_v30 = vunpack.c.l.b16 %v604_v24  ;;  %v3746_v24 = vpop.xlane.xlu2 %777 }
 0x12f   : > { %5395 = vst [vmem:[#allocation29_spill] sm:$0xff] %v3746_v24 }
 0x133   : > { %v575_v25 = vpop.f32.mrf.mxu0  ;;  %v652_v26 = vpop.f32.mrf.mxu1 }
 0x134   : > { %v605_v27 = vpack.c.bf16 %v575_v25, %v575_v25  ;;  %v720_v28 = vpack.c.bf16 %v652_v26, %v650_v22  ;;  %v3749_v25 = vpop.xlane.xlu0 %769  ;;  %v3751_v26 = vpop.xlane.xlu1 %781 }
 0x135   : > { %5396 = vst [vmem:[#allocation30_spill] sm:$0xff] %v3749_v25 }
 0x136   : > { %v679_v31 = vunpack.c.l.b16 %v605_v27  ;;  %745 = vmatmul.bf16.gmra.mxu3 %v720_v28  ;;  %5397 = vst [vmem:[#allocation31_spill] sm:$0xff] %v3751_v26 }
 0x138   : > { %v3692_v32 = vpack.c.b16 %v679_v31, %v678_v30 }
 0x13b   : > { %v578_v33 = vpop.f32.mrf.mxu0 }
 0x13c   : > { %v606_v63 = vpack.c.bf16 %v578_v33, %v578_v33  ;;  %v3756_v28 = vpop.xlane.xlu0 %779 }
 0x13d   : > { %5398 = vst [vmem:[#allocation32_spill] sm:$0xff] %v3756_v28 }
 0x13e   : > { %v680_v1 = vunpack.c.l.b16 %v606_v63 }
 0x143   : > { %v580_v34 = vpop.f32.mrf.mxu0 }
 0x144   : > { %v607_v62 = vpack.c.bf16 %v580_v34, %v580_v34 }
 0x146   : > { %v681_v0 = vunpack.c.l.b16 %v607_v62 }
 0x148   : > { %v3710_v3 = vpack.c.b16 %v681_v0, %v680_v1 }
 0x14b   : > { %v583_v35 = vpop.f32.mrf.mxu0 }
 0x14c   : > { %v608_v36 = vpack.c.bf16 %v583_v35, %v583_v35 }
 0x14e   : > { %v682_v39 = vunpack.c.l.b16 %v608_v36 }
 0x153   : > { %v585_v37 = vpop.f32.mrf.mxu0 }
 0x154   : > { %v609_v38 = vpack.c.bf16 %v585_v37, %v585_v37 }
 0x156   : > { %v683_v40 = vunpack.c.l.b16 %v609_v38 }
 0x158   : > { %v3694_v41 = vpack.c.b16 %v683_v40, %v682_v39 }
 0x15a   : > { %2341 = vrot.lane.b32.xlu2 %v3694_v41, %s3403_s15  ;;  %1905 = vrot.lane.b32.xlu1 %v3694_v41, %s3404_s28 }
 0x15b   : > { %v588_v42 = vpop.f32.mrf.mxu0 }
 0x15c   : > { %v610_v43 = vpack.c.bf16 %v588_v42, %v588_v42 }
 0x15e   : > { %v684_v48 = vunpack.c.l.b16 %v610_v43 }
 0x163   : > { %v590_v44 = vpop.f32.mrf.mxu0 }
 0x164   : > { %v611_v45 = vpack.c.bf16 %v590_v44, %v590_v44 }
 0x166   : > { %v685_v49 = vunpack.c.l.b16 %v611_v45 }
 0x168   : > { %v694_v50 = vpack.c.b16 %v685_v49, %v684_v48 }
 0x16a   : > { %2343 = vrot.lane.b32.xlu0 %v694_v50, %s3403_s15  ;;  %1907 = vrot.lane.b32.xlu1 %v694_v50, %s3404_s28 }
 0x16b   : > { %v593_v52 = vpop.f32.mrf.mxu0 }
 0x16c   : > { %v612_v53 = vpack.c.bf16 %v593_v52, %v593_v52 }
 0x16e   : > { %v686_v57 = vunpack.c.l.b16 %v612_v53 }
 0x172   : > { %1471 = vrot.lane.b32.xlu0 %v694_v50, %s3408_s26 }
 0x173   : > { %v595_v55 = vpop.f32.mrf.mxu0 }
 0x174   : > { %v613_v56 = vpack.c.bf16 %v595_v55, %v595_v55 }
 0x176   : > { %v687_v58 = vunpack.c.l.b16 %v613_v56 }
 0x178   : > { %v695_v61 = vpack.c.b16 %v687_v58, %v686_v57 }
 0x17a   : > { %2345 = vrot.lane.b32.xlu0 %v695_v61, %s3403_s15  ;;  %1909 = vrot.lane.b32.xlu2 %v695_v61, %s3404_s28 }
 0x17b   : > { %704 = vmatpush.bf16.xpose.msra.mxu2 %v695_v61  ;;  %1079 = vmatpush.bf16.msrb.mxu3 %v695_v61 }
 0x17f   : > { %1080 = vmatpush.bf16.msrb.mxu3 %v694_v50 }
 0x182   : > { %1473 = vrot.lane.b32.xlu2 %v695_v61, %s3408_s26 }
 0x183   : > { %705 = vmatpush.bf16.xpose.msra.mxu2 %v694_v50  ;;  %1081 = vmatpush.bf16.msrb.mxu3 %v3694_v41  ;;  %v731_v2 = vpop.f32.mrf.mxu0 }
 0x184   : > { %1643 = vperm.xlu1 %2906, %v731_v2   ;;  %1207 = vperm.xlu0 %2905, %v731_v2  }
 0x187   : > { %1082 = vmatpush.bf16.msrb.mxu3 %v3710_v3 }
 0x18a   : > { %820 = vperm.xlu2 %2904, %v731_v2  }
 0x18b   : > { %706 = vmatpush.bf16.xpose.msra.mxu2 %v3694_v41  ;;  %1083 = vmatpush.bf16.msrb.mxu3 %v3692_v32  ;;  %v733_v7 = vpop.f32.mrf.mxu0 }
 0x18c   : > { %2909 = vset.pattern.permute.xlu1 %v3406_v47  ;;  %2907 = vset.pattern.permute.xlu0 %v3409_v8 }
 0x18d   : > { %1211 = vperm.xlu1 %2909, %v733_v7   ;;  %2079 = vperm.xlu0 %2907, %v731_v2  }
 0x18f   : > { %1084 = vmatpush.bf16.msrb.mxu3 %v3684_v20 }
 0x192   : > { %2910 = vset.pattern.permute.xlu2 %v3405_v46 }
 0x193   : > { %707 = vmatpush.bf16.xpose.msra.mxu2 %v3710_v3  ;;  %1085 = vmatpush.bf16.msrb.mxu3 %v3672_v6 }
 0x194   : > { %1647 = vperm.xlu2 %2910, %v733_v7  }
 0x195   : > { %2911 = vset.pattern.permute.xlu1 %v3409_v8  ;;  %2908 = vset.pattern.permute.xlu0 %v3407_v51 }
 0x196   : > { %2083 = vperm.xlu1 %2911, %v733_v7   ;;  %825 = vperm.xlu0 %2908, %v733_v7  }
 0x197   : > { %1086 = vmatpush.bf16.msrb.mxu3 %v3658_v54 }
 0x199   : > { %v736_v9 = vpop.f32.mrf.mxu3 }
 0x19b   : > { %708 = vmatpush.bf16.xpose.msra.mxu2 %v3692_v32 }
 0x19c   : > { %2913 = vset.pattern.permute.xlu2 %v3406_v47 }
 0x19d   : > { %1215 = vperm.xlu2 %2913, %v736_v9  }
 0x19e   : > { %2912 = vset.pattern.permute.xlu1 %v3407_v51  ;;  %2924 = vset.pattern.permute.xlu0 %v3405_v46 }
 0x19f   : > { %830 = vperm.xlu1 %2912, %v736_v9  }
 0x1a1   : > { %v738_v11 = vpop.f32.mrf.mxu3 }
 0x1a3   : > { %709 = vmatpush.bf16.xpose.msra.mxu2 %v3684_v20 }
 0x1a5   : > { %2914 = vset.pattern.permute.xlu2 %v3405_v46 }
 0x1a6   : > { %1651 = vperm.xlu2 %2914, %v736_v9  }
 0x1a7   : > { %2917 = vset.pattern.permute.xlu1 %v3406_v47 }
 0x1a8   : > { %1219 = vperm.xlu1 %2917, %v738_v11  }
 0x1a9   : > { %v741_v12 = vpop.f32.mrf.mxu3 }
 0x1ab   : > { %710 = vmatpush.bf16.xpose.msra.mxu2 %v3672_v6 }
 0x1ae   : > { %2915 = vset.pattern.permute.xlu2 %v3409_v8 }
 0x1af   : > { %2087 = vperm.xlu2 %2915, %v736_v9  }
 0x1b0   : > { %2918 = vset.pattern.permute.xlu1 %v3405_v46 }
 0x1b1   : > { %v743_v13 = vpop.f32.mrf.mxu3  ;;  %1655 = vperm.xlu1 %2918, %v738_v11  }
 0x1b2   : > { %1663 = vperm.xlu0 %2924, %v743_v13  }
 0x1b3   : > { %711 = vmatpush.bf16.xpose.msra.mxu2 %v3658_v54 }
 0x1b4   : > { %v2342_v27 = vpop.permute.xlu2 %2341 }
 0x1b7   : > { %2916 = vset.pattern.permute.xlu2 %v3407_v51 }
 0x1b8   : > { %835 = vperm.xlu2 %2916, %v738_v11  }
 0x1b9   : > { %v746_v18 = vpop.f32.mrf.mxu3  ;;  %2919 = vset.pattern.permute.xlu1 %v3409_v8 }
 0x1ba   : > { %712 = vmatmul.bf16.vlgmr.msra.gmra.mxu2 %v655_v15  ;;  %2091 = vperm.xlu1 %2919, %v738_v11  }
 0x1bb   : > { %2931 = vset.pattern.permute.xlu0 %v3406_v47 }
 0x1c0   : > { %840 = vperm.xlu2 %2916, %v741_v12  }
 0x1c1   : > { %v748_v22 = vpop.f32.mrf.mxu3 }
 0x1c2   : > { %2095 = vperm.xlu1 %2919, %v741_v12   ;;  %1235 = vperm.xlu0 %2931, %v748_v22  }
 0x1c8   : > { %2920 = vset.pattern.permute.xlu2 %v3406_v47 }
 0x1c9   : > { %1223 = vperm.xlu2 %2920, %v741_v12  }
 0x1ca   : > { %2922 = vset.pattern.permute.xlu1 %v3407_v51  ;;  %2932 = vset.pattern.permute.xlu0 %v3405_v46 }
 0x1cb   : > { %845 = vperm.xlu1 %2922, %v743_v13   ;;  %1671 = vperm.xlu0 %2932, %v748_v22  }
 0x1cc   : > { %v1906_v30 = vpop.permute.xlu1 %1905 }
 0x1d1   : > { %2921 = vset.pattern.permute.xlu2 %v3405_v46 }
 0x1d2   : > { %1659 = vperm.xlu2 %2921, %v741_v12  }
 0x1d3   : > { %2923 = vset.pattern.permute.xlu1 %v3406_v47  ;;  %2933 = vset.pattern.permute.xlu0 %v3409_v8 }
 0x1d4   : > { %1227 = vperm.xlu1 %2923, %v743_v13   ;;  %2107 = vperm.xlu0 %2933, %v748_v22   ;;  %v1910_v31 = vpop.permute.xlu2 %1909 }
 0x1d5   : > { %1919 = vmatpush.bf16.msrb.mxu2 %v1910_v31 }
 0x1da   : > { %2925 = vset.pattern.permute.xlu2 %v3409_v8 }
 0x1db   : > { %2099 = vperm.xlu2 %2925, %v743_v13  }
 0x1dc   : > { %v2344_v33 = vpop.permute.xlu0 %2343  ;;  %v1908_v34 = vpop.permute.xlu1 %1907  ;;  %2929 = vset.pattern.permute.xlu1 %v3409_v8 }
 0x1dd   : > { %v1474_v35 = vpop.permute.xlu2 %1473  ;;  %2103 = vperm.xlu1 %2929, %v746_v18   ;;  %1920 = vmatpush.bf16.msrb.mxu2 %v1908_v34 }
 0x1de   : > { %1483 = vmatpush.bf16.msrb.mxu1 %v1474_v35 }
 0x1e1   : > { %1921 = vmatpush.bf16.msrb.mxu2 %v1906_v30 }
 0x1e3   : > { %2926 = vset.pattern.permute.xlu2 %v3407_v51 }
 0x1e4   : > { %850 = vperm.xlu2 %2926, %v746_v18   ;;  %v1472_v36 = vpop.permute.xlu0 %1471 }
 0x1e5   : > { %2930 = vset.pattern.permute.xlu1 %v3407_v51  ;;  %1484 = vmatpush.bf16.msrb.mxu1 %v1472_v36  ;;  %v821_v37 = vpop.permute.xlu2 %820 }
 0x1e6   : > { %855 = vperm.xlu1 %2930, %v748_v22  }
 0x1ec   : > { %2927 = vset.pattern.permute.xlu2 %v3406_v47  ;;  %v2346_v38 = vpop.permute.xlu0 %2345 }
 0x1ed   : > { %1231 = vperm.xlu2 %2927, %v746_v18   ;;  %2355 = vmatpush.bf16.msra.mxu3 %v2346_v38 }
 0x1ee   : > { %v3765_v39 = vpop.permute.xlu2 %1647 }
 0x1f1   : > { %2356 = vmatpush.bf16.msra.mxu3 %v2344_v33 }
 0x1f5   : > { %2928 = vset.pattern.permute.xlu2 %v3405_v46  ;;  %2357 = vmatpush.bf16.msra.mxu3 %v2342_v27 }
 0x1f6   : > { %1667 = vperm.xlu2 %2928, %v746_v18   ;;  %v3768_v40 = vpop.permute.xlu1 %1643  ;;  %v1208_v53 = vpop.permute.xlu0 %1207 }
 0x1f7   : > { %v3770_v42 = vpop.permute.xlu2 %1215 }
 0x1ff   : > { %v3772_v43 = vpop.permute.xlu1 %1211  ;;  %v3792_v58 = vpop.permute.xlu0 %2079 }
 0x200   : > { %v3774_v44 = vpop.permute.xlu2 %1651 }
 0x208   : > { %v3776_v45 = vpop.permute.xlu1 %2083  ;;  %v826_v1 = vpop.permute.xlu0 %825 }
 0x209   : > { %v3778_v47 = vpop.permute.xlu2 %2087 }
 0x211   : > { %v831_v48 = vpop.permute.xlu1 %830 }
 0x212   : > { %v836_v49 = vpop.permute.xlu2 %835 }
 0x21a   : > { %v3780_v50 = vpop.permute.xlu1 %1219  ;;  %v841_v51 = vpop.permute.xlu2 %840 }
 0x223   : > { %v3782_v46 = vpop.permute.xlu1 %1655  ;;  %v3784_v52 = vpop.permute.xlu2 %1223 }
 0x22c   : > { %v3786_v55 = vpop.permute.xlu1 %2091  ;;  %v3788_v56 = vpop.permute.xlu2 %1659 }
 0x234   : > { %v3790_v57 = vpop.permute.xlu1 %2095 }
 0x235   : > { %v3796_v63 = vpop.permute.xlu2 %2099 }
 0x23d   : > { %v3794_v61 = vpop.f32.mrf.mxu2  ;;  %v846_v62 = vpop.permute.xlu1 %845 }
 0x23e   : > { %v3799_v0 = vperm.slane %v3794_v61, 0  ;;  %v3816_v36 = vperm.slane %v3794_v61, 1  ;;  %v3887_v28 = vperm.slane %v3794_v61, 3 }
 0x240   : > { %v861_v2 = vadd.f32 %v3799_v0, %v831_v48  ;;  %v860_v7 = vadd.f32 %v3799_v0, %v826_v1  ;;  %v859_v8 = vadd.f32 %v3799_v0, %v821_v37  ;;  %v864_v9 = vadd.f32 %v3799_v0, %v846_v62 }
 0x241   : > { %v862_v11 = vadd.f32 %v3799_v0, %v836_v49  ;;  %v863_v18 = vadd.f32 %v3799_v0, %v841_v51  ;;  %v851_v49 = vpop.permute.xlu2 %850 }
 0x242   : > { %vm869_vm0 = vcmp.ge.f32.partialorder %v861_v2, 0.0  ;;  %v877_v12 = vmul.f32 0.2, %v861_v2  ;;  %vm868_vm1 = vcmp.ge.f32.partialorder %v860_v7, 0.0  ;;  %v876_v13 = vmul.f32 0.2, %v860_v7 }
 0x243   : > { %vm867_vm2 = vcmp.ge.f32.partialorder %v859_v8, 0.0  ;;  %v875_v15 = vmul.f32 0.2, %v859_v8  ;;  %v880_v37 = vmul.f32 0.2, %v864_v9  ;;  %vm872_vm3 = vcmp.ge.f32.partialorder %v864_v9, 0.0 }
 0x244   : > { %v885_v27 = vsel %vm869_vm0, %v861_v2, %v877_v12  ;;  %v884_v30 = vsel %vm868_vm1, %v860_v7, %v876_v13  ;;  %v878_v48 = vmul.f32 0.2, %v862_v11  ;;  %vm870_vm4 = vcmp.ge.f32.partialorder %v862_v11, 0.0 }
 0x245   : > { %v715_v22 = vpop.f32.mrf.mxu2  ;;  %v3810_v33 = vadd.f32 %v3664_v60, %v885_v27  ;;  %v3813_v34 = vadd.f32 %v3686_v23, %v884_v30  ;;  %v883_v35 = vsel %vm867_vm2, %v859_v8, %v875_v15  ;;  %v879_v51 = vmul.f32 0.2, %v863_v18 }
 0x246   : > { %v3807_v31 = vpop.permute.xlu1 %1227  ;;  %v3819_v38 = vadd.f32 %v3681_v17, %v883_v35  ;;  %vm871_vm5 = vcmp.ge.f32.partialorder %v863_v18, 0.0  ;;  %v865_v62 = vadd.f32 %v3799_v0, %v851_v49  ;;  %v888_v1 = vsel %vm872_vm3, %v864_v9, %v880_v37 }
 0x247   : > { %903 = vmax.xlane.f32.xlu1 %v3810_v33  ;;  %901 = vmax.xlane.f32.xlu2 %v3813_v34  ;;  %v886_v2 = vsel %vm870_vm4, %v862_v11, %v878_v48  ;;  %v1239_v7 = vadd.f32 %v3816_v36, %v1208_v53  ;;  %v887_v8 = vsel %vm871_vm5, %v863_v18, %v879_v51 }
 0x248   : > { %899 = vmax.xlane.f32.xlu0 %v3819_v38  ;;  %v3827_v12 = vadd.f32 %v3668_v4, %v888_v1  ;;  %v3830_v13 = vadd.f32 %v3670_v5, %v886_v2  ;;  %v881_v15 = vmul.f32 0.2, %v865_v62  ;;  %v3833_v22 = vadd.f32 %v3662_v59, %v887_v8  ;;  %v3850_v1 = vpop.permute.xlu0 %1663 }
 0x249   : > { %v1255_v30 = vmul.f32 0.2, %v1239_v7  ;;  %vm1247_vm6 = vcmp.ge.f32.partialorder %v1239_v7, 0.0  ;;  %vm873_vm7 = vcmp.ge.f32.partialorder %v865_v62, 0.0  ;;  %v1242_v11 = vadd.f32 %v3816_v36, %v3780_v50  ;;  %v1232_v48 = vpop.permute.xlu2 %1231 }
 0x24a   : > { %v889_v9 = vsel %vm873_vm7, %v865_v62, %v881_v15  ;;  %v1240_v18 = vadd.f32 %v3816_v36, %v3772_v43  ;;  %v1245_v50 = vadd.f32 %v3816_v36, %v1232_v48  ;;  %v1243_v2 = vadd.f32 %v3816_v36, %v3784_v52 }
 0x24b   : > { %v1263_v53 = vsel %vm1247_vm6, %v1239_v7, %v1255_v30  ;;  %v3848_v37 = vadd.f32 %v3689_v29, %v889_v9  ;;  %v1258_v49 = vmul.f32 0.2, %v1242_v11  ;;  %vm1250_vm8 = vcmp.ge.f32.partialorder %v1242_v11, 0.0 }
 0x24c   : > { %v3845_v35 = vadd.f32 %v3681_v17, %v1263_v53  ;;  %v1256_v51 = vmul.f32 0.2, %v1240_v18  ;;  %vm1248_vm9 = vcmp.ge.f32.partialorder %v1240_v18, 0.0  ;;  %v1241_v30 = vadd.f32 %v3816_v36, %v3770_v42 }
 0x24d   : > { %v1266_v8 = vsel %vm1250_vm8, %v1242_v11, %v1258_v49  ;;  %v3870_v48 = vperm.slane %v3794_v61, 2  ;;  %v1261_v52 = vmul.f32 0.2, %v1245_v50  ;;  %v1259_v11 = vmul.f32 0.2, %v1243_v2 }
 0x24e   : > { %v1264_v15 = vsel %vm1248_vm9, %v1240_v18, %v1256_v51  ;;  %v3861_v9 = vadd.f32 %v3670_v5, %v1266_v8  ;;  %vm1253_vm11 = vcmp.ge.f32.partialorder %v1245_v50, 0.0  ;;  %vm1251_vm12 = vcmp.ge.f32.partialorder %v1243_v2, 0.0 }
 0x24f   : > { %v3835_v27 = vpop.permute.xlu1 %2103  ;;  %909 = vmax.xlane.f32.xlu1 %v3827_v12  ;;  %905 = vmax.xlane.f32.xlu2 %v3830_v13  ;;  %v3864_v26 = vadd.f32 %v3686_v23, %v1264_v15  ;;  %v1257_v42 = vmul.f32 0.2, %v1241_v30  ;;  %vm1249_vm13 = vcmp.ge.f32.partialorder %v1241_v30, 0.0  ;;  %v1269_v49 = vsel %vm1253_vm11, %v1245_v50, %v1261_v52 }
 0x250   : > { %907 = vmax.xlane.f32.xlu0 %v3833_v22  ;;  %v1236_v18 = vpop.permute.xlu0 %1235  ;;  %v1267_v51 = vsel %vm1251_vm12, %v1243_v2, %v1259_v11  ;;  %v3881_v15 = vadd.f32 %v3689_v29, %v1269_v49  ;;  %v2112_v61 = vadd.f32 %v3887_v28, %v3776_v45 }
 0x251   : > { %v1265_v8 = vsel %vm1249_vm13, %v1241_v30, %v1257_v42  ;;  %v1676_v30 = vadd.f32 %v3870_v48, %v3765_v39  ;;  %v2111_v42 = vadd.f32 %v3887_v28, %v3792_v58 }
 0x252   : > { %v3890_v50 = vadd.f32 %v3664_v60, %v1265_v8  ;;  %vm2120_vm1 = vcmp.ge.f32.partialorder %v2112_v61, 0.0  ;;  %v1677_v8 = vadd.f32 %v3870_v48, %v3774_v44 }
 0x253   : > { %vm1684_vm2 = vcmp.ge.f32.partialorder %v1676_v30, 0.0  ;;  %v2127_v39 = vmul.f32 0.2, %v2111_v42  ;;  %vm2119_vm3 = vcmp.ge.f32.partialorder %v2111_v42, 0.0 }
 0x254   : > { %vm1685_vm5 = vcmp.ge.f32.partialorder %v1677_v8, 0.0 }
 0x257   : > { %1279 = vmax.xlane.f32.xlu1 %v3845_v35  ;;  %911 = vmax.xlane.f32.xlu2 %v3848_v37 }
 0x258   : > { %v856_v62 = vpop.permute.xlu1 %855 }
 0x259   : > { %v866_v43 = vadd.f32 %v3799_v0, %v856_v62  ;;  %v1675_v62 = vadd.f32 %v3870_v48, %v3768_v40 }
 0x25b   : > { %v882_v7 = vmul.f32 0.2, %v866_v43  ;;  %vm874_vm10 = vcmp.ge.f32.partialorder %v866_v43, 0.0  ;;  %v1691_v2 = vmul.f32 0.2, %v1675_v62  ;;  %vm1683_vm14 = vcmp.ge.f32.partialorder %v1675_v62, 0.0 }
 0x25d   : > { %v890_v53 = vsel %vm874_vm10, %v866_v43, %v882_v7  ;;  %v1246_v43 = vadd.f32 %v3816_v36, %v1236_v18  ;;  %v1244_v7 = vadd.f32 %v3816_v36, %v3807_v31  ;;  %v1699_v31 = vsel %vm1683_vm14, %v1675_v62, %v1691_v2 }
 0x25e   : > { %v3867_v0 = vadd.f32 %v3677_v10, %v890_v53  ;;  %v3884_v53 = vadd.f32 %v3662_v59, %v1267_v51  ;;  %v3902_v18 = vadd.f32 %v3681_v17, %v1699_v31  ;;  %v2128_v62 = vmul.f32 0.2, %v2112_v61 }
 0x25f   : > { %1285 = vmax.xlane.f32.xlu1 %v3861_v9  ;;  %1281 = vmax.xlane.f32.xlu2 %v3864_v26  ;;  %v1262_v40 = vmul.f32 0.2, %v1246_v43  ;;  %v1260_v52 = vmul.f32 0.2, %v1244_v7  ;;  %vm1254_vm15 = vcmp.ge.f32.partialorder %v1246_v43, 0.0  ;;  %vm1252_vm0 = vcmp.ge.f32.partialorder %v1244_v7, 0.0 }
 0x260   : > { %913 = vmax.xlane.f32.xlu0 %v3867_v0  ;;  %v2136_v45 = vsel %vm2120_vm1, %v2112_v61, %v2128_v62  ;;  %v2135_v2 = vsel %vm2119_vm3, %v2111_v42, %v2127_v39  ;;  %v2115_v42 = vadd.f32 %v3887_v28, %v3790_v57 }
 0x261   : > { %v1270_v36 = vsel %vm1254_vm15, %v1246_v43, %v1262_v40  ;;  %v1268_v11 = vsel %vm1252_vm0, %v1244_v7, %v1260_v52  ;;  %v1692_v43 = vmul.f32 0.2, %v1676_v30  ;;  %v1678_v7 = vadd.f32 %v3870_v48, %v3782_v46 }
 0x262   : > { %v3905_v49 = vadd.f32 %v3677_v10, %v1270_v36  ;;  %v3908_v51 = vadd.f32 %v3668_v4, %v1268_v11  ;;  %v2113_v40 = vadd.f32 %v3887_v28, %v3778_v47  ;;  %v3920_v52 = vadd.f32 %v3686_v23, %v2136_v45 }
 0x263   : > { %v1700_v58 = vsel %vm1684_vm2, %v1676_v30, %v1692_v43  ;;  %v3926_v36 = vadd.f32 %v3681_v17, %v2135_v2  ;;  %v1694_v61 = vmul.f32 0.2, %v1678_v7  ;;  %v1693_v30 = vmul.f32 0.2, %v1677_v8 }
 0x264   : > { %v3923_v31 = vadd.f32 %v3686_v23, %v1700_v58  ;;  %vm1686_vm4 = vcmp.ge.f32.partialorder %v1678_v7, 0.0  ;;  %v2129_v44 = vmul.f32 0.2, %v2113_v40  ;;  %vm2121_vm6 = vcmp.ge.f32.partialorder %v2113_v40, 0.0 }
 0x265   : > { %v1702_v47 = vsel %vm1686_vm4, %v1678_v7, %v1694_v61  ;;  %v1701_v46 = vsel %vm1685_vm5, %v1677_v8, %v1693_v30  ;;  %v1679_v23 = vadd.f32 %v3870_v48, %v3788_v56  ;;  %v2114_v17 = vadd.f32 %v3887_v28, %v3786_v55 }
 0x266   : > { %v2137_v11 = vsel %vm2121_vm6, %v2113_v40, %v2129_v44  ;;  %v3938_v62 = vadd.f32 %v3670_v5, %v1702_v47  ;;  %v3941_v43 = vadd.f32 %v3664_v60, %v1701_v46  ;;  %v2131_v55 = vmul.f32 0.2, %v2115_v42  ;;  %v1672_v40 = vpop.permute.xlu0 %1671 }
 0x267   : > { %1291 = vmax.xlane.f32.xlu1 %v3881_v15  ;;  %1287 = vmax.xlane.f32.xlu2 %v3884_v53  ;;  %v3944_v39 = vadd.f32 %v3664_v60, %v2137_v11  ;;  %v1695_v45 = vmul.f32 0.2, %v1679_v23  ;;  %v2130_v58 = vmul.f32 0.2, %v2114_v17  ;;  %vm1687_vm7 = vcmp.ge.f32.partialorder %v1679_v23, 0.0 }
 0x268   : > { %1283 = vmax.xlane.f32.xlu0 %v3890_v50  ;;  %vm2122_vm8 = vcmp.ge.f32.partialorder %v2114_v17, 0.0  ;;  %vm2123_vm9 = vcmp.ge.f32.partialorder %v2115_v42, 0.0  ;;  %v2116_v7 = vadd.f32 %v3887_v28, %v3796_v63  ;;  %v1680_v60 = vadd.f32 %v3870_v48, %v3850_v1 }
 0x269   : > { %v1703_v56 = vsel %vm1687_vm7, %v1679_v23, %v1695_v45  ;;  %v2138_v57 = vsel %vm2122_vm8, %v2114_v17, %v2130_v58  ;;  %v2117_v8 = vadd.f32 %v3887_v28, %v3835_v27  ;;  %v2139_v2 = vsel %vm2123_vm9, %v2115_v42, %v2131_v55  ;;  %v1668_v23 = vpop.permute.xlu2 %1667 }
 0x26a   : > { %v3956_v61 = vadd.f32 %v3662_v59, %v1703_v56  ;;  %v3959_v30 = vadd.f32 %v3670_v5, %v2138_v57  ;;  %v3962_v44 = vadd.f32 %v3662_v59, %v2139_v2  ;;  %v2132_v47 = vmul.f32 0.2, %v2116_v7 }
 0x26b   : > { %v1696_v46 = vmul.f32 0.2, %v1680_v60  ;;  %v2133_v63 = vmul.f32 0.2, %v2117_v8  ;;  %vm2124_vm10 = vcmp.ge.f32.partialorder %v2116_v7, 0.0  ;;  %vm1688_vm11 = vcmp.ge.f32.partialorder %v1680_v60, 0.0 }
 0x26c   : > { %vm2125_vm12 = vcmp.ge.f32.partialorder %v2117_v8, 0.0  ;;  %v1682_v27 = vadd.f32 %v3870_v48, %v1672_v40  ;;  %v1681_v5 = vadd.f32 %v3870_v48, %v1668_v23  ;;  %v2140_v1 = vsel %vm2124_vm10, %v2116_v7, %v2132_v47 }
 0x26d   : > { %v1704_v59 = vsel %vm1688_vm11, %v1680_v60, %v1696_v46  ;;  %v2141_v17 = vsel %vm2125_vm12, %v2117_v8, %v2133_v63  ;;  %v3970_v11 = vadd.f32 %v3668_v4, %v2140_v1 }
 0x26e   : > { %v3973_v42 = vadd.f32 %v3668_v4, %v1704_v59  ;;  %v1698_v45 = vmul.f32 0.2, %v1682_v27  ;;  %v1697_v58 = vmul.f32 0.2, %v1681_v5  ;;  %v3976_v55 = vadd.f32 %v3689_v29, %v2141_v17  ;;  %v2108_v56 = vpop.permute.xlu0 %2107 }
 0x26f   : > { %1715 = vmax.xlane.f32.xlu1 %v3902_v18  ;;  %1293 = vmax.xlane.f32.xlu2 %v3905_v49  ;;  %vm1690_vm13 = vcmp.ge.f32.partialorder %v1682_v27, 0.0  ;;  %vm1689_vm14 = vcmp.ge.f32.partialorder %v1681_v5, 0.0  ;;  %v2118_v48 = vadd.f32 %v3887_v28, %v2108_v56 }
 0x270   : > { %1289 = vmax.xlane.f32.xlu0 %v3908_v51  ;;  %v1706_v57 = vsel %vm1690_vm13, %v1682_v27, %v1698_v45  ;;  %v1705_v7 = vsel %vm1689_vm14, %v1681_v5, %v1697_v58 }
 0x271   : > { %v3983_v4 = vadd.f32 %v3677_v10, %v1706_v57  ;;  %v3986_v60 = vadd.f32 %v3689_v29, %v1705_v7  ;;  %v2134_v8 = vmul.f32 0.2, %v2118_v48  ;;  %vm2126_vm15 = vcmp.ge.f32.partialorder %v2118_v48, 0.0 }
 0x273   : > { %v2142_v2 = vsel %vm2126_vm15, %v2118_v48, %v2134_v8 }
 0x274   : > { %v3991_v40 = vadd.f32 %v3677_v10, %v2142_v2 }
 0x277   : > { %2153 = vmax.xlane.f32.xlu1 %v3920_v52  ;;  %1717 = vmax.xlane.f32.xlu2 %v3923_v31 }
 0x278   : > { %2151 = vmax.xlane.f32.xlu0 %v3926_v36 }
 0x27f   : > { %1721 = vmax.xlane.f32.xlu1 %v3938_v62  ;;  %1719 = vmax.xlane.f32.xlu2 %v3941_v43 }
 0x280   : > { %2155 = vmax.xlane.f32.xlu0 %v3944_v39 }
 0x287   : > { %1723 = vmax.xlane.f32.xlu1 %v3956_v61  ;;  %2157 = vmax.xlane.f32.xlu2 %v3959_v30 }
 0x288   : > { %2159 = vmax.xlane.f32.xlu0 %v3962_v44 }
 0x28f   : > { %2161 = vmax.xlane.f32.xlu1 %v3970_v11  ;;  %1725 = vmax.xlane.f32.xlu2 %v3973_v42 }
 0x290   : > { %2163 = vmax.xlane.f32.xlu0 %v3976_v55 }
 0x297   : > { %1729 = vmax.xlane.f32.xlu1 %v3983_v4  ;;  %1727 = vmax.xlane.f32.xlu2 %v3986_v60 }
 0x29f   : > { %2165 = vmax.xlane.f32.xlu2 %v3991_v40 }
 0x2a4   : > { %1901 = vrot.lane.b32.xlu0 %v3692_v32, %s3404_s28 }
 0x2ac   : > { %1465 = vrot.lane.b32.xlu0 %v3692_v32, %s3408_s26 }
 0x2b0   : > { %1467 = vrot.lane.b32.xlu1 %v3710_v3, %s3408_s26 }
 0x2b4   : > { %1463 = vrot.lane.b32.xlu0 %v3684_v20, %s3408_s26 }
 0x2b7   : > { %1903 = vrot.lane.b32.xlu2 %v3710_v3, %s3404_s28 }
 0x2b8   : > { %1897 = vrot.lane.b32.xlu1 %v3672_v6, %s3404_s28 }
 0x2ba   : > { %v904_v10 = vpop.xlane.xlu1 %903  ;;  %v4006_v29 = vpop.xlane.xlu2 %901 }
 0x2bb   : > { %v900_v28 = vpop.xlane.xlu0 %899  ;;  %v917_v5 = vsub.f32 %v3810_v33, %v904_v10 }
 0x2bd   : > { %v927_v17 = vmul.f32 1.442695, %v917_v5 }
 0x2bf   : > { %1469 = vrot.lane.b32.xlu2 %v3694_v41, %s3408_s26  ;;  %v915_v41 = vsub.f32 %v3819_v38, %v900_v28  ;;  %2937 = vpow2.f32 %v927_v17 }
 0x2c1   : > { %v923_v58 = vmul.f32 1.442695, %v915_v41 }
 0x2c2   : > { %v910_v47 = vpop.xlane.xlu1 %909  ;;  %v906_v46 = vpop.xlane.xlu2 %905 }
 0x2c3   : > { %v4012_v27 = vpop.xlane.xlu0 %907  ;;  %2939 = vpow2.f32 %v923_v58  ;;  %v918_v48 = vsub.f32 %v3830_v13, %v906_v46 }
 0x2c5   : > { %v4030_v38 = vpop.eup %2937  ;;  %v929_v7 = vmul.f32 1.442695, %v918_v48 }
 0x2c7   : > { %2339 = vrot.lane.b32.xlu2 %v3710_v3, %s3403_s15  ;;  %v920_v3 = vsub.f32 %v3827_v12, %v910_v47 }
 0x2c9   : > { %v4036_v8 = vpop.eup %2939 }
 0x2ca   : > { %v1280_v63 = vpop.xlane.xlu1 %1279  ;;  %v912_v23 = vpop.xlane.xlu2 %911 }
 0x2cb   : > { %v1295_v12 = vsub.f32 %v3845_v35, %v1280_v63  ;;  %v921_v10 = vsub.f32 %v3848_v37, %v912_v23 }
 0x2cd   : > { %v1303_v13 = vmul.f32 1.442695, %v1295_v12 }
 0x2cf   : > { %2337 = vrot.lane.b32.xlu2 %v3692_v32, %s3403_s15  ;;  %v933_v32 = vmul.f32 1.442695, %v920_v3 }
 0x2d1   : > { %2941 = vpow2.f32 %v933_v32 }
 0x2d2   : > { %v1286_v1 = vpop.xlane.xlu1 %1285  ;;  %v1282_v59 = vpop.xlane.xlu2 %1281  ;;  %2943 = vpow2.f32 %v929_v7 }
 0x2d3   : > { %v4018_v45 = vpop.xlane.xlu0 %913  ;;  %2945 = vpow2.f32 %v1303_v13  ;;  %v1298_v35 = vsub.f32 %v3861_v9, %v1286_v1  ;;  %v1296_v23 = vsub.f32 %v3864_v26, %v1282_v59 }
 0x2d5   : > { %v1309_v37 = vmul.f32 1.442695, %v1298_v35  ;;  %v1305_v3 = vmul.f32 1.442695, %v1296_v23 }
 0x2d7   : > { %1899 = vrot.lane.b32.xlu2 %v3684_v20, %s3404_s28  ;;  %v4046_v46 = vpop.eup %2941 }
 0x2d8   : > { %v4050_v63 = vpop.eup %2943 }
 0x2d9   : > { %v4056_v41 = vpop.eup %2945 }
 0x2da   : > { %v4023_v56 = vpop.xlane.xlu1 %1291  ;;  %v4025_v33 = vpop.xlane.xlu2 %1287 }
 0x2db   : > { %v4028_v57 = vpop.xlane.xlu0 %1283 }
 0x2de   : > { %943 = vadd.xlane.f32.xlu0 %v4030_v38 }
 0x2df   : > { %2335 = vrot.lane.b32.xlu2 %v3684_v20, %s3403_s15  ;;  %v935_v20 = vmul.f32 1.442695, %v921_v10 }
 0x2e1   : > { %2947 = vpow2.f32 %v935_v20 }
 0x2e2   : > { %v4038_v2 = vpop.xlane.xlu2 %1293  ;;  %939 = vadd.xlane.f32.xlu1 %v4036_v8  ;;  %v4044_v47 = vpop.xlane.xlu1 %1715  ;;  %2949 = vpow2.f32 %v1309_v37 }
 0x2e3   : > { %v4042_v28 = vpop.xlane.xlu0 %1289  ;;  %2951 = vpow2.f32 %v1305_v3 }
 0x2e6   : > { %949 = vadd.xlane.f32.xlu0 %v4046_v46 }
 0x2e7   : > { %v4060_v1 = vpop.eup %2947 }
 0x2e8   : > { %v4066_v59 = vpop.eup %2949 }
 0x2e9   : > { %v4069_v13 = vpop.eup %2951 }
 0x2ea   : > { %v4052_v5 = vpop.xlane.xlu2 %1717  ;;  %945 = vadd.xlane.f32.xlu1 %v4050_v63  ;;  %v2154_v58 = vpop.xlane.xlu1 %2153 }
 0x2eb   : > { %v2152_v17 = vpop.xlane.xlu0 %2151  ;;  %v2168_v48 = vsub.f32 %v3920_v52, %v2154_v58 }
 0x2ec   : > { %v2167_v9 = vsub.f32 %v3926_v36, %v2152_v17  ;;  %v916_v36 = vsub.f32 %v3813_v34, %v4006_v29  ;;  %v919_v34 = vsub.f32 %v3833_v22, %v4012_v27 }
 0x2ed   : > { %v2177_v7 = vmul.f32 1.442695, %v2168_v48 }
 0x2ee   : > { %1319 = vadd.xlane.f32.xlu0 %v4056_v41  ;;  %v2175_v26 = vmul.f32 1.442695, %v2167_v9  ;;  %v925_v35 = vmul.f32 1.442695, %v916_v36  ;;  %v922_v9 = vsub.f32 %v3867_v0, %v4018_v45 }
 0x2f0   : > { %2953 = vpow2.f32 %v2175_v26  ;;  %v937_v27 = vmul.f32 1.442695, %v922_v9 }
 0x2f1   : > { %2955 = vpow2.f32 %v2177_v7 }
 0x2f2   : > { %v4062_v32 = vpop.xlane.xlu2 %1719  ;;  %951 = vadd.xlane.f32.xlu1 %v4060_v1  ;;  %v1722_v12 = vpop.xlane.xlu1 %1721  ;;  %2957 = vpow2.f32 %v925_v35 }
 0x2f3   : > { %v1734_v52 = vsub.f32 %v3938_v62, %v1722_v12  ;;  %v4080_v23 = vpop.xlane.xlu0 %2155  ;;  %v931_v62 = vmul.f32 1.442695, %v919_v34  ;;  %v1297_v12 = vsub.f32 %v3890_v50, %v4028_v57 }
 0x2f5   : > { %v1745_v37 = vmul.f32 1.442695, %v1734_v52  ;;  %v1307_v52 = vmul.f32 1.442695, %v1297_v12 }
 0x2f6   : > { %1325 = vadd.xlane.f32.xlu0 %v4066_v59  ;;  %v4077_v20 = vpop.eup %2953 }
 0x2f7   : > { %v4082_v17 = vpop.eup %2955  ;;  %2959 = vpow2.f32 %v1745_v37  ;;  %v1731_v37 = vsub.f32 %v3902_v18, %v4044_v47 }
 0x2f8   : > { %v4089_v58 = vpop.eup %2957  ;;  %2961 = vpow2.f32 %v931_v62 }
 0x2f9   : > { %2963 = vpow2.f32 %v937_v27  ;;  %v1739_v57 = vmul.f32 1.442695, %v1731_v37  ;;  %v1732_v27 = vsub.f32 %v3923_v31, %v4052_v5  ;;  %v2169_v5 = vsub.f32 %v3944_v39, %v4080_v23 }
 0x2fa   : > { %v4073_v10 = vpop.xlane.xlu2 %2157  ;;  %1321 = vadd.xlane.f32.xlu1 %v4069_v13  ;;  %v4098_v26 = vpop.xlane.xlu1 %1723  ;;  %2965 = vpow2.f32 %v1307_v52 }
 0x2fb   : > { %v4096_v48 = vpop.xlane.xlu0 %2159  ;;  %2967 = vpow2.f32 %v1739_v57  ;;  %v1741_v18 = vmul.f32 1.442695, %v1732_v27 }
 0x2fd   : > { %v4092_v3 = vpop.eup %2959  ;;  %2969 = vpow2.f32 %v1741_v18 }
 0x2fe   : > { %2191 = vadd.xlane.f32.xlu0 %v4077_v20  ;;  %v4103_v7 = vpop.eup %2961 }
 0x2ff   : > { %v4116_v35 = vpop.eup %2963 }
 0x300   : > { %v4123_v9 = vpop.eup %2965 }
 0x301   : > { %v4130_v37 = vpop.eup %2967 }
 0x302   : > { %v4086_v29 = vpop.xlane.xlu2 %1725  ;;  %2193 = vadd.xlane.f32.xlu1 %v4082_v17  ;;  %v4114_v45 = vpop.xlane.xlu1 %2161 }
 0x303   : > { %v4112_v0 = vpop.xlane.xlu0 %2163  ;;  %v4139_v57 = vpop.eup %2969 }
 0x308   : > { %941 = vadd.xlane.f32.xlu2 %v4089_v58 }
 0x30a   : > { %v4100_v22 = vpop.xlane.xlu2 %1727  ;;  %1761 = vadd.xlane.f32.xlu1 %v4092_v3  ;;  %v4121_v62 = vpop.xlane.xlu1 %1729 }
 0x310   : > { %947 = vadd.xlane.f32.xlu2 %v4103_v7 }
 0x312   : > { %v4108_v36 = vpop.xlane.xlu2 %2165  ;;  %2333 = vrot.lane.b32.xlu0 %v3672_v6, %s3403_s15 }
 0x316   : > { %v1902_v50 = vpop.permute.xlu0 %1901 }
 0x318   : > { %953 = vadd.xlane.f32.xlu2 %v4116_v35 }
 0x31a   : > { %v1904_v34 = vpop.permute.xlu2 %1903 }
 0x31b   : > { %1922 = vmatpush.bf16.msrb.mxu2 %v1904_v34  ;;  %v1733_v34 = vsub.f32 %v3941_v43, %v4062_v32  ;;  %v2170_v43 = vsub.f32 %v3959_v30, %v4073_v10  ;;  %v2171_v10 = vsub.f32 %v3962_v44, %v4096_v48  ;;  %v2174_v44 = vsub.f32 %v3991_v40, %v4108_v36 }
 0x31d   : > { %v1743_v31 = vmul.f32 1.442695, %v1733_v34  ;;  %v2181_v18 = vmul.f32 1.442695, %v2170_v43  ;;  %v2189_v48 = vmul.f32 1.442695, %v2174_v44 }
 0x31e   : > { %v1466_v47 = vpop.permute.xlu0 %1465 }
 0x31f   : > { %1923 = vmatpush.bf16.msrb.mxu2 %v1902_v50  ;;  %2971 = vpow2.f32 %v1743_v31  ;;  %v1737_v31 = vsub.f32 %v3986_v60, %v4100_v22 }
 0x320   : > { %1323 = vadd.xlane.f32.xlu2 %v4123_v9 }
 0x322   : > { %v1470_v12 = vpop.permute.xlu2 %1469  ;;  %v1468_v52 = vpop.permute.xlu1 %1467 }
 0x323   : > { %1485 = vmatpush.bf16.msrb.mxu1 %v1470_v12  ;;  %1895 = vrot.lane.b32.xlu1 %v3658_v54, %s3404_s28  ;;  %v2179_v12 = vmul.f32 1.442695, %v2169_v5 }
 0x325   : > { %2973 = vpow2.f32 %v2179_v12 }
 0x326   : > { %v1464_v27 = vpop.permute.xlu0 %1463  ;;  %2975 = vpow2.f32 %v2181_v18 }
 0x327   : > { %1486 = vmatpush.bf16.msrb.mxu1 %v1468_v52 }
 0x328   : > { %1755 = vadd.xlane.f32.xlu2 %v4130_v37 }
 0x32a   : > { %v2340_v50 = vpop.permute.xlu2 %2339  ;;  %v1898_v52 = vpop.permute.xlu1 %1897 }
 0x32b   : > { %2358 = vmatpush.bf16.msra.mxu3 %v2340_v50  ;;  %1459 = vrot.lane.b32.xlu1 %v3658_v54, %s3408_s26  ;;  %v2183_v50 = vmul.f32 1.442695, %v2171_v10  ;;  %v1735_v10 = vsub.f32 %v3956_v61, %v4098_v26 }
 0x32c   : > { %1487 = vmatpush.bf16.msrb.mxu1 %v1466_v47  ;;  %v4144_v47 = vpop.eup %2971 }
 0x32d   : > { %v4147_v23 = vpop.eup %2973  ;;  %2977 = vpow2.f32 %v2183_v50 }
 0x32e   : > { %v4150_v34 = vpop.eup %2975 }
 0x330   : > { %1488 = vmatpush.bf16.msrb.mxu1 %v1464_v27  ;;  %1757 = vadd.xlane.f32.xlu2 %v4139_v57  ;;  %v1751_v27 = vmul.f32 1.442695, %v1737_v31 }
 0x332   : > { %v2338_v32 = vpop.permute.xlu2 %2337  ;;  %2979 = vpow2.f32 %v1751_v27 }
 0x333   : > { %2359 = vmatpush.bf16.msra.mxu3 %v2338_v32  ;;  %v4161_v12 = vpop.eup %2977  ;;  %2981 = vpow2.f32 %v2189_v48 }
 0x334   : > { %5399 = vst [vmem:[#allocation33_spill] sm:$0xff] %v4161_v12 }
 0x338   : > { %1759 = vadd.xlane.f32.xlu2 %v4144_v47 }
 0x33a   : > { %v1900_v39 = vpop.permute.xlu2 %1899 }
 0x33b   : > { %1924 = vmatpush.bf16.msrb.mxu2 %v1900_v39 }
 0x33c   : > { %2195 = vadd.xlane.f32.xlu0 %v4147_v23 }
 0x33f   : > { %1925 = vmatpush.bf16.msrb.mxu2 %v1898_v52 }
 0x340   : > { %2197 = vadd.xlane.f32.xlu2 %v4150_v34 }
 0x342   : > { %v2336_v30 = vpop.permute.xlu2 %2335 }
 0x343   : > { %2360 = vmatpush.bf16.msra.mxu3 %v2336_v30  ;;  %v1299_v30 = vsub.f32 %v3884_v53, %v4025_v33  ;;  %v1300_v53 = vsub.f32 %v3908_v51, %v4042_v28  ;;  %v2172_v33 = vsub.f32 %v3970_v11, %v4114_v45 }
 0x345   : > { %v1311_v27 = vmul.f32 1.442695, %v1299_v30  ;;  %v1313_v28 = vmul.f32 1.442695, %v1300_v53  ;;  %v2185_v11 = vmul.f32 1.442695, %v2172_v33 }
 0x350   : > { %2331 = vrot.lane.b32.xlu0 %v3658_v54, %s3403_s15  ;;  %v4172_v54 = vpop.eup %2979 }
 0x351   : > { %v4159_v5 = vpop.xlane.xlu0 %943  ;;  %5400 = vst [vmem:[#allocation34_spill] sm:$0xff] %v4172_v54  ;;  %v4179_v18 = vpop.eup %2981 }
 0x352   : > { %5401 = vst [vmem:[#allocation35_spill] sm:$0xff] %v4179_v18 }
 0x355   : > { %v4163_v43 = vpop.xlane.xlu1 %939  ;;  %2199 = vadd.xlane.f32.xlu1 %v4161_v12 }
 0x356   : > { %2983 = vrcp.f32 %v4163_v43  ;;  %vm960_vm1 = vweird.f32 %v4163_v43  ;;  %v964_v21 = vand.u32 2147483647, %v4163_v43  ;;  %v966_v14 = vand.u32 2147483648, %v4163_v43 }
 0x358   : > { %1461 = vrot.lane.b32.xlu2 %v3672_v6, %s3408_s26  ;;  %v1736_v6 = vsub.f32 %v3973_v42, %v4086_v29  ;;  %v1301_v42 = vsub.f32 %v3881_v15, %v4023_v56  ;;  %v1747_v29 = vmul.f32 1.442695, %v1735_v10  ;;  %v1738_v15 = vsub.f32 %v3983_v4, %v4121_v62 }
 0x359   : > { %v4170_v60 = vpop.xlane.xlu0 %949  ;;  %vm965_vm12 = vcmp.eq.f32.partialorder %v964_v21, 8.507059e+37 }
 0x35a   : > { %v1749_v52 = vmul.f32 1.442695, %v1736_v6  ;;  %v1315_v48 = vmul.f32 1.442695, %v1301_v42  ;;  %v1753_v62 = vmul.f32 1.442695, %v1738_v15 }
 0x35c   : > { %v4198_v31 = vpop.eup %2983 }
 0x35d   : > { %v4174_v22 = vpop.xlane.xlu1 %945  ;;  %1767 = vadd.xlane.f32.xlu1 %v4172_v54  ;;  %v956_v61 = vmul.f32 %v4198_v31, %v4163_v43  ;;  %vm961_vm4 = vweird.f32 %v4198_v31 }
 0x35e   : > { %vm4291_vm8 = vmor %vm960_vm1, %vm961_vm4  ;;  %vm1002_vm1 = vweird.f32 %v4174_v22  ;;  %vm988_vm4 = vweird.f32 %v4159_v5 }
 0x35f   : > { %v957_v6 = vsub.f32 1.0, %v956_v61 }
 0x361   : > { %v4177_v32 = vpop.xlane.xlu0 %1319  ;;  %v958_v42 = vmul.f32 %v4198_v31, %v957_v6 }
 0x365   : > { %v4181_v39 = vpop.xlane.xlu1 %951  ;;  %2205 = vadd.xlane.f32.xlu1 %v4179_v18 }
 0x369   : > { %v4184_v40 = vpop.xlane.xlu0 %1325 }
 0x36d   : > { %v4189_v36 = vpop.xlane.xlu1 %1321 }
 0x371   : > { %v4195_v50 = vpop.xlane.xlu0 %2191 }
 0x372   : > { %2985 = vrcp.f32 %v4195_v50  ;;  %vm2212_vm2 = vweird.f32 %v4195_v50 }
 0x373   : > { %2987 = vpow2.f32 %v1749_v52 }
 0x375   : > { %v4202_v44 = vpop.xlane.xlu1 %2193 }
 0x376   : > { %2989 = vrcp.f32 %v4202_v44  ;;  %vm2226_vm6 = vweird.f32 %v4202_v44 }
 0x377   : > { %2991 = vpow2.f32 %v1311_v27 }
 0x378   : > { %v4211_v26 = vpop.eup %2985  ;;  %2993 = vpow2.f32 %v1747_v29 }
 0x379   : > { %v4215_v56 = vpop.eup %2987  ;;  %v2208_v51 = vmul.f32 %v4211_v26, %v4195_v50  ;;  %2995 = vrcp.f32 %v4159_v5  ;;  %vm2213_vm0 = vweird.f32 %v4211_v26 }
 0x37a   : > { %5402 = vst [vmem:[#allocation36_spill] sm:$0xff] %v4215_v56  ;;  %1765 = vadd.xlane.f32.xlu0 %v4215_v56  ;;  %2997 = vrcp.f32 %v4174_v22  ;;  %vm4254_vm5 = vmor %vm2212_vm2, %vm2213_vm0 }
 0x37b   : > { %v2209_v45 = vsub.f32 1.0, %v2208_v51  ;;  %v4222_v52 = vpop.xlane.xlu2 %941 }
 0x37c   : > { %v4224_v4 = vpop.eup %2989  ;;  %2999 = vrcp.f32 %v4222_v52  ;;  %vm974_vm13 = vweird.f32 %v4222_v52 }
 0x37d   : > { %3001 = vpow2.f32 %v1315_v48  ;;  %v2210_v30 = vmul.f32 %v4211_v26, %v2209_v45  ;;  %v2222_v10 = vmul.f32 %v4224_v4, %v4202_v44  ;;  %v4230_v27 = vpop.eup %2991  ;;  %v2218_v48 = vand.u32 2147483648, %v4195_v50 }
 0x37e   : > { %5403 = vst [vmem:[#allocation37_spill] sm:$0xff] %v4230_v27  ;;  %3003 = vpow2.f32 %v1313_v28  ;;  %v4233_v29 = vpop.eup %2993  ;;  %v2216_v28 = vand.u32 2147483647, %v4195_v50  ;;  %vm2227_vm3 = vweird.f32 %v4224_v4  ;;  %v959_v45 = vadd.f32 %v4198_v31, %v958_v42 }
 0x37f   : > { %5404 = vst [vmem:[#allocation38_spill] sm:$0xff] %v4233_v29  ;;  %3005 = vpow2.f32 %v2185_v11  ;;  %v2211_v53 = vadd.f32 %v4211_v26, %v2210_v30  ;;  %v2223_v61 = vsub.f32 1.0, %v2222_v10  ;;  %v4237_v33 = vpop.eup %2995  ;;  %v2232_v50 = vand.u32 2147483648, %v4202_v44  ;;  %vm4279_vm7 = vmor %vm2226_vm6, %vm2227_vm3 }
 0x380   : > { %3007 = vpow2.f32 %v1753_v62  ;;  %v4243_v51 = vpop.eup %2997  ;;  %vm2217_vm9 = vcmp.eq.f32.partialorder %v2216_v28, 8.507059e+37  ;;  %v963_v43 = vsel %vm4291_vm8, %v4198_v31, %v959_v45  ;;  %v978_v28 = vand.u32 2147483647, %v4222_v52 }
 0x381   : > { %v2224_v6 = vmul.f32 %v4224_v4, %v2223_v61  ;;  %1763 = vadd.xlane.f32.xlu2 %v4233_v29  ;;  %v2215_v10 = vsel %vm4254_vm5, %v4211_v26, %v2211_v53  ;;  %v2230_v61 = vand.u32 2147483647, %v4202_v44  ;;  %v998_v18 = vmul.f32 %v4243_v51, %v4174_v22 }
 0x382   : > { %v3000_v11 = vpop.eup %2999  ;;  %1327 = vadd.xlane.f32.xlu0 %v4230_v27  ;;  %v2219_v27 = vor.u32 1.1754944e-38, %v2218_v48  ;;  %v2233_v56 = vor.u32 1.1754944e-38, %v2232_v50  ;;  %v980_v29 = vand.u32 2147483648, %v4222_v52  ;;  %v967_v26 = vor.u32 1.1754944e-38, %v966_v14 }
 0x383   : > { %v4261_v30 = vpop.eup %3001  ;;  %v2225_v42 = vadd.f32 %v4224_v4, %v2224_v6  ;;  %v970_v15 = vmul.f32 %v3000_v11, %v4222_v52  ;;  %v4269_v24 = vpop.xlane.xlu2 %947  ;;  %v984_v6 = vmul.f32 %v4237_v33, %v4159_v5  ;;  %vm2231_vm10 = vcmp.eq.f32.partialorder %v2230_v61, 8.507059e+37 }
 0x384   : > { %v4271_v16 = vpop.eup %3003  ;;  %v2334_v44 = vpop.permute.xlu0 %2333  ;;  %v2220_v12 = vsel %vm2217_vm9, %v2219_v27, %v2215_v10  ;;  %vm975_vm11 = vweird.f32 %v3000_v11  ;;  %3009 = vrcp.f32 %v4170_v60  ;;  %v968_v14 = vsel %vm965_vm12, %v967_v26, %v963_v43 }
 0x385   : > { %v4283_v53 = vpop.eup %3005  ;;  %v2229_v48 = vsel %vm4279_vm7, %v4224_v4, %v2225_v42  ;;  %v971_v54 = vsub.f32 1.0, %v970_v15  ;;  %2361 = vmatpush.bf16.msra.mxu3 %v2334_v44  ;;  %v999_v4 = vsub.f32 1.0, %v998_v18  ;;  %v4308_v50 = vmul.f32 %v4077_v20, %v2220_v12  ;;  %vm976_vm14 = vmor %vm974_vm13, %vm975_vm11  ;;  %v4321_v18 = vpop.xlane.xlu1 %1761 }
 0x386   : > { %v4298_v25 = vpop.eup %3007  ;;  %v2234_v15 = vsel %vm2231_vm10, %v2233_v56, %v2229_v48  ;;  %v985_v27 = vsub.f32 1.0, %v984_v6  ;;  %vm979_vm15 = vcmp.eq.f32.partialorder %v978_v28, 8.507059e+37  ;;  %3011 = vrcp.f32 %v4269_v24 }
 0x387   : > { %v972_v19 = vmul.f32 %v3000_v11, %v971_v54  ;;  %v4311_v31 = vmul.f32 %v4082_v17, %v2234_v15  ;;  %v981_v54 = vor.u32 1.1754944e-38, %v980_v29  ;;  %v1000_v17 = vmul.f32 %v4243_v51, %v999_v4 }
 0x388   : > { %v1067_v56 = vmul.f32 %v4036_v8, %v968_v14  ;;  %v5411_v29 = vsub.f32 %v3976_v55, %v4112_v0  ;;  %v986_v10 = vmul.f32 %v4237_v33, %v985_v27  ;;  %v1302_v44 = vsub.f32 %v3905_v49, %v4038_v2 }
 0x389   : > { %v973_v42 = vadd.f32 %v3000_v11, %v972_v19  ;;  %2201 = vadd.xlane.f32.xlu2 %v4283_v53  ;;  %v2327_v20 = vpack.c.bf16 %v4311_v31, %v4308_v50  ;;  %v1001_v8 = vadd.f32 %v4243_v51, %v1000_v17  ;;  %vm1003_vm0 = vweird.f32 %v4243_v51 }
 0x38a   : > { %1769 = vadd.xlane.f32.xlu0 %v4298_v25  ;;  %v2187_v45 = vmul.f32 1.442695, %v5411_v29  ;;  %v1008_v55 = vand.u32 2147483648, %v4174_v22  ;;  %v987_v49 = vadd.f32 %v4237_v33, %v986_v10  ;;  %vm989_vm2 = vweird.f32 %v4237_v33  ;;  %vm4351_vm3 = vmor %vm1002_vm1, %vm1003_vm0 }
 0x38b   : > { %v4316_v19 = vpop.xlane.xlu2 %953  ;;  %v977_v21 = vsel %vm976_vm14, %v3000_v11, %v973_v42  ;;  %v4329_v11 = vpop.eup %3009  ;;  %v1006_v2 = vand.u32 2147483647, %v4174_v22  ;;  %v1317_v0 = vmul.f32 1.442695, %v1302_v44  ;;  %v994_v62 = vand.u32 2147483648, %v4159_v5  ;;  %vm990_vm5 = vmor %vm988_vm4, %vm989_vm2 }
 0x38c   : > { %v982_v12 = vsel %vm979_vm15, %v981_v54, %v977_v21  ;;  %v4333_v6 = vpop.eup %3011  ;;  %3013 = vpow2.f32 %v2187_v45  ;;  %v1026_v48 = vmul.f32 %v4329_v11, %v4170_v60  ;;  %v992_v22 = vand.u32 2147483647, %v4159_v5 }
 0x38d   : > { %v1068_v52 = vmul.f32 %v4089_v58, %v982_v12  ;;  %v1012_v43 = vmul.f32 %v4333_v6, %v4269_v24  ;;  %3015 = vrcp.f32 %v4177_v32  ;;  %v1005_v4 = vsel %vm4351_vm3, %v4243_v51, %v1001_v8 }
 0x38e   : > { %3017 = vrcp.f32 %v4181_v39  ;;  %v1009_v15 = vor.u32 1.1754944e-38, %v1008_v55  ;;  %v991_v42 = vsel %vm990_vm5, %v4237_v33, %v987_v49  ;;  %vm1007_vm6 = vcmp.eq.f32.partialorder %v1006_v2, 8.507059e+37  ;;  %v4390_v55 = vld [vmem:[%s5345_s5] ss:$0 sm:$0xff] }
 0x38f   : > { %v1075_v61 = vpack.c.bf16 %v1068_v52, %v1067_v56  ;;  %v1027_v54 = vsub.f32 1.0, %v1026_v48  ;;  %v1013_v14 = vsub.f32 1.0, %v1012_v43  ;;  %v995_v21 = vor.u32 1.1754944e-38, %v994_v62  ;;  %1520 = vrot.lane.b32.xlu1 %v4390_v55, %s3408_s26 }
 0x390   : > { %v1010_v12 = vsel %vm1007_vm6, %v1009_v15, %v1005_v4  ;;  %3019 = vpow2.f32 %v1317_v0  ;;  %vm993_vm7 = vcmp.eq.f32.partialorder %v992_v22, 8.507059e+37  ;;  %v1036_v10 = vand.u32 2147483648, %v4170_v60 }
 0x391   : > { %1087 = vmatmul.bf16.vlgmr.msrb.gmra.mxu3 %v1075_v61  ;;  %1329 = vadd.xlane.f32.xlu2 %v4271_v16  ;;  %3021 = vrcp.f32 %v4189_v36  ;;  %v996_v5 = vsel %vm993_vm7, %v995_v21, %v991_v42  ;;  %v1070_v33 = vmul.f32 %v4050_v63, %v1010_v12  ;;  %v1028_v52 = vmul.f32 %v4329_v11, %v1027_v54 }
 0x392   : > { %1331 = vadd.xlane.f32.xlu0 %v4261_v30  ;;  %v4363_v27 = vpop.eup %3013  ;;  %3023 = vrcp.f32 %v4316_v19  ;;  %v1014_v29 = vmul.f32 %v4333_v6, %v1013_v14  ;;  %v1069_v45 = vmul.f32 %v4030_v38, %v996_v5  ;;  %vm1031_vm8 = vweird.f32 %v4329_v11 }
 0x393   : > { %v4341_v58 = vpop.xlane.xlu2 %1323  ;;  %v4367_v51 = vpop.eup %3015  ;;  %vm1017_vm9 = vweird.f32 %v4333_v6  ;;  %v1029_v2 = vadd.f32 %v4329_v11, %v1028_v52  ;;  %vm1030_vm10 = vweird.f32 %v4170_v60  ;;  %v1022_v62 = vand.u32 2147483648, %v4269_v24 }
 0x394   : > { %v4373_v56 = vpop.eup %3017  ;;  %v1336_v61 = vmul.f32 %v4367_v51, %v4177_v32  ;;  %v1076_v8 = vpack.c.bf16 %v1070_v33, %v1069_v45  ;;  %v1015_v38 = vadd.f32 %v4333_v6, %v1014_v29  ;;  %v1034_v48 = vand.u32 2147483647, %v4170_v60  ;;  %vm4409_vm12 = vmor %vm1030_vm10, %vm1031_vm8 }
 0x395   : > { %v1896_v26 = vpop.permute.xlu1 %1895  ;;  %v1040_v63 = vmul.f32 %v4373_v56, %v4181_v39  ;;  %vm1016_vm11 = vweird.f32 %v4269_v24  ;;  %v1037_v4 = vor.u32 1.1754944e-38, %v1036_v10  ;;  %v1346_v15 = vand.u32 2147483648, %v4177_v32  ;;  %v4443_v10 = vld [vmem:[%s5346_s6] ss:$0 sm:$0xff] }
 0x396   : > { %1926 = vmatpush.bf16.msrb.mxu2 %v1896_v26  ;;  %v4382_v44 = vpop.eup %3019  ;;  %v1337_v28 = vsub.f32 1.0, %v1336_v61  ;;  %v1020_v26 = vand.u32 2147483647, %v4269_v24  ;;  %vm4423_vm13 = vmor %vm1016_vm11, %vm1017_vm9  ;;  %v1033_v12 = vsel %vm4409_vm12, %v4329_v11, %v1029_v2  ;;  %v1050_v5 = vand.u32 2147483648, %v4181_v39 }
 0x397   : > { %v4392_v49 = vpop.eup %3021  ;;  %v1041_v60 = vsub.f32 1.0, %v1040_v63  ;;  %v1019_v21 = vsel %vm4423_vm13, %v4333_v6, %v1015_v38  ;;  %v1023_v29 = vor.u32 1.1754944e-38, %v1022_v62  ;;  %vm1035_vm15 = vcmp.eq.f32.partialorder %v1034_v48, 8.507059e+37  ;;  %1967 = vrot.lane.b32.xlu1 %v4443_v10, %s3404_s28 }
 0x398   : > { %v4397_v0 = vpop.eup %3023  ;;  %v1350_v14 = vmul.f32 %v4392_v49, %v4189_v36  ;;  %v1338_v45 = vmul.f32 %v4367_v51, %v1337_v28  ;;  %vm1021_vm14 = vcmp.eq.f32.partialorder %v1020_v26, 8.507059e+37  ;;  %v1038_v63 = vsel %vm1035_vm15, %v1037_v4, %v1033_v12 }
 0x399   : > { %2203 = vadd.xlane.f32.xlu2 %v4363_v27  ;;  %v1054_v33 = vmul.f32 %v4397_v0, %v4316_v19  ;;  %v1042_v11 = vmul.f32 %v4373_v56, %v1041_v60  ;;  %v1024_v61 = vsel %vm1021_vm14, %v1023_v29, %v1019_v21  ;;  %vm1340_vm0 = vweird.f32 %v4177_v32 }
 0x39a   : > { %v4451_v38 = vor.u32 1.1754944e-38, %v1346_v15  ;;  %v1351_v2 = vsub.f32 1.0, %v1350_v14  ;;  %v1048_v62 = vand.u32 2147483647, %v4181_v39  ;;  %vm1341_vm1 = vweird.f32 %v4367_v51 }
 0x39b   : > { %v4370_v17 = vpop.xlane.xlu2 %1755  ;;  %v1055_v28 = vsub.f32 1.0, %v1054_v33  ;;  %v4458_v26 = vor.u32 1.1754944e-38, %v1050_v5  ;;  %v4461_v4 = vadd.f32 %v4367_v51, %v1338_v45  ;;  %vm1044_vm2 = vweird.f32 %v4181_v39  ;;  %vm4517_vm13 = vmor %vm1340_vm0, %vm1341_vm1 }
 0x39c   : > { %3025 = vrcp.f32 %v4370_v17  ;;  %v1071_v15 = vmul.f32 %v4103_v7, %v1024_v61  ;;  %v1072_v60 = vmul.f32 %v4046_v46, %v1038_v63  ;;  %vm1045_vm3 = vweird.f32 %v4373_v56 }
 0x39d   : > { %3027 = vrcp.f32 %v4321_v18  ;;  %v4475_v21 = vadd.f32 %v4373_v56, %v1042_v11  ;;  %v1352_v7 = vmul.f32 %v4392_v49, %v1351_v2  ;;  %vm1354_vm5 = vweird.f32 %v4189_v36  ;;  %vm4536_vm1 = vmor %vm1044_vm2, %vm1045_vm3 }
 0x39e   : > { %v1782_v12 = vand.u32 2147483648, %v4370_v17  ;;  %v1056_v5 = vmul.f32 %v4397_v0, %v1055_v28  ;;  %vm1776_vm6 = vweird.f32 %v4370_v17  ;;  %v1780_v33 = vand.u32 2147483647, %v4370_v17 }
 0x39f   : > { %vm1355_vm7 = vweird.f32 %v4392_v49  ;;  %v1077_v11 = vpack.c.bf16 %v1072_v60, %v1071_v15  ;;  %v1353_v28 = vadd.f32 %v4392_v49, %v1352_v7  ;;  %vm4508_vm11 = vcmp.eq.f32.partialorder %v1048_v62, 8.507059e+37 }
 0x3a0   : > { %v1783_v60 = vor.u32 1.1754944e-38, %v1782_v12  ;;  %vm1059_vm12 = vweird.f32 %v4397_v0  ;;  %vm1781_vm14 = vcmp.eq.f32.partialorder %v1780_v33, 8.507059e+37  ;;  %v1057_v62 = vadd.f32 %v4397_v0, %v1056_v5  ;;  %vm4566_vm2 = vmor %vm1354_vm5, %vm1355_vm7 }
 0x3a1   : > { %1333 = vadd.xlane.f32.xlu2 %v4382_v44  ;;  %1092 = vmatmul.bf16.gmra.mxu3 %v1076_v8  ;;  %v1344_v8 = vand.u32 2147483647, %v4177_v32  ;;  %v1064_v7 = vand.u32 2147483648, %v4316_v19  ;;  %v1343_v39 = vsel %vm4517_vm13, %v4367_v51, %v4461_v4 }
 0x3a2   : > { %v4403_v43 = vpop.eup %3025 }
 0x3a3   : > { %v1772_v42 = vmul.f32 %v4403_v43, %v4370_v17  ;;  %v4419_v54 = vpop.xlane.xlu2 %1757  ;;  %v4454_v48 = vpop.eup %3027  ;;  %vm1777_vm4 = vweird.f32 %v4403_v43  ;;  %vm4503_vm10 = vcmp.eq.f32.partialorder %v1344_v8, 8.507059e+37 }
 0x3a4   : > { %3029 = vrcp.f32 %v4419_v54  ;;  %v1814_v46 = vmul.f32 %v4454_v48, %v4321_v18  ;;  %vm4490_vm8 = vmor %vm1776_vm6, %vm1777_vm4  ;;  %v1796_v45 = vand.u32 2147483648, %v4419_v54  ;;  %v1794_v61 = vand.u32 2147483647, %v4419_v54 }
 0x3a5   : > { %v1773_v52 = vsub.f32 1.0, %v1772_v42  ;;  %3031 = vrcp.f32 %v4184_v40  ;;  %vm1790_vm15 = vweird.f32 %v4419_v54  ;;  %vm1058_vm4 = vweird.f32 %v4316_v19 }
 0x3a6   : > { %1956 = vrot.lane.b32.xlu0 %v4390_v55, %s3404_s28  ;;  %v1815_v15 = vsub.f32 1.0, %v1814_v46  ;;  %v1797_v32 = vor.u32 1.1754944e-38, %v1796_v45  ;;  %vm1795_vm0 = vcmp.eq.f32.partialorder %v1794_v61, 8.507059e+37  ;;  %v1358_v45 = vand.u32 2147483647, %v4189_v36 }
 0x3a7   : > { %v1774_v6 = vmul.f32 %v4403_v43, %v1773_v52  ;;  %v4560_v61 = vld [vmem:[%s5347_s7] ss:$0 sm:$0xff] }
 0x3a8   : > { %v1816_v4 = vmul.f32 %v4454_v48, %v1815_v15  ;;  %1978 = vrot.lane.b32.xlu1 %v4560_v61, %s3404_s28  ;;  %vm1359_vm5 = vcmp.eq.f32.partialorder %v1358_v45, 8.507059e+37  ;;  %s2527_s28 = sshll.u32 %s4666_s12, 4  ;;  %s2528_s28 = int_to_ptr.vmem [resolvable:$true] %s2527_s28 }
 0x3a9   : > { %v1775_v42 = vadd.f32 %v4403_v43, %v1774_v6 }
 0x3aa   : > { %v3030_v22 = vpop.eup %3029 }
 0x3ab   : > { %v1786_v24 = vmul.f32 %v3030_v22, %v4419_v54  ;;  %v4472_v14 = vpop.xlane.xlu2 %1759  ;;  %v4497_v6 = vpop.eup %3031  ;;  %vm1791_vm9 = vweird.f32 %v3030_v22  ;;  %v1779_v63 = vsel %vm4490_vm8, %v4403_v43, %v1775_v42  ;;  %vm4549_vm8 = vmor %vm1058_vm4, %vm1059_vm12  ;;  %v1065_v43 = vor.u32 1.1754944e-38, %v1064_v7 }
 0x3ac   : > { %3033 = vrcp.f32 %v4472_v14  ;;  %vm1792_vm6 = vmor %vm1790_vm15, %vm1791_vm9  ;;  %v1784_v46 = vsel %vm1781_vm14, %v1783_v60, %v1779_v63  ;;  %v1061_v51 = vsel %vm4549_vm8, %v4397_v0, %v1057_v62  ;;  %v1810_v7 = vand.u32 2147483648, %v4472_v14 }
 0x3ad   : > { %v1787_v52 = vsub.f32 1.0, %v1786_v24  ;;  %3035 = vrcp.f32 %v4341_v58  ;;  %v1883_v60 = vmul.f32 %v4130_v37, %v1784_v46  ;;  %vm1819_vm9 = vweird.f32 %v4454_v48 }
 0x3ae   : > { %2392 = vrot.lane.b32.xlu0 %v4390_v55, %s3403_s15  ;;  %v1808_v24 = vand.u32 2147483647, %v4472_v14  ;;  %vm1818_vm12 = vweird.f32 %v4321_v18 }
 0x3af   : > { %v1788_v17 = vmul.f32 %v3030_v22, %v1787_v52  ;;  %v1062_v52 = vand.u32 2147483647, %v4316_v19  ;;  %v4603_v46 = vpop.xlane.xlu0 %2195  ;;  %vm4629_vm13 = vmor %vm1818_vm12, %vm1819_vm9 }
 0x3b0   : > { %vm1809_vm14 = vcmp.eq.f32.partialorder %v1808_v24, 8.507059e+37  ;;  %v2246_v31 = vand.u32 2147483648, %v4603_v46  ;;  %vm2240_vm12 = vweird.f32 %v4603_v46 }
 0x3b1   : > { %v1789_v8 = vadd.f32 %v3030_v22, %v1788_v17  ;;  %1097 = vmatmul.bf16.gmra.mxu3 %v1077_v11  ;;  %v1360_v11 = vand.u32 2147483648, %v4189_v36  ;;  %v1047_v36 = vsel %vm4536_vm1, %v4373_v56, %v4475_v21  ;;  %vm1063_vm3 = vcmp.eq.f32.partialorder %v1062_v52, 8.507059e+37 }
 0x3b2   : > { %v4523_v42 = vpop.eup %3033  ;;  %v1378_v56 = vmul.f32 %v4497_v6, %v4184_v40  ;;  %v1066_v15 = vsel %vm1063_vm3, %v1065_v43, %v1061_v51  ;;  %v1824_v52 = vand.u32 2147483648, %v4321_v18  ;;  %vm1382_vm1 = vweird.f32 %v4184_v40 }
 0x3b3   : > { %v1800_v12 = vmul.f32 %v4523_v42, %v4472_v14  ;;  %v4530_v33 = vpop.xlane.xlu2 %2197  ;;  %v1793_v54 = vsel %vm1792_vm6, %v3030_v22, %v1789_v8  ;;  %v4541_v29 = vpop.eup %3035  ;;  %v1361_v21 = vor.u32 1.1754944e-38, %v1360_v11  ;;  %vm1805_vm7 = vweird.f32 %v4523_v42 }
 0x3b4   : > { %v1798_v17 = vsel %vm1795_vm0, %v1797_v32, %v1793_v54  ;;  %v1357_v32 = vsel %vm4566_vm2, %v4392_v49, %v1353_v28  ;;  %v1364_v37 = vmul.f32 %v4541_v29, %v4341_v58  ;;  %v1052_v49 = vsel %vm4508_vm11, %v4458_v26, %v1047_v36 }
 0x3b5   : > { %v1801_v63 = vsub.f32 1.0, %v1800_v12  ;;  %v1884_v8 = vmul.f32 %v4139_v57, %v1798_v17  ;;  %v1348_v28 = vsel %vm4503_vm10, %v4451_v38, %v1343_v39  ;;  %v1362_v12 = vsel %vm1359_vm5, %v1361_v21, %v1357_v32 }
 0x3b6   : > { %2403 = vrot.lane.b32.xlu0 %v4443_v10, %s3403_s15  ;;  %v1817_v54 = vadd.f32 %v4454_v48, %v1816_v4  ;;  %v1365_v26 = vsub.f32 1.0, %v1364_v37  ;;  %vm1804_vm11 = vweird.f32 %v4472_v14  ;;  %v1074_v2 = vmul.f32 %v4116_v35, %v1066_v15 }
 0x3b7   : > { %v1802_v57 = vmul.f32 %v4523_v42, %v1801_v63  ;;  %v1891_v0 = vpack.c.bf16 %v1884_v8, %v1883_v60  ;;  %v1379_v5 = vsub.f32 1.0, %v1378_v56  ;;  %3037 = vrcp.f32 %v4530_v33  ;;  %vm4615_vm10 = vmor %vm1804_vm11, %vm1805_vm7 }
 0x3b8   : > { %v1073_v45 = vmul.f32 %v4060_v1, %v1052_v49  ;;  %v1448_v35 = vmul.f32 %v4069_v13, %v1362_v12  ;;  %v1822_v17 = vand.u32 2147483647, %v4321_v18  ;;  %3039 = vrcp.f32 %v4603_v46  ;;  %v1460_v13 = vpop.permute.xlu1 %1459 }
 0x3b9   : > { %1927 = vmatmul.bf16.vlgmr.msrb.gmra.mxu2 %v1891_v0  ;;  %v1803_v62 = vadd.f32 %v4523_v42, %v1802_v57  ;;  %1531 = vrot.lane.b32.xlu2 %v4443_v10, %s3408_s26  ;;  %v1447_v1 = vmul.f32 %v4056_v41, %v1348_v28  ;;  %v1811_v22 = vor.u32 1.1754944e-38, %v1810_v7  ;;  %v1366_v19 = vmul.f32 %v4541_v29, %v1365_v26 }
 0x3ba   : > { %v1078_v63 = vpack.c.bf16 %v1074_v2, %v1073_v45  ;;  %v1821_v18 = vsel %vm4629_vm13, %v4454_v48, %v1817_v54  ;;  %v1825_v60 = vor.u32 1.1754944e-38, %v1824_v52  ;;  %vm1823_vm15 = vcmp.eq.f32.partialorder %v1822_v17, 8.507059e+37 }
 0x3bb   : > { %v1462_v38 = vpop.permute.xlu2 %1461  ;;  %v1807_v14 = vsel %vm4615_vm10, %v4523_v42, %v1803_v62  ;;  %v1380_v42 = vmul.f32 %v4497_v6, %v1379_v5  ;;  %v1455_v8 = vpack.c.bf16 %v1448_v35, %v1447_v1  ;;  %v1367_v48 = vadd.f32 %v4541_v29, %v1366_v19 }
 0x3bc   : > { %1489 = vmatpush.bf16.msrb.mxu1 %v1462_v38  ;;  %v1812_v41 = vsel %vm1809_vm14, %v1811_v22, %v1807_v14  ;;  %v1826_v36 = vsel %vm1823_vm15, %v1825_v60, %v1821_v18  ;;  %vm1369_vm4 = vweird.f32 %v4541_v29  ;;  %v1374_v37 = vand.u32 2147483648, %v4341_v58 }
 0x3bd   : > { %v4640_v51 = vpop.eup %3037  ;;  %v1885_v43 = vmul.f32 %v4144_v47, %v1812_v41  ;;  %v1381_v57 = vadd.f32 %v4497_v6, %v1380_v42  ;;  %vm1383_vm6 = vweird.f32 %v4497_v6  ;;  %vm1368_vm0 = vweird.f32 %v4341_v58 }
 0x3be   : > { %v4645_v32 = vpop.eup %3039  ;;  %v2250_v0 = vmul.f32 %v4640_v51, %v4530_v33  ;;  %v1886_v56 = vmul.f32 %v4092_v3, %v1826_v36  ;;  %v1372_v47 = vand.u32 2147483647, %v4341_v58  ;;  %v1388_v21 = vand.u32 2147483648, %v4184_v40  ;;  %vm1370_vm8 = vmor %vm1368_vm0, %vm1369_vm4 }
 0x3bf   : > { %v2236_v15 = vmul.f32 %v4645_v32, %v4603_v46  ;;  %v1371_v28 = vsel %vm1370_vm8, %v4541_v29, %v1367_v48  ;;  %v1386_v62 = vand.u32 2147483647, %v4184_v40  ;;  %v1375_v7 = vor.u32 1.1754944e-38, %v1374_v37  ;;  %vm1384_vm2 = vmor %vm1382_vm1, %vm1383_vm6  ;;  %v5436_v37 = vld [vmem:[#allocation27_spill] sm:$0xff] }
 0x3c0   : > { %1490 = vmatpush.bf16.msrb.mxu1 %v1460_v13  ;;  %v1892_v49 = vpack.c.bf16 %v1886_v56, %v1885_v43  ;;  %v2251_v12 = vsub.f32 1.0, %v2250_v0  ;;  %vm1373_vm3 = vcmp.eq.f32.partialorder %v1372_v47, 8.507059e+37  ;;  %v1385_v3 = vsel %vm1384_vm2, %v4497_v6, %v1381_v57 }
 0x3c1   : > { %1102 = vmatmul.bf16.gmra.mxu3 %v1078_v63  ;;  %1542 = vrot.lane.b32.xlu2 %v4560_v61, %s3408_s26  ;;  %v1376_v58 = vsel %vm1373_vm3, %v1375_v7, %v1371_v28  ;;  %v1389_v54 = vor.u32 1.1754944e-38, %v1388_v21  ;;  %v2237_v26 = vsub.f32 1.0, %v2236_v15  ;;  %vm1387_vm5 = vcmp.eq.f32.partialorder %v1386_v62, 8.507059e+37 }
 0x3c2   : > { %v2332_v4 = vpop.permute.xlu0 %2331  ;;  %v3410_v40 = vmov 0.0   ;;  %v2252_v29 = vmul.f32 %v4640_v51, %v2251_v12  ;;  %v1449_v38 = vmul.f32 %v4123_v9, %v1376_v58  ;;  %vm2255_vm7 = vweird.f32 %v4640_v51 }
 0x3c3   : > { %1491 = vmatmul.bf16.vlgmr.msrb.gmra.mxu1 %v1455_v8  ;;  %2362 = vmatpush.bf16.msra.mxu3 %v2332_v4  ;;  %812 = vst [vmem:[%s4666_s12 + $0x10] sm:$0xff] %v3410_v40  ;;  %v1390_v6 = vsel %vm1387_vm5, %v1389_v54, %v1385_v3  ;;  %v2238_v2 = vmul.f32 %v4645_v32, %v2237_v26  ;;  %v2260_v9 = vand.u32 2147483648, %v4530_v33  ;;  %vm2254_vm9 = vweird.f32 %v4530_v33 }
 0x3c4   : > { %810 = vst [vmem:[%s4666_s12] sm:$0xff] %v3410_v40  ;;  %v1450_v24 = vmul.f32 %v4066_v59, %v1390_v6  ;;  %v2253_v52 = vadd.f32 %v4640_v51, %v2252_v29  ;;  %vm2241_vm11 = vweird.f32 %v4645_v32  ;;  %v2258_v50 = vand.u32 2147483647, %v4530_v33  ;;  %vm2256_vm10 = vmor %vm2254_vm9, %vm2255_vm7 }
 0x3c5   : > { %811 = vst [vmem:[%s4666_s12 + $0x8] sm:$0xff] %v3410_v40  ;;  %v2239_v59 = vadd.f32 %v4645_v32, %v2238_v2  ;;  %vm2242_vm13 = vmor %vm2240_vm12, %vm2241_vm11  ;;  %v2261_v11 = vor.u32 1.1754944e-38, %v2260_v9  ;;  %v2247_v14 = vor.u32 1.1754944e-38, %v2246_v31  ;;  %vm783_vm4 = vcmp.gt.f32.partialorder %v5436_v37, -1e+29 }
 0x3c6   : > { %813 = vst [vmem:[%s4666_s12 + $0x18] sm:$0xff] %v3410_v40  ;;  %v1456_v5 = vpack.c.bf16 %v1450_v24, %v1449_v38  ;;  %v2257_v45 = vsel %vm2256_vm10, %v4640_v51, %v2253_v52  ;;  %vm2259_vm14 = vcmp.eq.f32.partialorder %v2258_v50, 8.507059e+37 }
 0x3c7   : > { %814 = vst [vmem:[%s4666_s12 + $0x20] sm:$0xff] %v3410_v40  ;;  %v2243_v35 = vsel %vm2242_vm13, %v4645_v32, %v2239_v59  ;;  %v2262_v17 = vsel %vm2259_vm14, %v2261_v11, %v2257_v45 }
 0x3c8   : > { %815 = vst [vmem:[%s4666_s12 + $0x28] sm:$0xff] %v3410_v40  ;;  %v2322_v33 = vmul.f32 %v4150_v34, %v2262_v17  ;;  %v2200_v22 = vpop.xlane.xlu1 %2199 }
 0x3c9   : > { %1932 = vmatmul.bf16.gmra.mxu2 %v1892_v49  ;;  %2414 = vrot.lane.b32.xlu2 %v4560_v61, %s3403_s15  ;;  %816 = vst [vmem:[%s4666_s12 + $0x30] sm:$0xff] %v3410_v40  ;;  %3041 = vrcp.f32 %v2200_v22  ;;  %v2274_v43 = vand.u32 2147483648, %v2200_v22  ;;  %v2272_v32 = vand.u32 2147483647, %v2200_v22  ;;  %vm2268_vm0 = vweird.f32 %v2200_v22  ;;  %s2526_s15 = scalar_lea.hbm %s5349_s9, %s2774_s20 }
 0x3ca   : > { %817 = vst [vmem:[%s4666_s12 + $0x38] sm:$0xff] %v3410_v40  ;;  %v4736_v49 = vsel %vm783_vm4, 1.0, %v3410_v40  ;;  %s2529_s26 = sshll.u32 %s2526_s15, 4  ;;  %s2530_s26 = int_to_ptr.hbm [resolvable:$true] %s2529_s26 }
 0x3cb   : > { %vm4742_vm8 = vcmp.eq.f32.partialorder %v2272_v32, 8.507059e+37  ;;  %v2275_v7 = vor.u32 1.1754944e-38, %v2274_v43  ;;  %s3325_s13 = sshra.s32 %s2530_s26, 4  ;;  %s3326_s13 = int_to_ptr.hbm [resolvable:$true] %s3325_s13 }
 0x3cc   : > { %s3327_s25 = scalar_lea.hbm %s3326_s13, 64  ;;  %p3332_p2 = scmp.lt.s32.totalorder %s3326_s13, %s5349_s9 }
 0x3cd   : > { %p3328_p1 = scmp.ne.s32.totalorder %s3326_s13, %s3327_s25  ;;  %p3333_p10 = scmp.lt.s32.totalorder %s3331_s0, %s3327_s25 }
 0x3cf   : > { %v3042_v13 = vpop.eup %3041  ;;  %p3329_p4 = pnand %p3328_p1, %p3556_p3  ;;  %p3334_p11 = por %p3333_p10, %p3332_p2 }
 0x3d0   : > { %v2264_v63 = vmul.f32 %v3042_v13, %v2200_v22  ;;  %vm2269_vm6 = vweird.f32 %v3042_v13 }
 0x3d1   : > { %2363 = vmatmul.bf16.vlgmr.msra.gmra.mxu3 %v2327_v20  ;;  %v2244_v20 = vand.u32 2147483647, %v4603_v46  ;;  %v4705_v46 = vpop.xlane.xlu1 %1767  ;;  %vm4738_vm1 = vmor %vm2268_vm0, %vm2269_vm6  ;;  %p3330_p8 = pneg %p3329_p4 }
 0x3d2   : > { %3043 = vrcp.f32 %v4705_v46  ;;  %v2265_v42 = vsub.f32 1.0, %v2264_v63  ;;  %v1866_v56 = vand.u32 2147483648, %v4705_v46  ;;  %vm1860_vm2 = vweird.f32 %v4705_v46  ;;  %v5447_v63 = vld [vmem:[#allocation33_spill] sm:$0xff] }
 0x3d3   : > { %1496 = vmatmul.bf16.gmra.mxu1 %v1456_v5  ;;  %vm2245_vm15 = vcmp.eq.f32.partialorder %v2244_v20, 8.507059e+37  ;;  %v1864_v54 = vand.u32 2147483647, %v4705_v46  ;;  %p3335_p9 = pnand %p3334_p11, %p3330_p8 }
 0x3d4   : > { %v2248_v1 = vsel %vm2245_vm15, %v2247_v14, %v2243_v35  ;;  %v4760_v38 = vor.u32 1.1754944e-38, %v1866_v56 }
 0x3d5   : > { %v2321_v39 = vmul.f32 %v4147_v23, %v2248_v1  ;;  %v2266_v23 = vmul.f32 %v3042_v13, %v2265_v42  ;;  %vm4784_vm10 = vcmp.eq.f32.partialorder %v1864_v54, 8.507059e+37  ;;  %v5451_v54 = vld [vmem:[#allocation36_spill] sm:$0xff] }
 0x3d7   : > { %v2328_v19 = vpack.c.bf16 %v2322_v33, %v2321_v39  ;;  %v2267_v57 = vadd.f32 %v3042_v13, %v2266_v23 }
 0x3d8   : > { %v4713_v34 = vpop.eup %3043 }
 0x3d9   : > { %v4711_v41 = vpop.xlane.xlu1 %2205  ;;  %v1856_v51 = vmul.f32 %v4713_v34, %v4705_v46  ;;  %v2271_v58 = vsel %vm4738_vm1, %v3042_v13, %v2267_v57  ;;  %vm1861_vm11 = vweird.f32 %v4713_v34  ;;  %v5450_v46 = vld [vmem:[#allocation38_spill] sm:$0xff] }
 0x3da   : > { %v2316_v52 = vand.u32 2147483648, %v4711_v41  ;;  %v2276_v59 = vsel %vm4742_vm8, %v2275_v7, %v2271_v58  ;;  %v2314_v42 = vand.u32 2147483647, %v4711_v41  ;;  %vm4821_vm15 = vmor %vm1860_vm2, %vm1861_vm11  ;;  %vm2310_vm0 = vweird.f32 %v4711_v41 }
 0x3db   : > { %v1857_v0 = vsub.f32 1.0, %v1856_v51 }
 0x3dc   : > { %v4802_v23 = vor.u32 1.1754944e-38, %v2316_v52 }
 0x3dd   : > { %v1858_v26 = vmul.f32 %v4713_v34, %v1857_v0 }
 0x3df   : > { %v1859_v14 = vadd.f32 %v4713_v34, %v1858_v26 }
 0x3e1   : > { %2368 = vmatmul.bf16.gmra.mxu3 %v2328_v19 }
 0x3ed   : > { %v4708_v18 = vpop.xlane.xlu0 %1765 }
 0x3ee   : > { %3045 = vrcp.f32 %v4708_v18  ;;  %vm1846_vm5 = vweird.f32 %v4708_v18  ;;  %v1852_v9 = vand.u32 2147483648, %v4708_v18  ;;  %v1850_v20 = vand.u32 2147483647, %v4708_v18 }
 0x3ef   : > { %3047 = vrcp.f32 %v4711_v41 }
 0x3f0   : > { %v1853_v13 = vor.u32 1.1754944e-38, %v1852_v9  ;;  %vm1851_vm14 = vcmp.eq.f32.partialorder %v1850_v20, 8.507059e+37 }
 0x3f4   : > { %v4715_v60 = vpop.eup %3045  ;;  %v4718_v8 = vpop.xlane.xlu2 %1763 }
 0x3f5   : > { %v1842_v4 = vmul.f32 %v4715_v60, %v4708_v18  ;;  %3049 = vrcp.f32 %v4718_v8  ;;  %v4725_v36 = vpop.xlane.xlu0 %1327  ;;  %v4730_v47 = vpop.eup %3047  ;;  %vm1847_vm3 = vweird.f32 %v4715_v60  ;;  %v1838_v31 = vand.u32 2147483648, %v4718_v8 }
 0x3f6   : > { %3051 = vrcp.f32 %v4725_v36  ;;  %v2306_v6 = vmul.f32 %v4730_v47, %v4711_v41  ;;  %vm4778_vm9 = vmor %vm1846_vm5, %vm1847_vm3  ;;  %vm1832_vm12 = vweird.f32 %v4718_v8  ;;  %v1836_v33 = vand.u32 2147483647, %v4718_v8 }
 0x3f7   : > { %v1843_v48 = vsub.f32 1.0, %v1842_v4  ;;  %v4799_v18 = vmul.f32 %v5447_v63, %v2276_v59  ;;  %v1839_v43 = vor.u32 1.1754944e-38, %v1838_v31  ;;  %vm2311_vm1 = vweird.f32 %v4730_v47 }
 0x3f8   : > { %v2307_v45 = vsub.f32 1.0, %v2306_v6  ;;  %vm1837_vm4 = vcmp.eq.f32.partialorder %v1836_v33, 8.507059e+37 }
 0x3f9   : > { %v1844_v21 = vmul.f32 %v4715_v60, %v1843_v48 }
 0x3fa   : > { %v2308_v56 = vmul.f32 %v4730_v47, %v2307_v45 }
 0x3fb   : > { %v4733_v15 = vpop.eup %3049  ;;  %v1845_v5 = vadd.f32 %v4715_v60, %v1844_v21 }
 0x3fc   : > { %v1828_v12 = vmul.f32 %v4733_v15, %v4718_v8  ;;  %v4749_v3 = vpop.xlane.xlu2 %2201  ;;  %v4762_v2 = vpop.eup %3051  ;;  %vm1833_vm7 = vweird.f32 %v4733_v15 }
 0x3fd   : > { %3053 = vrcp.f32 %v4749_v3  ;;  %v4758_v29 = vpop.xlane.xlu0 %1769  ;;  %v1392_v11 = vmul.f32 %v4762_v2, %v4725_v36  ;;  %v1849_v22 = vsel %vm4778_vm9, %v4715_v60, %v1845_v5  ;;  %vm4794_vm13 = vmor %vm1832_vm12, %vm1833_vm7  ;;  %v2288_v28 = vand.u32 2147483648, %v4749_v3 }
 0x3fe   : > { %v1829_v24 = vsub.f32 1.0, %v1828_v12  ;;  %3055 = vrcp.f32 %v4758_v29  ;;  %v1854_v57 = vsel %vm1851_vm14, %v1853_v13, %v1849_v22  ;;  %vm2282_vm8 = vweird.f32 %v4749_v3  ;;  %v5456_v13 = vld [vmem:[#allocation30_spill] sm:$0xff] }
 0x3ff   : > { %v1393_v48 = vsub.f32 1.0, %v1392_v11  ;;  %v1888_v26 = vmul.f32 %v5451_v54, %v1854_v57  ;;  %v1880_v31 = vand.u32 2147483648, %v4758_v29  ;;  %v2289_v45 = vor.u32 1.1754944e-38, %v2288_v28 }
 0x400   : > { %v1830_v50 = vmul.f32 %v4733_v15, %v1829_v24  ;;  %v2309_v11 = vadd.f32 %v4730_v47, %v2308_v56  ;;  %vm1397_vm7 = vweird.f32 %v4762_v2  ;;  %vm4861_vm9 = vcmp.eq.f32.partialorder %v2314_v42, 8.507059e+37 }
 0x401   : > { %v1394_v6 = vmul.f32 %v4762_v2, %v1393_v48  ;;  %vm1874_vm11 = vweird.f32 %v4758_v29  ;;  %v1878_v19 = vand.u32 2147483647, %v4758_v29  ;;  %vm1396_vm12 = vweird.f32 %v4725_v36 }
 0x402   : > { %v1831_v1 = vadd.f32 %v4733_v15, %v1830_v50  ;;  %v1402_v50 = vand.u32 2147483648, %v4725_v36  ;;  %vm4880_vm14 = vmor %vm1396_vm12, %vm1397_vm7  ;;  %v1881_v0 = vor.u32 1.1754944e-38, %v1880_v31 }
 0x403   : > { %v3054_v39 = vpop.eup %3053 }
 0x404   : > { %v4804_v51 = vpop.eup %3055  ;;  %v2278_v8 = vmul.f32 %v3054_v39, %v4749_v3  ;;  %v4807_v4 = vpop.xlane.xlu2 %1329  ;;  %v1835_v60 = vsel %vm4794_vm13, %v4733_v15, %v1831_v1  ;;  %v1863_v15 = vsel %vm4821_vm15, %v4713_v34, %v1859_v14  ;;  %vm2283_vm6 = vweird.f32 %v3054_v39 }
 0x405   : > { %v1870_v32 = vmul.f32 %v4804_v51, %v4758_v29  ;;  %3057 = vrcp.f32 %v4807_v4  ;;  %v4815_v37 = vpop.xlane.xlu0 %1331  ;;  %v1840_v7 = vsel %vm1837_vm4, %v1839_v43, %v1835_v60  ;;  %v2286_v34 = vand.u32 2147483647, %v4749_v3  ;;  %vm4844_vm2 = vmor %vm2282_vm8, %vm2283_vm6 }
 0x406   : > { %v2279_v21 = vsub.f32 1.0, %v2278_v8  ;;  %3059 = vrcp.f32 %v4815_v37  ;;  %v1887_v58 = vmul.f32 %v5450_v46, %v1840_v7  ;;  %v1868_v9 = vsel %vm4784_vm10, %v4760_v38, %v1863_v15  ;;  %vm4897_vm8 = vmor %vm2310_vm0, %vm2311_vm1 }
 0x407   : > { %v1871_v62 = vsub.f32 1.0, %v1870_v32  ;;  %vm1875_vm3 = vweird.f32 %v4804_v51  ;;  %vm2287_vm5 = vcmp.eq.f32.partialorder %v2286_v34, 8.507059e+37  ;;  %v1395_v1 = vadd.f32 %v4762_v2, %v1394_v6 }
 0x408   : > { %v2280_v12 = vmul.f32 %v3054_v39, %v2279_v21  ;;  %v1893_v5 = vpack.c.bf16 %v1888_v26, %v1887_v58  ;;  %vm784_vm10 = vcmp.gt.f32.partialorder %v5456_v13, -1e+29  ;;  %v1416_v63 = vand.u32 2147483648, %v4807_v4  ;;  %vm4874_vm13 = vmor %vm1874_vm11, %vm1875_vm3  ;;  %v5465_v26 = vld [vmem:[#allocation34_spill] sm:$0xff] }
 0x409   : > { %v1872_v24 = vmul.f32 %v4804_v51, %v1871_v62  ;;  %v1400_v60 = vand.u32 2147483647, %v4725_v36  ;;  %v1399_v32 = vsel %vm4880_vm14, %v4762_v2, %v1395_v1  ;;  %v1414_v57 = vand.u32 2147483647, %v4807_v4 }
 0x40a   : > { %v2281_v52 = vadd.f32 %v3054_v39, %v2280_v12  ;;  %1937 = vmatmul.bf16.gmra.mxu2 %v1893_v5  ;;  %vm1410_vm4 = vweird.f32 %v4807_v4  ;;  %v1403_v56 = vor.u32 1.1754944e-38, %v1402_v50  ;;  %vm1879_vm6 = vcmp.eq.f32.partialorder %v1878_v19, 8.507059e+37 }
 0x40b   : > { %v3058_v59 = vpop.eup %3057  ;;  %v1873_v14 = vadd.f32 %v4804_v51, %v1872_v24  ;;  %v1417_v15 = vor.u32 1.1754944e-38, %v1416_v63  ;;  %v2313_v28 = vsel %vm4897_vm8, %v4730_v47, %v2309_v11  ;;  %vm1415_vm0 = vcmp.eq.f32.partialorder %v1414_v57, 8.507059e+37 }
 0x40c   : > { %v1406_v3 = vmul.f32 %v3058_v59, %v4807_v4  ;;  %v4850_v35 = vpop.xlane.xlu2 %2203  ;;  %v2285_v38 = vsel %vm4844_vm2, %v3054_v39, %v2281_v52  ;;  %v4856_v17 = vpop.eup %3059  ;;  %vm1411_vm15 = vweird.f32 %v3058_v59  ;;  %vm1401_vm2 = vcmp.eq.f32.partialorder %v1400_v60, 8.507059e+37 }
 0x40d   : > { %3061 = vrcp.f32 %v4850_v35  ;;  %v2290_v39 = vsel %vm2287_vm5, %v2289_v45, %v2285_v38  ;;  %v1420_v29 = vmul.f32 %v4856_v17, %v4815_v37  ;;  %vm4901_vm3 = vmor %vm1410_vm4, %vm1411_vm15  ;;  %v1404_v46 = vsel %vm1401_vm2, %v1403_v56, %v1399_v32 }
 0x40e   : > { %v1407_v22 = vsub.f32 1.0, %v1406_v3  ;;  %v2324_v8 = vmul.f32 %v4283_v53, %v2290_v39  ;;  %v1877_v53 = vsel %vm4874_vm13, %v4804_v51, %v1873_v14  ;;  %v1889_v6 = vmul.f32 %v5465_v26, %v1868_v9 }
 0x40f   : > { %v1882_v4 = vsel %vm1879_vm6, %v1881_v0, %v1877_v53  ;;  %v1421_v62 = vsub.f32 1.0, %v1420_v29  ;;  %v2318_v5 = vsel %vm4861_vm9, %v4802_v23, %v2313_v28  ;;  %v2302_v52 = vand.u32 2147483648, %v4850_v35 }
 0x410   : > { %v1408_v43 = vmul.f32 %v3058_v59, %v1407_v22  ;;  %v2329_v36 = vpack.c.bf16 %v2324_v8, %v4799_v18  ;;  %v1890_v47 = vmul.f32 %v4298_v25, %v1882_v4  ;;  %v2300_v9 = vand.u32 2147483647, %v4850_v35  ;;  %v5467_v22 = vld [vmem:[#allocation35_spill] sm:$0xff] }
 0x411   : > { %v1422_v45 = vmul.f32 %v4856_v17, %v1421_v62  ;;  %v4930_v23 = vsel %vm784_vm10, 1.0, %v3410_v40  ;;  %vm2296_vm5 = vweird.f32 %v4850_v35  ;;  %v2303_v33 = vor.u32 1.1754944e-38, %v2302_v52  ;;  %v5471_v52 = vld [vmem:[#allocation28_spill] sm:$0xff] }
 0x412   : > { %v1409_v21 = vadd.f32 %v3058_v59, %v1408_v43  ;;  %2373 = vmatmul.bf16.gmra.mxu3 %v2329_v36  ;;  %v1894_v38 = vpack.c.bf16 %v1890_v47, %v1889_v6  ;;  %v2326_v39 = vmul.f32 %v5467_v22, %v2318_v5  ;;  %vm1425_vm9 = vweird.f32 %v4856_v17 }
 0x413   : > { %v3062_v18 = vpop.eup %3061  ;;  %vm2301_vm11 = vcmp.eq.f32.partialorder %v2300_v9, 8.507059e+37  ;;  %v1430_v8 = vand.u32 2147483648, %v4815_v37  ;;  %vm1424_vm10 = vweird.f32 %v4815_v37  ;;  %v1428_v53 = vand.u32 2147483647, %v4815_v37  ;;  %v5470_v37 = vld [vmem:[#allocation25_spill] sm:$0xff] }
 0x414   : > { %v2292_v41 = vmul.f32 %v3062_v18, %v4850_v35  ;;  %v1088_v7 = vpop.f32.mrf.mxu3  ;;  %v4909_v12 = vpop.xlane.xlu2 %1333  ;;  %v1413_v58 = vsel %vm4901_vm3, %v3058_v59, %v1409_v21  ;;  %v5466_v59 = vld [vmem:[#allocation37_spill] sm:$0xff]  ;;  %vm2297_vm1 = vweird.f32 %v3062_v18  ;;  %v1423_v35 = vadd.f32 %v4856_v17, %v1422_v45  ;;  %vm4947_vm12 = vmor %vm1424_vm10, %vm1425_vm9 }
 0x415   : > { %v1108_v54 = vmul.f32 %v4736_v49, %v1088_v7  ;;  %3063 = vrcp.f32 %v4909_v12  ;;  %v1418_v34 = vsel %vm1415_vm0, %v1417_v15, %v1413_v58  ;;  %v1451_v31 = vmul.f32 %v5466_v59, %v1404_v46  ;;  %vm2298_vm7 = vmor %vm2296_vm5, %vm2297_vm1 }
 0x416   : > { %v2293_v24 = vsub.f32 1.0, %v2292_v41  ;;  %v1452_v20 = vmul.f32 %v4271_v16, %v1418_v34  ;;  %v1444_v32 = vand.u32 2147483648, %v4909_v12  ;;  %v1442_v56 = vand.u32 2147483647, %v4909_v12 }
 0x417   : > { %v1119_v50 = vadd.f32 %v4390_v55, %v1108_v54  ;;  %vm785_vm14 = vcmp.gt.f32.partialorder %v5470_v37, -1e+29  ;;  %v1431_v2 = vor.u32 1.1754944e-38, %v1430_v8  ;;  %vm1438_vm15 = vweird.f32 %v4909_v12 }
 0x418   : > { %v2294_v11 = vmul.f32 %v3062_v18, %v2293_v24  ;;  %v1457_v3 = vpack.c.bf16 %v1452_v20, %v1451_v31  ;;  %vm1429_vm4 = vcmp.eq.f32.partialorder %v1428_v53, 8.507059e+37  ;;  %v1445_v62 = vor.u32 1.1754944e-38, %v1444_v32 }
 0x419   : > { %v1130_v25 = vmul.f32 %v4443_v10, %v1119_v50  ;;  %v4960_v41 = vsel %vm785_vm14, 1.0, %v3410_v40  ;;  %vm1443_vm8 = vcmp.eq.f32.partialorder %v1442_v56, 8.507059e+37  ;;  %vm786_vm2 = vcmp.gt.f32.partialorder %v5471_v52, -1e+29 }
 0x41a   : > { %v2295_v14 = vadd.f32 %v3062_v18, %v2294_v11  ;;  %1501 = vmatmul.bf16.gmra.mxu1 %v1457_v3  ;;  %1942 = vmatmul.bf16.gmra.mxu2 %v1894_v38  ;;  %vm1197_vm0 = vcmask 130048   ;;  %v4975_v11 = vpop.permute.xlu1 %1520 }
 0x41b   : > { %v3064_v1 = vpop.eup %3063  ;;  %v1141_v16 = vadd.f32 %v4560_v61, %v1130_v25 }
 0x41c   : > { %v1434_v19 = vmul.f32 %v3064_v1, %v4909_v12  ;;  %v1090_v13 = vpop.f32.mrf.mxu3  ;;  %v2299_v63 = vsel %vm2298_vm7, %v3062_v18, %v2295_v14  ;;  %vm1439_vm13 = vweird.f32 %v3064_v1  ;;  %v5472_v14 = vld [vmem:[#allocation26_spill] sm:$0xff] }
 0x41d   : > { %v1157_v60 = vmin.f32 %v1141_v16, 0.0  ;;  %v1109_v42 = vmul.f32 %v4930_v23, %v1090_v13  ;;  %v2304_v43 = vsel %vm2301_vm11, %v2303_v33, %v2299_v63  ;;  %vm1440_vm6 = vmor %vm1438_vm15, %vm1439_vm13  ;;  %vm1149_vm3 = vcmp.gt.f32.partialorder %v1141_v16, 0.0 }
 0x41e   : > { %v1435_v29 = vsub.f32 1.0, %v1434_v19  ;;  %v2325_v48 = vmul.f32 %v4363_v27, %v2304_v43  ;;  %v1427_v27 = vsel %vm4947_vm12, %v4856_v17, %v1423_v35  ;;  %vm787_vm1 = vcmp.gt.f32.partialorder %v5472_v14, -1e+29  ;;  %v4990_v35 = vld [vmem:[%s5345_s5] ss:$0 sm:$0xff]  ;;  %v5473_v43 = vld [vmem:[#allocation29_spill] sm:$0xff] }
 0x41f   : > { %v1165_v36 = vmul.f32 1.442695, %v1157_v60  ;;  %v1120_v57 = vadd.f32 %v4390_v55, %v1109_v42  ;;  %v1432_v28 = vsel %vm1429_vm4, %v1431_v2, %v1427_v27  ;;  %v4984_v22 = vsel %vm787_vm1, 1.0, %v3410_v40  ;;  %v5007_v27 = vpop.permute.xlu0 %1956  ;;  %v5474_v2 = vld [vmem:[#allocation32_spill] sm:$0xff] }
 0x420   : > { %v1436_v21 = vmul.f32 %v3064_v1, %v1435_v29  ;;  %v2330_v51 = vpack.c.bf16 %v2326_v39, %v2325_v48  ;;  %v1453_v12 = vmul.f32 %v4261_v30, %v1432_v28  ;;  %v4970_v30 = vsel %vm786_vm2, 1.0, %v3410_v40  ;;  %v4997_v48 = vpop.permute.xlu2 %1531 }
 0x421   : > { %3065 = vpow2.f32 %v1165_v36  ;;  %v1131_v18 = vmul.f32 %v4443_v10, %v1120_v57  ;;  %vm788_vm7 = vcmp.gt.f32.partialorder %v5473_v43, -1e+29  ;;  %vm789_vm11 = vcmp.gt.f32.partialorder %v5474_v2, -1e+29 }
 0x422   : > { %v1437_v15 = vadd.f32 %v3064_v1, %v1436_v21  ;;  %2378 = vmatmul.bf16.gmra.mxu3 %v2330_v51  ;;  %v4993_v60 = vpop.permute.xlu1 %1967  ;;  %v5003_v32 = vsel %vm788_vm7, 1.0, %v3410_v40 }
 0x423   : > { %v1142_v4 = vadd.f32 %v4560_v61, %v1131_v18 }
 0x424   : > { %v1093_v17 = vpop.f32.mrf.mxu3  ;;  %v1441_v7 = vsel %vm1440_vm6, %v3064_v1, %v1437_v15 }
 0x425   : > { %v1158_v46 = vmin.f32 %v1142_v4, 0.0  ;;  %v1110_v58 = vmul.f32 %v4960_v41, %v1093_v17  ;;  %v1446_v54 = vsel %vm1443_vm8, %v1445_v62, %v1441_v7  ;;  %vm1150_vm5 = vcmp.gt.f32.partialorder %v1142_v4, 0.0  ;;  %v3130_v62 = vld [vmem:[%s5346_s6] ss:$0 sm:$0xff] }
 0x426   : > { %v1454_v26 = vmul.f32 %v4382_v44, %v1446_v54 }
 0x427   : > { %v3066_v6 = vpop.eup %3065  ;;  %v1167_v24 = vmul.f32 1.442695, %v1158_v46  ;;  %v1121_v34 = vadd.f32 %v4390_v55, %v1110_v58 }
 0x428   : > { %v2727_v47 = vadd.f32 -1.0, %v3066_v6  ;;  %v1458_v5 = vpack.c.bf16 %v1454_v26, %v1453_v12  ;;  %v5021_v6 = vpop.permute.xlu2 %1542 }
 0x429   : > { %3067 = vpow2.f32 %v1167_v24  ;;  %v1132_v50 = vmul.f32 %v4443_v10, %v1121_v34  ;;  %v5028_v24 = vsel %vm789_vm11, 1.0, %v3410_v40 }
 0x42a   : > { %v1189_v59 = vsel %vm1149_vm3, %v1141_v16, %v2727_v47  ;;  %1506 = vmatmul.bf16.gmra.mxu1 %v1458_v5  ;;  %v5016_v46 = vpop.permute.xlu1 %1978 }
 0x42b   : > { %v1143_v31 = vadd.f32 %v4560_v61, %v1132_v50  ;;  %1198 = vst.msk [vmem:[%s4666_s12] sm:$0xff] %vm1197_vm0, %v1189_v59 }
 0x42c   : > { %v1095_v44 = vpop.f32.mrf.mxu3 }
 0x42d   : > { %v1159_v20 = vmin.f32 %v1143_v31, 0.0  ;;  %v1111_v45 = vmul.f32 %v4970_v30, %v1095_v44  ;;  %vm1151_vm9 = vcmp.gt.f32.partialorder %v1143_v31, 0.0 }
 0x42f   : > { %v3068_v9 = vpop.eup %3067  ;;  %v1169_v25 = vmul.f32 1.442695, %v1159_v20  ;;  %v1122_v3 = vadd.f32 %v4390_v55, %v1111_v45 }
 0x430   : > { %v2728_v38 = vadd.f32 -1.0, %v3068_v9 }
 0x431   : > { %3069 = vpow2.f32 %v1169_v25  ;;  %v1133_v1 = vmul.f32 %v4443_v10, %v1122_v3  ;;  %v5475_v3 = vld [vmem:[#allocation31_spill] sm:$0xff] }
 0x432   : > { %v1190_v16 = vsel %vm1150_vm5, %v1142_v4, %v2728_v38  ;;  %vm790_vm12 = vcmp.gt.f32.partialorder %v5475_v3, -1e+29 }
 0x433   : > { %v1144_v33 = vadd.f32 %v4560_v61, %v1133_v1  ;;  %1199 = vst.msk [vmem:[%s4666_s12 + $0x8] sm:$0xff] %vm1197_vm0, %v1190_v16 }
 0x434   : > { %v1098_v39 = vpop.f32.mrf.mxu3 }
 0x435   : > { %v1160_v19 = vmin.f32 %v1144_v33, 0.0  ;;  %v1112_v55 = vmul.f32 %v4984_v22, %v1098_v39  ;;  %vm1152_vm10 = vcmp.gt.f32.partialorder %v1144_v33, 0.0 }
 0x437   : > { %v3070_v13 = vpop.eup %3069  ;;  %v1171_v63 = vmul.f32 1.442695, %v1160_v19  ;;  %v1123_v8 = vadd.f32 %v4990_v35, %v1112_v55 }
 0x438   : > { %v2729_v42 = vadd.f32 -1.0, %v3070_v13 }
 0x439   : > { %3071 = vpow2.f32 %v1171_v63  ;;  %v1134_v29 = vmul.f32 %v4443_v10, %v1123_v8 }
 0x43a   : > { %v1191_v53 = vsel %vm1151_vm9, %v1143_v31, %v2729_v42  ;;  %v5052_v42 = vsel %vm790_vm12, 1.0, %v3410_v40 }
 0x43b   : > { %v1145_v36 = vadd.f32 %v4560_v61, %v1134_v29  ;;  %1200 = vst.msk [vmem:[%s4666_s12 + $0x10] sm:$0xff] %vm1197_vm0, %v1191_v53 }
 0x43c   : > { %v1100_v57 = vpop.f32.mrf.mxu3  ;;  %v1928_v0 = vpop.f32.mrf.mxu2 }
 0x43d   : > { %v1161_v56 = vmin.f32 %v1145_v36, 0.0  ;;  %v1113_v21 = vmul.f32 %v5003_v32, %v1100_v57  ;;  %v1948_v51 = vmul.f32 %v4736_v49, %v1928_v0  ;;  %vm1153_vm13 = vcmp.gt.f32.partialorder %v1145_v36, 0.0 }
 0x43f   : > { %v3072_v10 = vpop.eup %3071  ;;  %v1173_v37 = vmul.f32 1.442695, %v1161_v56  ;;  %v1124_v18 = vadd.f32 %v4990_v35, %v1113_v21  ;;  %v1959_v28 = vadd.f32 %v5007_v27, %v1948_v51 }
 0x440   : > { %v2730_v15 = vadd.f32 -1.0, %v3072_v10  ;;  %v1492_v4 = vpop.f32.mrf.mxu1 }
 0x441   : > { %3073 = vpow2.f32 %v1173_v37  ;;  %v1135_v17 = vmul.f32 %v3130_v62, %v1124_v18  ;;  %v1512_v7 = vmul.f32 %v4736_v49, %v1492_v4  ;;  %v1970_v54 = vmul.f32 %v4993_v60, %v1959_v28 }
 0x442   : > { %v1192_v58 = vsel %vm1152_vm10, %v1144_v33, %v2730_v15 }
 0x443   : > { %v1146_v12 = vadd.f32 %v4560_v61, %v1135_v17  ;;  %v1523_v26 = vadd.f32 %v4975_v11, %v1512_v7  ;;  %1201 = vst.msk [vmem:[%s4666_s12 + $0x18] sm:$0xff] %vm1197_vm0, %v1192_v58  ;;  %v1981_v5 = vadd.f32 %v5016_v46, %v1970_v54 }
 0x444   : > { %v1103_v34 = vpop.f32.mrf.mxu3  ;;  %v1930_v47 = vpop.f32.mrf.mxu2 }
 0x445   : > { %v1162_v52 = vmin.f32 %v1146_v12, 0.0  ;;  %v1534_v50 = vmul.f32 %v4997_v48, %v1523_v26  ;;  %v1114_v59 = vmul.f32 %v5028_v24, %v1103_v34  ;;  %v1949_v31 = vmul.f32 %v4930_v23, %v1930_v47 }
 0x446   : > { %v1997_v44 = vmin.f32 %v1981_v5, 0.0  ;;  %vm1154_vm14 = vcmp.gt.f32.partialorder %v1146_v12, 0.0  ;;  %vm1989_vm15 = vcmp.gt.f32.partialorder %v1981_v5, 0.0 }
 0x447   : > { %v3074_v20 = vpop.eup %3073  ;;  %v1175_v45 = vmul.f32 1.442695, %v1162_v52  ;;  %v1125_v9 = vadd.f32 %v4990_v35, %v1114_v59  ;;  %v5036_v25 = vadd.f32 %v5021_v6, %v1534_v50  ;;  %v1960_v14 = vadd.f32 %v5007_v27, %v1949_v31 }
 0x448   : > { %v2731_v38 = vadd.f32 -1.0, %v3074_v20  ;;  %v1494_v1 = vpop.f32.mrf.mxu1  ;;  %v2005_v16 = vmul.f32 1.442695, %v1997_v44 }
 0x449   : > { %3075 = vpow2.f32 %v1175_v45  ;;  %v1136_v33 = vmul.f32 %v3130_v62, %v1125_v9  ;;  %v1513_v39 = vmul.f32 %v4930_v23, %v1494_v1  ;;  %v1971_v55 = vmul.f32 %v4993_v60, %v1960_v14 }
 0x44a   : > { %v1193_v19 = vsel %vm1153_vm13, %v1145_v36, %v2731_v38  ;;  %3077 = vpow2.f32 %v2005_v16  ;;  %v1561_v13 = vmin.f32 %v5036_v25, 0.0  ;;  %vm1553_vm4 = vcmp.gt.f32.partialorder %v5036_v25, 0.0 }
 0x44b   : > { %v5044_v63 = vadd.f32 %v4560_v61, %v1136_v33  ;;  %v1524_v8 = vadd.f32 %v4975_v11, %v1513_v39  ;;  %1202 = vst.msk [vmem:[%s4666_s12 + $0x20] sm:$0xff] %vm1197_vm0, %v1193_v19  ;;  %v5055_v36 = vadd.f32 %v5016_v46, %v1971_v55 }
 0x44c   : > { %v1105_v43 = vpop.f32.mrf.mxu3  ;;  %v1933_v29 = vpop.f32.mrf.mxu2  ;;  %v1569_v53 = vmul.f32 1.442695, %v1561_v13 }
 0x44d   : > { %v1163_v57 = vmin.f32 %v5044_v63, 0.0  ;;  %v1535_v0 = vmul.f32 %v4997_v48, %v1524_v8  ;;  %v1115_v56 = vmul.f32 %v5052_v42, %v1105_v43  ;;  %v1950_v21 = vmul.f32 %v4960_v41, %v1933_v29 }
 0x44e   : > { %3079 = vpow2.f32 %v1569_v53  ;;  %v1998_v51 = vmin.f32 %v5055_v36, 0.0  ;;  %vm1155_vm6 = vcmp.gt.f32.partialorder %v5044_v63, 0.0  ;;  %vm1990_vm2 = vcmp.gt.f32.partialorder %v5055_v36, 0.0 }
 0x44f   : > { %v3076_v10 = vpop.eup %3075  ;;  %v1177_v40 = vmul.f32 1.442695, %v1163_v57  ;;  %v1126_v37 = vadd.f32 %v4990_v35, %v1115_v56  ;;  %v5064_v18 = vadd.f32 %v5021_v6, %v1535_v0  ;;  %v1961_v4 = vadd.f32 %v5007_v27, %v1950_v21 }
 0x450   : > { %v3078_v2 = vpop.eup %3077  ;;  %v2732_v15 = vadd.f32 -1.0, %v3076_v10  ;;  %v1497_v28 = vpop.f32.mrf.mxu1  ;;  %v2007_v17 = vmul.f32 1.442695, %v1998_v51 }
 0x451   : > { %3081 = vpow2.f32 %v1177_v40  ;;  %v1137_v7 = vmul.f32 %v3130_v62, %v1126_v37  ;;  %v1514_v58 = vmul.f32 %v4960_v41, %v1497_v28  ;;  %v2743_v54 = vadd.f32 -1.0, %v3078_v2 }
 0x452   : > { %v1194_v26 = vsel %vm1154_vm14, %v1146_v12, %v2732_v15  ;;  %v1972_v34 = vmul.f32 %v4993_v60, %v1961_v4  ;;  %v1562_v35 = vmin.f32 %v5064_v18, 0.0  ;;  %3083 = vpow2.f32 %v2007_v17 }
 0x453   : > { %v1148_v47 = vadd.f32 %v4560_v61, %v1137_v7  ;;  %v1525_v52 = vadd.f32 %v4975_v11, %v1514_v58  ;;  %v2029_v50 = vsel %vm1989_vm15, %v1981_v5, %v2743_v54  ;;  %1203 = vst.msk [vmem:[%s4666_s12 + $0x28] sm:$0xff] %vm1197_vm0, %v1194_v26  ;;  %vm1554_vm8 = vcmp.gt.f32.partialorder %v5064_v18, 0.0 }
 0x454   : > { %v3080_v59 = vpop.eup %3079  ;;  %2045 = vrot.lane.b32.xlu2 %v2029_v50, %s3411_s19  ;;  %v1935_v62 = vpop.f32.mrf.mxu2  ;;  %v1571_v31 = vmul.f32 1.442695, %v1562_v35  ;;  %v1983_v12 = vadd.f32 %v5016_v46, %v1972_v34  ;;  %vm1633_vm15 = vcmask 261248  }
 0x455   : > { %v1164_v44 = vmin.f32 %v1148_v47, 0.0  ;;  %v1536_v20 = vmul.f32 %v4997_v48, %v1525_v52  ;;  %v1951_v45 = vmul.f32 %v4970_v30, %v1935_v62  ;;  %v2735_v61 = vadd.f32 -1.0, %v3080_v59  ;;  %v2364_v62 = vpop.f32.mrf.mxu3 }
 0x456   : > { %3085 = vpow2.f32 %v1571_v31  ;;  %v1999_v14 = vmin.f32 %v1983_v12, 0.0  ;;  %vm1156_vm3 = vcmp.gt.f32.partialorder %v1148_v47, 0.0  ;;  %vm1991_vm5 = vcmp.gt.f32.partialorder %v1983_v12, 0.0 }
 0x457   : > { %v3082_v5 = vpop.eup %3081  ;;  %v1179_v9 = vmul.f32 1.442695, %v1164_v44  ;;  %v1547_v3 = vadd.f32 %v5021_v6, %v1536_v20  ;;  %v1962_v38 = vadd.f32 %v5007_v27, %v1951_v45  ;;  %v1593_v16 = vsel %vm1553_vm4, %v5036_v25, %v2735_v61 }
 0x458   : > { %v2733_v1 = vadd.f32 -1.0, %v3082_v5  ;;  %v1499_v33 = vpop.f32.mrf.mxu1  ;;  %v3084_v39 = vpop.eup %3083  ;;  %1609 = vrot.lane.b32.xlu0 %v1593_v16, %s3412_s23  ;;  %v2009_v43 = vmul.f32 1.442695, %v1999_v14 }
 0x459   : > { %3087 = vpow2.f32 %v1179_v9  ;;  %v1973_v19 = vmul.f32 %v4993_v60, %v1962_v38  ;;  %v1515_v55 = vmul.f32 %v4970_v30, %v1499_v33  ;;  %v1563_v8 = vmin.f32 %v1547_v3, 0.0 }
 0x45a   : > { %v1195_v13 = vsel %vm1155_vm6, %v5044_v63, %v2733_v1  ;;  %v2744_v57 = vadd.f32 -1.0, %v3084_v39  ;;  %3089 = vpow2.f32 %v2009_v43  ;;  %vm1555_vm1 = vcmp.gt.f32.partialorder %v1547_v3, 0.0 }
 0x45b   : > { %v1984_v29 = vadd.f32 %v5016_v46, %v1973_v19  ;;  %v1526_v25 = vadd.f32 %v4975_v11, %v1515_v55  ;;  %1204 = vst.msk [vmem:[%s4666_s12 + $0x30] sm:$0xff] %vm1197_vm0, %v1195_v13  ;;  %v1573_v0 = vmul.f32 1.442695, %v1563_v8  ;;  %v5115_v13 = vpop.permute.xlu0 %2392 }
 0x45c   : > { %v3086_v53 = vpop.eup %3085  ;;  %v2030_v2 = vsel %vm1990_vm2, %v5055_v36, %v2744_v57  ;;  %vm2069_vm2 = vcmask 392448  }
 0x45d   : > { %v1537_v56 = vmul.f32 %v4997_v48, %v1526_v25  ;;  %v2736_v21 = vadd.f32 -1.0, %v3086_v53  ;;  %3091 = vpow2.f32 %v1573_v0  ;;  %v2000_v51 = vmin.f32 %v1984_v29, 0.0  ;;  %v2366_v31 = vpop.f32.mrf.mxu3 }
 0x45e   : > { %vm1992_vm9 = vcmp.gt.f32.partialorder %v1984_v29, 0.0  ;;  %v2385_v53 = vmul.f32 %v4930_v23, %v2366_v31 }
 0x45f   : > { %v3088_v63 = vpop.eup %3087  ;;  %v1594_v10 = vsel %vm1554_vm8, %v5064_v18, %v2736_v21  ;;  %v1548_v40 = vadd.f32 %v5021_v6, %v1537_v56  ;;  %v2011_v15 = vmul.f32 1.442695, %v2000_v51 }
 0x460   : > { %v2734_v37 = vadd.f32 -1.0, %v3088_v63  ;;  %1611 = vrot.lane.b32.xlu1 %v1594_v10, %s3412_s23  ;;  %2047 = vrot.lane.b32.xlu0 %v2030_v2, %s3411_s19  ;;  %v3090_v28 = vpop.eup %3089  ;;  %v2396_v2 = vadd.f32 %v5115_v13, %v2385_v53 }
 0x461   : > { %v1564_v4 = vmin.f32 %v1548_v40, 0.0  ;;  %3093 = vpow2.f32 %v2011_v15  ;;  %v2745_v7 = vadd.f32 -1.0, %v3090_v28  ;;  %vm1556_vm7 = vcmp.gt.f32.partialorder %v1548_v40, 0.0 }
 0x462   : > { %v1196_v17 = vsel %vm1156_vm3, %v1148_v47, %v2734_v37 }
 0x463   : > { %v1575_v58 = vmul.f32 1.442695, %v1564_v4  ;;  %1205 = vst.msk [vmem:[%s4666_s12 + $0x38] sm:$0xff] %vm1197_vm0, %v1196_v17  ;;  %v3092_v18 = vpop.eup %3091  ;;  %v2031_v34 = vsel %vm1991_vm5, %v1983_v12, %v2745_v7 }
 0x464   : > { %v2737_v54 = vadd.f32 -1.0, %v3092_v18  ;;  %v2384_v18 = vmul.f32 %v4736_v49, %v2364_v62 }
 0x465   : > { %3095 = vpow2.f32 %v1575_v58  ;;  %v2369_v44 = vpop.f32.mrf.mxu3 }
 0x466   : > { %v1595_v26 = vsel %vm1555_vm1, %v1547_v3, %v2737_v54  ;;  %v5135_v54 = vpop.permute.xlu0 %2403 }
 0x467   : > { %v3094_v36 = vpop.eup %3093  ;;  %1613 = vrot.lane.b32.xlu2 %v1595_v26, %s3412_s23 }
 0x468   : > { %2049 = vrot.lane.b32.xlu1 %v2031_v34, %s3411_s19  ;;  %v2746_v52 = vadd.f32 -1.0, %v3094_v36  ;;  %v2407_v36 = vmul.f32 %v5135_v54, %v2396_v2 }
 0x46a   : > { %v2032_v59 = vsel %vm1992_vm9, %v1984_v29, %v2746_v52 }
 0x46b   : > { %v3096_v35 = vpop.eup %3095 }
 0x46c   : > { %v2738_v47 = vadd.f32 -1.0, %v3096_v35  ;;  %v2386_v35 = vmul.f32 %v4960_v41, %v2369_v44 }
 0x46d   : > { %v5105_v12 = vpop.f32.mrf.mxu3 }
 0x46e   : > { %v1596_v50 = vsel %vm1556_vm7, %v1548_v40, %v2738_v47 }
 0x46f   : > { %1615 = vrot.lane.b32.xlu0 %v1596_v50, %s3412_s23  ;;  %2051 = vrot.lane.b32.xlu2 %v2032_v59, %s3411_s19 }
 0x48d   : > { %v1938_v20 = vpop.f32.mrf.mxu2 }
 0x48e   : > { %v1952_v45 = vmul.f32 %v4984_v22, %v1938_v20 }
 0x490   : > { %v1963_v61 = vadd.f32 %v5007_v27, %v1952_v45  ;;  %v2395_v45 = vadd.f32 %v5115_v13, %v2384_v18 }
 0x492   : > { %v1974_v5 = vmul.f32 %v4993_v60, %v1963_v61  ;;  %v5151_v61 = vpop.permute.xlu2 %2414 }
 0x494   : > { %v1985_v3 = vadd.f32 %v5016_v46, %v1974_v5  ;;  %v5155_v5 = vadd.f32 %v5151_v61, %v2407_v36 }
 0x495   : > { %v2374_v9 = vpop.f32.mrf.mxu3  ;;  %v1940_v38 = vpop.f32.mrf.mxu2 }
 0x496   : > { %v1953_v14 = vmul.f32 %v5003_v32, %v1940_v38  ;;  %v2001_v16 = vmin.f32 %v1985_v3, 0.0  ;;  %vm1993_vm0 = vcmp.gt.f32.partialorder %v1985_v3, 0.0  ;;  %v2388_v50 = vmul.f32 %v4984_v22, %v2374_v9 }
 0x497   : > { %v1502_v1 = vpop.f32.mrf.mxu1  ;;  %v2434_v53 = vmin.f32 %v5155_v5, 0.0  ;;  %vm2426_vm6 = vcmp.gt.f32.partialorder %v5155_v5, 0.0 }
 0x498   : > { %v1516_v33 = vmul.f32 %v4984_v22, %v1502_v1  ;;  %v1964_v39 = vadd.f32 %v5007_v27, %v1953_v14  ;;  %v2013_v19 = vmul.f32 1.442695, %v2001_v16  ;;  %v2397_v22 = vadd.f32 %v5115_v13, %v2386_v35 }
 0x499   : > { %v2399_v38 = vadd.f32 %v5115_v13, %v2388_v50 }
 0x49a   : > { %v1527_v55 = vadd.f32 %v4975_v11, %v1516_v33  ;;  %v1975_v8 = vmul.f32 %v4993_v60, %v1964_v39  ;;  %3097 = vpow2.f32 %v2013_v19 }
 0x49c   : > { %v1538_v43 = vmul.f32 %v4997_v48, %v1527_v55  ;;  %v5122_v25 = vadd.f32 %v5016_v46, %v1975_v8  ;;  %v2406_v55 = vmul.f32 %v5135_v54, %v2395_v45 }
 0x49d   : > { %v5119_v29 = vpop.f32.mrf.mxu3  ;;  %v1943_v57 = vpop.f32.mrf.mxu2 }
 0x49e   : > { %v1549_v0 = vadd.f32 %v5021_v6, %v1538_v43  ;;  %v1954_v56 = vmul.f32 %v5028_v24, %v1943_v57  ;;  %v2002_v10 = vmin.f32 %v5122_v25, 0.0  ;;  %v2408_v43 = vmul.f32 %v5135_v54, %v2397_v22 }
 0x49f   : > { %v1504_v21 = vpop.f32.mrf.mxu1  ;;  %v2387_v57 = vmul.f32 %v4970_v30, %v5105_v12  ;;  %vm1994_vm10 = vcmp.gt.f32.partialorder %v5122_v25, 0.0 }
 0x4a0   : > { %v1517_v51 = vmul.f32 %v5003_v32, %v1504_v21  ;;  %v1565_v63 = vmin.f32 %v1549_v0, 0.0  ;;  %v3098_v40 = vpop.eup %3097  ;;  %v1965_v37 = vadd.f32 %v5007_v27, %v1954_v56  ;;  %v2015_v58 = vmul.f32 1.442695, %v2002_v10 }
 0x4a1   : > { %v2747_v4 = vadd.f32 -1.0, %v3098_v40  ;;  %vm1557_vm11 = vcmp.gt.f32.partialorder %v1549_v0, 0.0  ;;  %v2410_v56 = vmul.f32 %v5135_v54, %v2399_v38 }
 0x4a2   : > { %v1528_v15 = vadd.f32 %v4975_v11, %v1517_v51  ;;  %v1577_v23 = vmul.f32 1.442695, %v1565_v63  ;;  %v1976_v28 = vmul.f32 %v4993_v60, %v1965_v37  ;;  %v2389_v63 = vmul.f32 %v5003_v32, %v5119_v29 }
 0x4a3   : > { %v2033_v7 = vsel %vm1993_vm0, %v1985_v3, %v2747_v4  ;;  %v5179_v37 = vadd.f32 %v5151_v61, %v2406_v55  ;;  %v5183_v4 = vadd.f32 %v5151_v61, %v2408_v43 }
 0x4a4   : > { %v1539_v17 = vmul.f32 %v4997_v48, %v1528_v15  ;;  %3099 = vpow2.f32 %v1577_v23  ;;  %v5138_v26 = vadd.f32 %v5016_v46, %v1976_v28  ;;  %2053 = vrot.lane.b32.xlu0 %v2033_v7, %s3411_s19  ;;  %v2443_v15 = vmul.f32 1.442695, %v2434_v53 }
 0x4a5   : > { %v5141_v34 = vpop.f32.mrf.mxu3  ;;  %v1945_v47 = vpop.f32.mrf.mxu2  ;;  %3101 = vpow2.f32 %v2015_v58  ;;  %v5187_v23 = vadd.f32 %v5151_v61, %v2410_v56  ;;  %v2433_v35 = vmin.f32 %v5179_v37, 0.0  ;;  %vm2425_vm3 = vcmp.gt.f32.partialorder %v5179_v37, 0.0 }
 0x4a6   : > { %v1550_v52 = vadd.f32 %v5021_v6, %v1539_v17  ;;  %v1955_v49 = vmul.f32 %v5052_v42, %v1945_v47  ;;  %v2003_v20 = vmin.f32 %v5138_v26, 0.0  ;;  %v2390_v50 = vmul.f32 %v5028_v24, %v5141_v34 }
 0x4a7   : > { %v1507_v59 = vpop.f32.mrf.mxu1  ;;  %v2441_v45 = vmul.f32 1.442695, %v2433_v35  ;;  %vm1995_vm13 = vcmp.gt.f32.partialorder %v5138_v26, 0.0  ;;  %vm2429_vm1 = vcmp.gt.f32.partialorder %v5187_v23, 0.0  ;;  %vm2427_vm5 = vcmp.gt.f32.partialorder %v5183_v4, 0.0 }
 0x4a8   : > { %v1518_v62 = vmul.f32 %v5028_v24, %v1507_v59  ;;  %v1566_v31 = vmin.f32 %v1550_v52, 0.0  ;;  %v1966_v41 = vadd.f32 %v5007_v27, %v1955_v49  ;;  %v2017_v33 = vmul.f32 1.442695, %v2003_v20 }
 0x4a9   : > { %vm1558_vm12 = vcmp.gt.f32.partialorder %v1550_v52, 0.0  ;;  %v2401_v34 = vadd.f32 %v5115_v13, %v2390_v50 }
 0x4aa   : > { %v3100_v44 = vpop.eup %3099  ;;  %v1529_v9 = vadd.f32 %v4975_v11, %v1518_v62  ;;  %v1579_v3 = vmul.f32 1.442695, %v1566_v31  ;;  %v1977_v14 = vmul.f32 %v4993_v60, %v1966_v41 }
 0x4ab   : > { %v2739_v1 = vadd.f32 -1.0, %v3100_v44  ;;  %v3102_v8 = vpop.eup %3101 }
 0x4ac   : > { %v1540_v16 = vmul.f32 %v4997_v48, %v1529_v9  ;;  %3103 = vpow2.f32 %v1579_v3  ;;  %v5163_v19 = vadd.f32 %v5016_v46, %v1977_v14  ;;  %v2748_v10 = vadd.f32 -1.0, %v3102_v8 }
 0x4ad   : > { %v2381_v27 = vpop.f32.mrf.mxu3  ;;  %v1597_v39 = vsel %vm1557_vm11, %v1549_v0, %v2739_v1  ;;  %3105 = vpow2.f32 %v2017_v33  ;;  %v2412_v33 = vmul.f32 %v5135_v54, %v2401_v34 }
 0x4ae   : > { %1617 = vrot.lane.b32.xlu1 %v1597_v39, %s3412_s23  ;;  %v1551_v60 = vadd.f32 %v5021_v6, %v1540_v16  ;;  %v2391_v46 = vmul.f32 %v5052_v42, %v2381_v27  ;;  %v2004_v40 = vmin.f32 %v5163_v19, 0.0  ;;  %v2034_v7 = vsel %vm1994_vm10, %v5122_v25, %v2748_v10  ;;  %v5204_v59 = vpop.permute.xlu2 %2045 }
 0x4af   : > { %v1509_v0 = vpop.f32.mrf.mxu1  ;;  %vm1996_vm8 = vcmp.gt.f32.partialorder %v5163_v19, 0.0  ;;  %vm2505_vm10 = vcmask 523648  }
 0x4b0   : > { %v1519_v21 = vmul.f32 %v5052_v42, %v1509_v0  ;;  %v1567_v51 = vmin.f32 %v1551_v60, 0.0  ;;  %v2398_v42 = vadd.f32 %v5115_v13, %v2387_v57  ;;  %v2402_v29 = vadd.f32 %v5115_v13, %v2391_v46 }
 0x4b1   : > { %v2019_v58 = vmul.f32 1.442695, %v2004_v40  ;;  %vm1559_vm14 = vcmp.gt.f32.partialorder %v1551_v60, 0.0  ;;  %v5228_v57 = vadd.f32 %v5151_v61, %v2412_v33 }
 0x4b2   : > { %v3104_v2 = vpop.eup %3103  ;;  %v1530_v30 = vadd.f32 %v4975_v11, %v1519_v21  ;;  %v1581_v12 = vmul.f32 1.442695, %v1567_v51  ;;  %v2400_v11 = vadd.f32 %v5115_v13, %v2389_v63  ;;  %v2409_v47 = vmul.f32 %v5135_v54, %v2398_v42 }
 0x4b3   : > { %v2740_v32 = vadd.f32 -1.0, %v3104_v2  ;;  %v3106_v18 = vpop.eup %3105  ;;  %vm2431_vm11 = vcmp.gt.f32.partialorder %v5228_v57, 0.0 }
 0x4b4   : > { %v1541_v28 = vmul.f32 %v4997_v48, %v1530_v30  ;;  %3107 = vpow2.f32 %v1581_v12  ;;  %v2437_v48 = vmin.f32 %v5187_v23, 0.0  ;;  %v2411_v49 = vmul.f32 %v5135_v54, %v2400_v11 }
 0x4b5   : > { %v1598_v17 = vsel %vm1558_vm12, %v1550_v52, %v2740_v32  ;;  %v2413_v52 = vmul.f32 %v5135_v54, %v2402_v29  ;;  %3109 = vpow2.f32 %v2443_v15  ;;  %v2749_v62 = vadd.f32 -1.0, %v3106_v18 }
 0x4b6   : > { %1619 = vrot.lane.b32.xlu2 %v1598_v17, %s3412_s23  ;;  %2055 = vrot.lane.b32.xlu1 %v2034_v7, %s3411_s19  ;;  %v1552_v36 = vadd.f32 %v5021_v6, %v1541_v28  ;;  %3111 = vpow2.f32 %v2019_v58  ;;  %v2435_v6 = vmin.f32 %v5183_v4, 0.0  ;;  %v5208_v41 = vadd.f32 %v5151_v61, %v2409_v47 }
 0x4b7   : > { %v2449_v24 = vmul.f32 1.442695, %v2437_v48  ;;  %v5213_v22 = vadd.f32 %v5151_v61, %v2413_v52  ;;  %v2035_v3 = vsel %vm1995_vm13, %v5138_v26, %v2749_v62  ;;  %v5217_v14 = vadd.f32 %v5151_v61, %v2411_v49 }
 0x4b8   : > { %v1568_v25 = vmin.f32 %v1552_v36, 0.0  ;;  %v2445_v38 = vmul.f32 1.442695, %v2435_v6  ;;  %v2436_v13 = vmin.f32 %v5208_v41, 0.0  ;;  %vm1560_vm4 = vcmp.gt.f32.partialorder %v1552_v36, 0.0 }
 0x4b9   : > { %v2440_v26 = vmin.f32 %v5213_v22, 0.0  ;;  %v2438_v55 = vmin.f32 %v5217_v14, 0.0  ;;  %vm2428_vm7 = vcmp.gt.f32.partialorder %v5208_v41, 0.0  ;;  %vm2432_vm9 = vcmp.gt.f32.partialorder %v5213_v22, 0.0 }
 0x4ba   : > { %v3108_v31 = vpop.eup %3107  ;;  %v1583_v20 = vmul.f32 1.442695, %v1568_v25  ;;  %v2447_v53 = vmul.f32 1.442695, %v2436_v13  ;;  %vm2430_vm0 = vcmp.gt.f32.partialorder %v5217_v14, 0.0 }
 0x4bb   : > { %v2741_v44 = vadd.f32 -1.0, %v3108_v31  ;;  %v3110_v1 = vpop.eup %3109  ;;  %v2455_v54 = vmul.f32 1.442695, %v2440_v26  ;;  %v2451_v21 = vmul.f32 1.442695, %v2438_v55 }
 0x4bc   : > { %3113 = vpow2.f32 %v1583_v20  ;;  %v3112_v16 = vpop.eup %3111  ;;  %v2752_v39 = vadd.f32 -1.0, %v3110_v1 }
 0x4bd   : > { %v1599_v9 = vsel %vm1559_vm14, %v1551_v60, %v2741_v44  ;;  %3115 = vpow2.f32 %v2441_v45  ;;  %v2750_v43 = vadd.f32 -1.0, %v3112_v16 }
 0x4be   : > { %1621 = vrot.lane.b32.xlu0 %v1599_v9, %s3412_s23  ;;  %2057 = vrot.lane.b32.xlu2 %v2035_v3, %s3411_s19  ;;  %3117 = vpow2.f32 %v2449_v24  ;;  %v2466_v46 = vsel %vm2426_vm6, %v5155_v5, %v2752_v39  ;;  %v2439_v5 = vmin.f32 %v5228_v57, 0.0 }
 0x4bf   : > { %3119 = vpow2.f32 %v2445_v38  ;;  %v2036_v61 = vsel %vm1996_vm8, %v5163_v19, %v2750_v43 }
 0x4c0   : > { %3121 = vpow2.f32 %v2447_v53  ;;  %v2453_v19 = vmul.f32 1.442695, %v2439_v5 }
 0x4c1   : > { %v1614_v27 = vpop.permute.xlu2 %1613  ;;  %3123 = vpow2.f32 %v2455_v54 }
 0x4c2   : > { %v3114_v8 = vpop.eup %3113  ;;  %1636 = vst.msk [vmem:[%s4666_s12 + $0x10] sm:$0xff] %vm1633_vm15, %v1614_v27  ;;  %3125 = vpow2.f32 %v2451_v21 }
 0x4c3   : > { %v2742_v60 = vadd.f32 -1.0, %v3114_v8  ;;  %v3116_v56 = vpop.eup %3115  ;;  %3127 = vpow2.f32 %v2453_v19 }
 0x4c4   : > { %v3118_v51 = vpop.eup %3117  ;;  %v2751_v10 = vadd.f32 -1.0, %v3116_v56 }
 0x4c5   : > { %v1600_v0 = vsel %vm1560_vm4, %v1552_v36, %v2742_v60  ;;  %v3120_v63 = vpop.eup %3119  ;;  %v2755_v40 = vadd.f32 -1.0, %v3118_v51 }
 0x4c6   : > { %1623 = vrot.lane.b32.xlu1 %v1600_v0, %s3412_s23  ;;  %2483 = vrot.lane.b32.xlu2 %v2466_v46, %s3413_s16  ;;  %v2753_v30 = vadd.f32 -1.0, %v3120_v63  ;;  %v3122_v12 = vpop.eup %3121  ;;  %v2465_v15 = vsel %vm2425_vm3, %v5179_v37, %v2751_v10 }
 0x4c7   : > { %2059 = vrot.lane.b32.xlu0 %v2036_v61, %s3411_s19  ;;  %v2469_v42 = vsel %vm2429_vm1, %v5187_v23, %v2755_v40  ;;  %v3124_v32 = vpop.eup %3123  ;;  %v2754_v17 = vadd.f32 -1.0, %v3122_v12 }
 0x4c8   : > { %v2467_v29 = vsel %vm2427_vm5, %v5183_v4, %v2753_v30  ;;  %v3126_v28 = vpop.eup %3125  ;;  %v2758_v7 = vadd.f32 -1.0, %v3124_v32 }
 0x4c9   : > { %v2756_v23 = vadd.f32 -1.0, %v3126_v28  ;;  %v2468_v4 = vsel %vm2428_vm7, %v5208_v41, %v2754_v17  ;;  %v3128_v18 = vpop.eup %3127  ;;  %v2052_v52 = vpop.permute.xlu2 %2051 }
 0x4ca   : > { %v1610_v2 = vpop.permute.xlu0 %1609  ;;  %v2472_v58 = vsel %vm2432_vm9, %v5213_v22, %v2758_v7  ;;  %v2757_v47 = vadd.f32 -1.0, %v3128_v18 }
 0x4cb   : > { %1634 = vst.msk [vmem:[%s4666_s12] sm:$0xff] %vm1633_vm15, %v1610_v2  ;;  %v2470_v36 = vsel %vm2430_vm0, %v5217_v14, %v2756_v23 }
 0x4cc   : > { %2070 = vst.msk [vmem:[%s4666_s12] sm:$0xff] %vm2069_vm2, %v5204_v59  ;;  %v2471_v48 = vsel %vm2431_vm11, %v5228_v57, %v2757_v47 }
 0x4ce   : > { %2481 = vrot.lane.b32.xlu1 %v2465_v15, %s3413_s16  ;;  %2489 = vrot.lane.b32.xlu2 %v2469_v42, %s3413_s16 }
 0x4cf   : > { %2485 = vrot.lane.b32.xlu0 %v2467_v29, %s3413_s16 }
 0x4d2   : > { %v1612_v11 = vpop.permute.xlu1 %1611  ;;  %v2048_v37 = vpop.permute.xlu0 %2047 }
 0x4d3   : > { %1635 = vst.msk [vmem:[%s4666_s12 + $0x8] sm:$0xff] %vm1633_vm15, %v1612_v11 }
 0x4d4   : > { %2071 = vst.msk [vmem:[%s4666_s12 + $0x8] sm:$0xff] %vm2069_vm2, %v2048_v37 }
 0x4d6   : > { %2487 = vrot.lane.b32.xlu1 %v2468_v4, %s3413_s16  ;;  %2495 = vrot.lane.b32.xlu2 %v2472_v58, %s3413_s16 }
 0x4d7   : > { %2491 = vrot.lane.b32.xlu0 %v2470_v36, %s3413_s16 }
 0x4da   : > { %v2050_v35 = vpop.permute.xlu1 %2049 }
 0x4db   : > { %2072 = vst.msk [vmem:[%s4666_s12 + $0x10] sm:$0xff] %vm2069_vm2, %v2050_v35 }
 0x4de   : > { %2493 = vrot.lane.b32.xlu1 %v2471_v48, %s3413_s16 }
 0x4e1   : > { %v1616_v50 = vpop.permute.xlu0 %1615 }
 0x4e2   : > { %1637 = vst.msk [vmem:[%s4666_s12 + $0x18] sm:$0xff] %vm1633_vm15, %v1616_v50 }
 0x4e3   : > { %2073 = vst.msk [vmem:[%s4666_s12 + $0x18] sm:$0xff] %vm2069_vm2, %v2052_v52 }
 0x510   : > { %v1620_v25 = vpop.permute.xlu2 %1619 }
 0x511   : > { %1639 = vst.msk [vmem:[%s4666_s12 + $0x28] sm:$0xff] %vm1633_vm15, %v1620_v25 }
 0x516   : > { %v2054_v6 = vpop.permute.xlu0 %2053 }
 0x518   : > { %v2058_v49 = vpop.permute.xlu2 %2057 }
 0x520   : > { %v1618_v59 = vpop.permute.xlu1 %1617  ;;  %v2484_v62 = vpop.permute.xlu2 %2483 }
 0x521   : > { %1638 = vst.msk [vmem:[%s4666_s12 + $0x20] sm:$0xff] %vm1633_vm15, %v1618_v59 }
 0x522   : > { %2074 = vst.msk [vmem:[%s4666_s12 + $0x20] sm:$0xff] %vm2069_vm2, %v2054_v6 }
 0x523   : > { %2507 = vst.msk [vmem:[%s4666_s12 + $0x8] sm:$0xff] %vm2505_vm10, %v2484_v62 }
 0x528   : > { %v2056_v31 = vpop.permute.xlu1 %2055  ;;  %v2490_v20 = vpop.permute.xlu2 %2489 }
 0x529   : > { %2075 = vst.msk [vmem:[%s4666_s12 + $0x28] sm:$0xff] %vm2069_vm2, %v2056_v31 }
 0x52a   : > { %2510 = vst.msk [vmem:[%s4666_s12 + $0x20] sm:$0xff] %vm2505_vm10, %v2490_v20 }
 0x530   : > { %v1622_v45 = vpop.permute.xlu0 %1621  ;;  %v2496_v24 = vpop.permute.xlu2 %2495 }
 0x531   : > { %1640 = vst.msk [vmem:[%s4666_s12 + $0x30] sm:$0xff] %vm1633_vm15, %v1622_v45 }
 0x532   : > { %2076 = vst.msk [vmem:[%s4666_s12 + $0x30] sm:$0xff] %vm2069_vm2, %v2058_v49 }
 0x538   : > { %v1624_v41 = vpop.permute.xlu1 %1623 }
 0x539   : > { %1641 = vst.msk [vmem:[%s4666_s12 + $0x38] sm:$0xff] %vm1633_vm15, %v1624_v41  ;;  %v2060_v44 = vpop.permute.xlu0 %2059 }
 0x53a   : > { %2077 = vst.msk [vmem:[%s4666_s12 + $0x38] sm:$0xff] %vm2069_vm2, %v2060_v44 }
 0x53b   : > { %2513 = vst.msk [vmem:[%s4666_s12 + $0x38] sm:$0xff] %vm2505_vm10, %v2496_v24 }
 0x540   : > { %v2482_v34 = vpop.permute.xlu1 %2481 }
 0x541   : > { %2506 = vst.msk [vmem:[%s4666_s12] sm:$0xff] %vm2505_vm10, %v2482_v34  ;;  %v2486_v22 = vpop.permute.xlu0 %2485 }
 0x542   : > { %2508 = vst.msk [vmem:[%s4666_s12 + $0x10] sm:$0xff] %vm2505_vm10, %v2486_v22 }
 0x548   : > { %v2488_v9 = vpop.permute.xlu1 %2487 }
 0x549   : > { %2509 = vst.msk [vmem:[%s4666_s12 + $0x18] sm:$0xff] %vm2505_vm10, %v2488_v9  ;;  %v2492_v3 = vpop.permute.xlu0 %2491 }
 0x54a   : > { %2511 = vst.msk [vmem:[%s4666_s12 + $0x28] sm:$0xff] %vm2505_vm10, %v2492_v3 }
 0x550   : > { %v2494_v38 = vpop.permute.xlu1 %2493 }
 0x551   : > { %2512 = vst.msk [vmem:[%s4666_s12 + $0x30] sm:$0xff] %vm2505_vm10, %v2494_v38 }
 0x552   : > { %3338 = shalt.err (!%p3335_p9)
}
 0x553   : > { %s3414_s29 = smov 128   ;;  %s3415_s12 = smov 8  }
 0x554   : > { %2815 = dma.vmem_to_hbm [thread:$0]  (%p3556_p3), %s2528_s28, 1024, %s2530_s26, %s2515_s11, %s3414_s29, %s3414_s29, %s3415_s12  }
 0x555 PF: > { %s5477_s17 = sld [smem:[#allocation21_spill]]  ;;  %s2544_s24 = sand.u32 1, %s3381_s30  }
 0x556   : > { %s2545_s19 = scalar_lea.sflag [#allocation4], %s2544_s24 }
 0x55b   : > { %p5478_p12 = scmp.ge.s32.totalorder %s5477_s17, 2 }
 0x55d   : > { %p2838_p13 = pnand %p5478_p12, %p3501_p6 }
 0x55f   : > { %p2839_p0 = pneg %p2838_p13 }
 0x561   : > { %3376 = dma.done.wait (%p2839_p0), %s2545_s19, 1024  }
 0x562   : > { %3378 = vsyncadd (%p2839_p0), %s2545_s19, 4294966272  ;;  %s5479_s12 = sld [smem:[#allocation23_spill]]  ;;  %s5482_s30 = smov %s3385_s10 }
 0x563   : > { %s5480_s23 = sld [smem:[#allocation20_spill]] }
 0x564   : > { %s5481_s11 = sld [smem:[#allocation24_spill]] }
 0x568   : > { %p27_p5 = scmp.ge.s32.totalorder %s5479_s12, 4  }
 0x569   : > { %s5483_s10 = smov %s5480_s23 }
 0x56a   :  { %29 = sbr.rel (!%p27_p5) target bundleno = 14 (0xe), region = 131 }
 0x56f   :  { %2551 = vsyncpa [#allocation3], 1 }
 0x570   :  { %2553 = vsyncpa [#allocation3 + $0x1], 1 }
 0x571   :  { %2554 = vsyncpa [#allocation6], 1 }
 0x572   :  { %2556 = vsyncpa [#allocation6 + $0x1], 1 }
 0x573   :  { %2557 = vsyncpa [#allocation9], 1 }
 0x574   :  { %2558 = vsyncpa [#allocation12], 1 }
 0x575   :  { %2560 = vsyncpa [#allocation12 + $0x1], 1 }
 0x576   :  { %2561 = vsyncpa [#allocation4], 1 }
 0x577   :  { %2563 = vsyncpa [#allocation4 + $0x1], 1 }

</bundles_post_ra>
